<compile_context>
chip_gen: v7x
topology: tpu7x:2x2x1
jax: 0.10.0
libtpu: 0.0.40
codegen_flags: <defaults>
</compile_context>

<pallas_src>
import functools

import jax
import jax.numpy as jnp
from jax.experimental import pallas as pl
from jax.experimental.pallas import tpu as pltpu


def _round_up(v, m):
    return (v + m - 1) // m * m


# ----------------------------------------------------------------------------
# RoI max pooling kernel (channels-last, two-stage reduction, lane-dense out)
# ----------------------------------------------------------------------------
def _roi_pool_kernel(batch_idx_ref, rois_ref, x_ref, out_ref, *,
                     roi_size, spatial_scale, height, width, channels):
    del batch_idx_ref                       # only used inside the index_maps
    r = pl.program_id(0)
    S = roi_size
    base = 4 * r

    x1 = rois_ref[base + 0] * spatial_scale
    y1 = rois_ref[base + 1] * spatial_scale
    x2 = rois_ref[base + 2] * spatial_scale
    y2 = rois_ref[base + 3] * spatial_scale

    # torchvision RoIPool uses std::round; ROI coords are non-negative so
    # floor(v + 0.5) reproduces round-half-away-from-zero.
    roi_start_w = jnp.floor(x1 + 0.5).astype(jnp.int32)
    roi_start_h = jnp.floor(y1 + 0.5).astype(jnp.int32)
    roi_end_w = jnp.floor(x2 + 0.5).astype(jnp.int32)
    roi_end_h = jnp.floor(y2 + 0.5).astype(jnp.int32)

    roi_w = jnp.maximum(roi_end_w - roi_start_w + 1, 1)
    roi_h = jnp.maximum(roi_end_h - roi_start_h + 1, 1)
    bin_w = roi_w.astype(jnp.float32) / float(S)
    bin_h = roi_h.astype(jnp.float32) / float(S)

    # Per-bin edges (traced scalars).  Matches torchvision: floor/ceil + clip.
    hstarts, hends, wstarts, wends = [], [], [], []
    for p in range(S):
        hstarts.append(jnp.clip(
            jnp.floor(p * bin_h).astype(jnp.int32) + roi_start_h, 0, height))
        hends.append(jnp.clip(
            jnp.ceil((p + 1) * bin_h).astype(jnp.int32) + roi_start_h, 0, height))
        wstarts.append(jnp.clip(
            jnp.floor(p * bin_w).astype(jnp.int32) + roi_start_w, 0, width))
        wends.append(jnp.clip(
            jnp.ceil((p + 1) * bin_w).astype(jnp.int32) + roi_start_w, 0, width))

    neg_inf = jnp.float32(-jnp.inf)

    # Stage 1: one pass over H -> S row-band maxima, each of shape (W, C).
    # Only (W, C) tiles are live (no full (H, W, C) value in vregs).
    band_max = [jnp.full((width, channels), neg_inf, jnp.float32)
                for _ in range(S)]
    for h in range(height):
        row = x_ref[0, h]                                   # (W, C), C on lanes
        for ph in range(S):
            in_band = (h >= hstarts[ph]) & (h < hends[ph])
            band_max[ph] = jnp.where(
                in_band, jnp.maximum(band_max[ph], row), band_max[ph])

    # Stage 2: for each bin, mask the W axis of its row-band and reduce.
    col_ids = jax.lax.broadcasted_iota(jnp.int32, (width, 1), 0)
    for ph in range(S):
        h_empty = hends[ph] <= hstarts[ph]
        for pw in range(S):
            col_mask = (col_ids >= wstarts[pw]) & (col_ids < wends[pw])
            masked = jnp.where(col_mask, band_max[ph], neg_inf)     # (W, C)
            bmax = jnp.max(masked, axis=0, keepdims=True)           # (1, C)
            is_empty = h_empty | (wends[pw] <= wstarts[pw])
            bmax = jnp.where(is_empty, jnp.zeros_like(bmax), bmax)  # empty bin -> 0
            idx = ph * S + pw
            out_ref[0, idx:idx + 1, :] = bmax


def roi_pool(x_nhwc, batch_idx, rois_xyxy, roi_size, spatial_scale):
    """x_nhwc: (N, H, W, C); batch_idx: (R,) int; rois_xyxy: (R, 4) [x1,y1,x2,y2]."""
    N, H, W, C = x_nhwc.shape
    R = rois_xyxy.shape[0]
    rois_flat = rois_xyxy.astype(jnp.float32).reshape(-1)    # (4R,) flat 1D SMEM

    kernel = functools.partial(
        _roi_pool_kernel, roi_size=roi_size, spatial_scale=float(spatial_scale),
        height=H, width=W, channels=C)

    return pl.pallas_call(
        kernel,
        out_shape=jax.ShapeDtypeStruct((R, roi_size * roi_size, C), jnp.float32),
        grid_spec=pltpu.PrefetchScalarGridSpec(
            num_scalar_prefetch=1,        # batch indices -> SMEM, used in index_maps
            grid=(R,),
            in_specs=[
                pl.BlockSpec(memory_space=pltpu.MemorySpace.SMEM),   # flat roi coords
                pl.BlockSpec((1, H, W, C), lambda r, bidx: (bidx[r], 0, 0, 0)),
            ],
            out_specs=pl.BlockSpec((1, roi_size * roi_size, C),
                                   lambda r, bidx: (r, 0, 0)),
        ),
        compiler_params=pltpu.CompilerParams(
            dimension_semantics=("parallel",)),   # disjoint outputs; v7x 2-TC sharding
    )(batch_idx.astype(jnp.int32), rois_flat, x_nhwc)


# ----------------------------------------------------------------------------
# Tiled linear kernel: y = relu?(x @ w + b), f32 accumulator, bf16 MXU inputs
# ----------------------------------------------------------------------------
def _linear_kernel(x_ref, w_ref, b_ref, o_ref, acc_ref, *, apply_relu):
    @pl.when(pl.program_id(2) == 0)
    def _():
        acc_ref[...] = jnp.zeros_like(acc_ref)

    acc_ref[...] += jnp.dot(x_ref[...], w_ref[...],
                            preferred_element_type=jnp.float32)

    @pl.when(pl.program_id(2) == pl.num_programs(2) - 1)
    def _():
        res = acc_ref[...] + b_ref[...]        # bias / ReLU stay f32 (v5e-safe)
        if apply_relu:
            res = jnp.maximum(res, 0.0)
        o_ref[...] = res.astype(o_ref.dtype)


def _pad2d(a, rows, cols, dtype):
    a = a.astype(dtype)
    if a.shape == (rows, cols):
        return a
    return jnp.zeros((rows, cols), dtype).at[:a.shape[0], :a.shape[1]].set(a)


def linear_pallas(x, w, b, *, apply_relu=False, compute_dtype=jnp.bfloat16,
                  tm=128, tn=128, tk_max=512):
    """Tiled (M, N, K) matmul + bias (+ReLU); scales to real VGG16 fc sizes."""
    M, K = x.shape
    Kw, N = w.shape
    assert K == Kw and b.shape == (N,)
    tk = min(tk_max, _round_up(K, 128))
    Mp, Np, Kp = _round_up(M, tm), _round_up(N, tn), _round_up(K, tk)

    xp = _pad2d(x, Mp, Kp, compute_dtype)
    wp = _pad2d(w, Kp, Np, compute_dtype)
    bp = _pad2d(b[None, :], 1, Np, jnp.float32)

    out = pl.pallas_call(
        functools.partial(_linear_kernel, apply_relu=apply_relu),
        out_shape=jax.ShapeDtypeStruct((Mp, Np), jnp.float32),
        grid_spec=pltpu.PrefetchScalarGridSpec(
            num_scalar_prefetch=0,
            grid=(Mp // tm, Np // tn, Kp // tk),
            in_specs=[
                pl.BlockSpec((tm, tk), lambda i, j, k: (i, k)),
                pl.BlockSpec((tk, tn), lambda i, j, k: (k, j)),
                pl.BlockSpec((1, tn), lambda i, j, k: (0, j)),
            ],
            out_specs=pl.BlockSpec((tm, tn), lambda i, j, k: (i, j)),
            scratch_shapes=[pltpu.VMEM((tm, tn), jnp.float32)]),
        compiler_params=pltpu.CompilerParams(
            dimension_semantics=("parallel", "parallel", "arbitrary")),
    )(xp, wp, bp)
    return out[:M, :N]


# ----------------------------------------------------------------------------
# Parameters (PyTorch layout), one-time preparation, and forward
# ----------------------------------------------------------------------------
def init_params(key, n_class, roi_size, channels, hidden):
    """Synthetic parameters in PyTorch layout (Linear weights are (out, in))."""
    in_dim = channels * roi_size * roi_size
    k1, k2, k3, k4 = jax.random.split(key, 4)
    return {
        # classifier = Linear(in_dim, hidden) + ReLU + Linear(hidden, hidden) + ReLU
        "fc1_w": jax.random.normal(k1, (hidden, in_dim), jnp.float32) * 0.01,
        "fc1_b": jnp.zeros((hidden,), jnp.float32),
        "fc2_w": jax.random.normal(k2, (hidden, hidden), jnp.float32) * 0.01,
        "fc2_b": jnp.zeros((hidden,), jnp.float32),
        # normal_init(cls_loc, 0, 0.001); normal_init(score, 0, 0.01); zero bias
        "cls_loc_w": jax.random.normal(k3, (n_class * 4, hidden), jnp.float32) * 0.001,
        "cls_loc_b": jnp.zeros((n_class * 4,), jnp.float32),
        "score_w": jax.random.normal(k4, (n_class, hidden), jnp.float32) * 0.01,
        "score_b": jnp.zeros((n_class,), jnp.float32),
    }


def prepare_params(params, roi_size, channels, *, weight_dtype=jnp.bfloat16):
    """One-time weight prep: transpose to (in, out), permute fc1 rows from the
    PyTorch (C, S, S) flatten order to our (S*S, C) pooled layout, concatenate
    cls_loc + score into one head matmul, cast weights to bf16 for the MXU."""
    S, C = roi_size, channels
    hidden, in_dim = params["fc1_w"].shape
    assert in_dim == C * S * S
    w1 = (params["fc1_w"].T                      # (C*S*S, hidden), rows = c*S*S + s
          .reshape(C, S * S, hidden)
          .transpose(1, 0, 2)                    # rows = s*C + c  -> matches (R, S*S, C)
          .reshape(S * S * C, hidden))
    w_head = jnp.concatenate([params["cls_loc_w"].T, params["score_w"].T], axis=1)
    b_head = jnp.concatenate([params["cls_loc_b"], params["score_b"]], axis=0)
    return {
        "w1": w1.astype(weight_dtype),
        "b1": params["fc1_b"].astype(jnp.float32),
        "w2": params["fc2_w"].T.astype(weight_dtype),
        "b2": params["fc2_b"].astype(jnp.float32),
        "w_head": w_head.astype(weight_dtype),
        "b_head": b_head.astype(jnp.float32),
        "n_loc": int(params["cls_loc_w"].shape[0]),
    }


def vgg16_roi_head_forward(prepared, x, rois, roi_indices, *,
                           roi_size, spatial_scale):
    """x: (N, C, H, W); rois: (R, 4) as (y1, x1, y2, x2); roi_indices: (R,)."""
    R = rois.shape[0]
    roi_indices = roi_indices.astype(jnp.int32)
    rois = rois.astype(jnp.float32)
    # [y1, x1, y2, x2] -> [x1, y1, x2, y2]  (same reorder as torch's [:, [0,2,1,4,3]])
    rois_xyxy = rois[:, jnp.array([1, 0, 3, 2])]

    # Sort ROIs by batch index so consecutive grid steps hit the same image slab
    # (Pallas skips the HBM->VMEM DMA when the block index does not change).
    order = jnp.argsort(roi_indices)
    inv_order = jnp.argsort(order)
    sorted_idx = roi_indices[order]
    sorted_rois = rois_xyxy[order]

    # Channels-last so C sits on the 128-lane axis inside the pooling kernel.
    x_nhwc = jnp.transpose(x, (0, 2, 3, 1))

    pool = roi_pool(x_nhwc, sorted_idx, sorted_rois, roi_size, spatial_scale)
    pool_flat = pool.reshape(R, -1)     # (R, S*S*C); fc1 rows were permuted to match

    h = linear_pallas(pool_flat, prepared["w1"], prepared["b1"], apply_relu=True)
    h = linear_pallas(h, prepared["w2"], prepared["b2"], apply_relu=True)
    head = linear_pallas(h, prepared["w_head"], prepared["b_head"], apply_relu=False)

    n_loc = prepared["n_loc"]
    roi_cls_locs = head[:, :n_loc][inv_order]
    roi_scores = head[:, n_loc:][inv_order]
    return roi_cls_locs, roi_scores


if __name__ == "__main__":
    key = jax.random.PRNGKey(0)

    # small, module-consistent shapes
    n_class = 5
    roi_size = 4
    spatial_scale = 0.5            # feature map is 1/2 of image resolution
    N, C, H, W = 2, 8, 16, 16      # VGG feature map (NCHW), synthetic
    R = 8                          # number of ROIs
    hidden = 64                    # stand-in for 4096

    k_x, k_roi, k_hw, k_idx, k_p = jax.random.split(key, 5)
    x = jax.random.normal(k_x, (N, C, H, W), jnp.float32)

    img_h, img_w = H / spatial_scale, W / spatial_scale
    y1x1 = jax.random.uniform(k_roi, (R, 2), minval=0.0, maxval=img_h * 0.5)
    hw = jax.random.uniform(k_hw, (R, 2), minval=4.0, maxval=img_h * 0.5)
    y2x2 = jnp.minimum(y1x1 + hw, jnp.array([img_h - 1.0, img_w - 1.0]))
    rois = jnp.concatenate([y1x1, y2x2], axis=1)            # (R, 4) (y1, x1, y2, x2)
    roi_indices = jax.random.randint(k_idx, (R,), 0, N)     # (R,)

    params = init_params(k_p, n_class, roi_size, C, hidden)
    prepared = prepare_params(params, roi_size, C)          # one-time weight prep

    roi_cls_locs, roi_scores = vgg16_roi_head_forward(
        prepared, x, rois, roi_indices,
        roi_size=roi_size, spatial_scale=spatial_scale)
    jax.block_until_ready((roi_cls_locs, roi_scores))

    assert roi_cls_locs.shape == (R, n_class * 4)
    assert roi_scores.shape == (R, n_class)
    assert jnp.all(jnp.isfinite(roi_cls_locs)) and jnp.all(jnp.isfinite(roi_scores))
    print("KERNEL_OK")
</pallas_src>

<mosaic_0001>
module attributes {stable_mosaic.version = 11 : i64} {
  func.func @_roi_pool_kernel(%arg0: i32, %arg1: memref<8xi32, #tpu.memory_space<smem>>, %arg2: memref<32xf32, #tpu.memory_space<smem>>, %arg3: memref<1x16x16x8xf32, #tpu.memory_space<vmem>>, %arg4: memref<1x16x8xf32, #tpu.memory_space<vmem>>) attributes {dimension_semantics = [#tpu.dimension_semantics<parallel>], iteration_bounds = array<i64: 8>, scalar_prefetch = 1 : i64, scratch_operands = 0 : i64, tpu.core_type = #tpu.core_type<tc>, window_params = [{transform_indices = @transform_0, window_bounds = array<i64: 32>}, {transform_indices = @transform_1, window_bounds = array<i64: 1, 16, 16, 8>}, {transform_indices = @transform_2, window_bounds = array<i64: 1, 16, 8>}]} {
    %c4_i32 = arith.constant 4 : i32
    %0 = arith.muli %c4_i32, %arg0 : i32
    %c0_i32 = arith.constant 0 : i32
    %1 = arith.addi %0, %c0_i32 : i32
    %2 = arith.index_cast %1 : i32 to index
    %3 = memref.load %arg2[%2] : memref<32xf32, #tpu.memory_space<smem>>
    %cst = arith.constant 5.000000e-01 : f32
    %4 = arith.mulf %3, %cst : f32
    %c1_i32 = arith.constant 1 : i32
    %5 = arith.addi %0, %c1_i32 : i32
    %6 = arith.index_cast %5 : i32 to index
    %7 = memref.load %arg2[%6] : memref<32xf32, #tpu.memory_space<smem>>
    %cst_0 = arith.constant 5.000000e-01 : f32
    %8 = arith.mulf %7, %cst_0 : f32
    %c2_i32 = arith.constant 2 : i32
    %9 = arith.addi %0, %c2_i32 : i32
    %10 = arith.index_cast %9 : i32 to index
    %11 = memref.load %arg2[%10] : memref<32xf32, #tpu.memory_space<smem>>
    %cst_1 = arith.constant 5.000000e-01 : f32
    %12 = arith.mulf %11, %cst_1 : f32
    %c3_i32 = arith.constant 3 : i32
    %13 = arith.addi %0, %c3_i32 : i32
    %14 = arith.index_cast %13 : i32 to index
    %15 = memref.load %arg2[%14] : memref<32xf32, #tpu.memory_space<smem>>
    %cst_2 = arith.constant 5.000000e-01 : f32
    %16 = arith.mulf %15, %cst_2 : f32
    %cst_3 = arith.constant 5.000000e-01 : f32
    %17 = arith.addf %4, %cst_3 : f32
    %18 = math.floor %17 : f32
    %19 = arith.fptosi %18 : f32 to i32
    %cst_4 = arith.constant 5.000000e-01 : f32
    %20 = arith.addf %8, %cst_4 : f32
    %21 = math.floor %20 : f32
    %22 = arith.fptosi %21 : f32 to i32
    %cst_5 = arith.constant 5.000000e-01 : f32
    %23 = arith.addf %12, %cst_5 : f32
    %24 = math.floor %23 : f32
    %25 = arith.fptosi %24 : f32 to i32
    %cst_6 = arith.constant 5.000000e-01 : f32
    %26 = arith.addf %16, %cst_6 : f32
    %27 = math.floor %26 : f32
    %28 = arith.fptosi %27 : f32 to i32
    %29 = arith.subi %25, %19 : i32
    %c1_i32_7 = arith.constant 1 : i32
    %30 = arith.addi %29, %c1_i32_7 : i32
    %c1_i32_8 = arith.constant 1 : i32
    %31 = arith.maxsi %30, %c1_i32_8 : i32
    %32 = arith.subi %28, %22 : i32
    %c1_i32_9 = arith.constant 1 : i32
    %33 = arith.addi %32, %c1_i32_9 : i32
    %c1_i32_10 = arith.constant 1 : i32
    %34 = arith.maxsi %33, %c1_i32_10 : i32
    %35 = arith.sitofp %31 : i32 to f32
    %cst_11 = arith.constant 4.000000e+00 : f32
    %36 = arith.divf %35, %cst_11 : f32
    %37 = arith.sitofp %34 : i32 to f32
    %cst_12 = arith.constant 4.000000e+00 : f32
    %38 = arith.divf %37, %cst_12 : f32
    %cst_13 = arith.constant 0.000000e+00 : f32
    %39 = arith.mulf %cst_13, %38 : f32
    %40 = math.floor %39 : f32
    %41 = arith.fptosi %40 : f32 to i32
    %42 = arith.addi %41, %22 : i32
    %c0_i32_14 = arith.constant 0 : i32
    %c16_i32 = arith.constant 16 : i32
    %43 = arith.maxsi %c0_i32_14, %42 : i32
    %44 = arith.minsi %c16_i32, %43 : i32
    %cst_15 = arith.constant 1.000000e+00 : f32
    %45 = arith.mulf %cst_15, %38 : f32
    %46 = math.ceil %45 : f32
    %47 = arith.fptosi %46 : f32 to i32
    %48 = arith.addi %47, %22 : i32
    %c0_i32_16 = arith.constant 0 : i32
    %c16_i32_17 = arith.constant 16 : i32
    %49 = arith.maxsi %c0_i32_16, %48 : i32
    %50 = arith.minsi %c16_i32_17, %49 : i32
    %cst_18 = arith.constant 0.000000e+00 : f32
    %51 = arith.mulf %cst_18, %36 : f32
    %52 = math.floor %51 : f32
    %53 = arith.fptosi %52 : f32 to i32
    %54 = arith.addi %53, %19 : i32
    %c0_i32_19 = arith.constant 0 : i32
    %c16_i32_20 = arith.constant 16 : i32
    %55 = arith.maxsi %c0_i32_19, %54 : i32
    %56 = arith.minsi %c16_i32_20, %55 : i32
    %cst_21 = arith.constant 1.000000e+00 : f32
    %57 = arith.mulf %cst_21, %36 : f32
    %58 = math.ceil %57 : f32
    %59 = arith.fptosi %58 : f32 to i32
    %60 = arith.addi %59, %19 : i32
    %c0_i32_22 = arith.constant 0 : i32
    %c16_i32_23 = arith.constant 16 : i32
    %61 = arith.maxsi %c0_i32_22, %60 : i32
    %62 = arith.minsi %c16_i32_23, %61 : i32
    %cst_24 = arith.constant 1.000000e+00 : f32
    %63 = arith.mulf %cst_24, %38 : f32
    %64 = math.floor %63 : f32
    %65 = arith.fptosi %64 : f32 to i32
    %66 = arith.addi %65, %22 : i32
    %c0_i32_25 = arith.constant 0 : i32
    %c16_i32_26 = arith.constant 16 : i32
    %67 = arith.maxsi %c0_i32_25, %66 : i32
    %68 = arith.minsi %c16_i32_26, %67 : i32
    %cst_27 = arith.constant 2.000000e+00 : f32
    %69 = arith.mulf %cst_27, %38 : f32
    %70 = math.ceil %69 : f32
    %71 = arith.fptosi %70 : f32 to i32
    %72 = arith.addi %71, %22 : i32
    %c0_i32_28 = arith.constant 0 : i32
    %c16_i32_29 = arith.constant 16 : i32
    %73 = arith.maxsi %c0_i32_28, %72 : i32
    %74 = arith.minsi %c16_i32_29, %73 : i32
    %cst_30 = arith.constant 1.000000e+00 : f32
    %75 = arith.mulf %cst_30, %36 : f32
    %76 = math.floor %75 : f32
    %77 = arith.fptosi %76 : f32 to i32
    %78 = arith.addi %77, %19 : i32
    %c0_i32_31 = arith.constant 0 : i32
    %c16_i32_32 = arith.constant 16 : i32
    %79 = arith.maxsi %c0_i32_31, %78 : i32
    %80 = arith.minsi %c16_i32_32, %79 : i32
    %cst_33 = arith.constant 2.000000e+00 : f32
    %81 = arith.mulf %cst_33, %36 : f32
    %82 = math.ceil %81 : f32
    %83 = arith.fptosi %82 : f32 to i32
    %84 = arith.addi %83, %19 : i32
    %c0_i32_34 = arith.constant 0 : i32
    %c16_i32_35 = arith.constant 16 : i32
    %85 = arith.maxsi %c0_i32_34, %84 : i32
    %86 = arith.minsi %c16_i32_35, %85 : i32
    %cst_36 = arith.constant 2.000000e+00 : f32
    %87 = arith.mulf %cst_36, %38 : f32
    %88 = math.floor %87 : f32
    %89 = arith.fptosi %88 : f32 to i32
    %90 = arith.addi %89, %22 : i32
    %c0_i32_37 = arith.constant 0 : i32
    %c16_i32_38 = arith.constant 16 : i32
    %91 = arith.maxsi %c0_i32_37, %90 : i32
    %92 = arith.minsi %c16_i32_38, %91 : i32
    %cst_39 = arith.constant 3.000000e+00 : f32
    %93 = arith.mulf %cst_39, %38 : f32
    %94 = math.ceil %93 : f32
    %95 = arith.fptosi %94 : f32 to i32
    %96 = arith.addi %95, %22 : i32
    %c0_i32_40 = arith.constant 0 : i32
    %c16_i32_41 = arith.constant 16 : i32
    %97 = arith.maxsi %c0_i32_40, %96 : i32
    %98 = arith.minsi %c16_i32_41, %97 : i32
    %cst_42 = arith.constant 2.000000e+00 : f32
    %99 = arith.mulf %cst_42, %36 : f32
    %100 = math.floor %99 : f32
    %101 = arith.fptosi %100 : f32 to i32
    %102 = arith.addi %101, %19 : i32
    %c0_i32_43 = arith.constant 0 : i32
    %c16_i32_44 = arith.constant 16 : i32
    %103 = arith.maxsi %c0_i32_43, %102 : i32
    %104 = arith.minsi %c16_i32_44, %103 : i32
    %cst_45 = arith.constant 3.000000e+00 : f32
    %105 = arith.mulf %cst_45, %36 : f32
    %106 = math.ceil %105 : f32
    %107 = arith.fptosi %106 : f32 to i32
    %108 = arith.addi %107, %19 : i32
    %c0_i32_46 = arith.constant 0 : i32
    %c16_i32_47 = arith.constant 16 : i32
    %109 = arith.maxsi %c0_i32_46, %108 : i32
    %110 = arith.minsi %c16_i32_47, %109 : i32
    %cst_48 = arith.constant 3.000000e+00 : f32
    %111 = arith.mulf %cst_48, %38 : f32
    %112 = math.floor %111 : f32
    %113 = arith.fptosi %112 : f32 to i32
    %114 = arith.addi %113, %22 : i32
    %c0_i32_49 = arith.constant 0 : i32
    %c16_i32_50 = arith.constant 16 : i32
    %115 = arith.maxsi %c0_i32_49, %114 : i32
    %116 = arith.minsi %c16_i32_50, %115 : i32
    %cst_51 = arith.constant 4.000000e+00 : f32
    %117 = arith.mulf %cst_51, %38 : f32
    %118 = math.ceil %117 : f32
    %119 = arith.fptosi %118 : f32 to i32
    %120 = arith.addi %119, %22 : i32
    %c0_i32_52 = arith.constant 0 : i32
    %c16_i32_53 = arith.constant 16 : i32
    %121 = arith.maxsi %c0_i32_52, %120 : i32
    %122 = arith.minsi %c16_i32_53, %121 : i32
    %cst_54 = arith.constant 3.000000e+00 : f32
    %123 = arith.mulf %cst_54, %36 : f32
    %124 = math.floor %123 : f32
    %125 = arith.fptosi %124 : f32 to i32
    %126 = arith.addi %125, %19 : i32
    %c0_i32_55 = arith.constant 0 : i32
    %c16_i32_56 = arith.constant 16 : i32
    %127 = arith.maxsi %c0_i32_55, %126 : i32
    %128 = arith.minsi %c16_i32_56, %127 : i32
    %cst_57 = arith.constant 4.000000e+00 : f32
    %129 = arith.mulf %cst_57, %36 : f32
    %130 = math.ceil %129 : f32
    %131 = arith.fptosi %130 : f32 to i32
    %132 = arith.addi %131, %19 : i32
    %c0_i32_58 = arith.constant 0 : i32
    %c16_i32_59 = arith.constant 16 : i32
    %133 = arith.maxsi %c0_i32_58, %132 : i32
    %134 = arith.minsi %c16_i32_59, %133 : i32
    %cst_60 = arith.constant 0xFF800000 : f32
    %135 = vector.broadcast %cst_60 : f32 to vector<16x8xf32>
    %cst_61 = arith.constant 0xFF800000 : f32
    %136 = vector.broadcast %cst_61 : f32 to vector<16x8xf32>
    %cst_62 = arith.constant 0xFF800000 : f32
    %137 = vector.broadcast %cst_62 : f32 to vector<16x8xf32>
    %cst_63 = arith.constant 0xFF800000 : f32
    %138 = vector.broadcast %cst_63 : f32 to vector<16x8xf32>
    %c0 = arith.constant 0 : index
    %c0_64 = arith.constant 0 : index
    %c0_65 = arith.constant 0 : index
    %c0_66 = arith.constant 0 : index
    %139 = vector.load %arg3[%c0, %c0_64, %c0_65, %c0_66] : memref<1x16x16x8xf32, #tpu.memory_space<vmem>>, vector<1x1x16x8xf32>
    %140 = vector.shape_cast %139 : vector<1x1x16x8xf32> to vector<16x8xf32>
    %c0_i32_67 = arith.constant 0 : i32
    %141 = arith.cmpi sle, %44, %c0_i32_67 : i32
    %c0_i32_68 = arith.constant 0 : i32
    %142 = arith.cmpi sgt, %50, %c0_i32_68 : i32
    %143 = arith.andi %141, %142 : i1
    %144 = arith.maximumf %135, %140 : vector<16x8xf32>
    %145 = arith.select %143, %144, %135 : vector<16x8xf32>
    %c0_i32_69 = arith.constant 0 : i32
    %146 = arith.cmpi sle, %68, %c0_i32_69 : i32
    %c0_i32_70 = arith.constant 0 : i32
    %147 = arith.cmpi sgt, %74, %c0_i32_70 : i32
    %148 = arith.andi %146, %147 : i1
    %149 = arith.maximumf %136, %140 : vector<16x8xf32>
    %150 = arith.select %148, %149, %136 : vector<16x8xf32>
    %c0_i32_71 = arith.constant 0 : i32
    %151 = arith.cmpi sle, %92, %c0_i32_71 : i32
    %c0_i32_72 = arith.constant 0 : i32
    %152 = arith.cmpi sgt, %98, %c0_i32_72 : i32
    %153 = arith.andi %151, %152 : i1
    %154 = arith.maximumf %137, %140 : vector<16x8xf32>
    %155 = arith.select %153, %154, %137 : vector<16x8xf32>
    %c0_i32_73 = arith.constant 0 : i32
    %156 = arith.cmpi sle, %116, %c0_i32_73 : i32
    %c0_i32_74 = arith.constant 0 : i32
    %157 = arith.cmpi sgt, %122, %c0_i32_74 : i32
    %158 = arith.andi %156, %157 : i1
    %159 = arith.maximumf %138, %140 : vector<16x8xf32>
    %160 = arith.select %158, %159, %138 : vector<16x8xf32>
    %c0_75 = arith.constant 0 : index
    %c1 = arith.constant 1 : index
    %c0_76 = arith.constant 0 : index
    %c0_77 = arith.constant 0 : index
    %161 = vector.load %arg3[%c0_75, %c1, %c0_76, %c0_77] : memref<1x16x16x8xf32, #tpu.memory_space<vmem>>, vector<1x1x16x8xf32>
    %162 = vector.shape_cast %161 : vector<1x1x16x8xf32> to vector<16x8xf32>
    %c1_i32_78 = arith.constant 1 : i32
    %163 = arith.cmpi sle, %44, %c1_i32_78 : i32
    %c1_i32_79 = arith.constant 1 : i32
    %164 = arith.cmpi sgt, %50, %c1_i32_79 : i32
    %165 = arith.andi %163, %164 : i1
    %166 = arith.maximumf %145, %162 : vector<16x8xf32>
    %167 = arith.select %165, %166, %145 : vector<16x8xf32>
    %c1_i32_80 = arith.constant 1 : i32
    %168 = arith.cmpi sle, %68, %c1_i32_80 : i32
    %c1_i32_81 = arith.constant 1 : i32
    %169 = arith.cmpi sgt, %74, %c1_i32_81 : i32
    %170 = arith.andi %168, %169 : i1
    %171 = arith.maximumf %150, %162 : vector<16x8xf32>
    %172 = arith.select %170, %171, %150 : vector<16x8xf32>
    %c1_i32_82 = arith.constant 1 : i32
    %173 = arith.cmpi sle, %92, %c1_i32_82 : i32
    %c1_i32_83 = arith.constant 1 : i32
    %174 = arith.cmpi sgt, %98, %c1_i32_83 : i32
    %175 = arith.andi %173, %174 : i1
    %176 = arith.maximumf %155, %162 : vector<16x8xf32>
    %177 = arith.select %175, %176, %155 : vector<16x8xf32>
    %c1_i32_84 = arith.constant 1 : i32
    %178 = arith.cmpi sle, %116, %c1_i32_84 : i32
    %c1_i32_85 = arith.constant 1 : i32
    %179 = arith.cmpi sgt, %122, %c1_i32_85 : i32
    %180 = arith.andi %178, %179 : i1
    %181 = arith.maximumf %160, %162 : vector<16x8xf32>
    %182 = arith.select %180, %181, %160 : vector<16x8xf32>
    %c0_86 = arith.constant 0 : index
    %c2 = arith.constant 2 : index
    %c0_87 = arith.constant 0 : index
    %c0_88 = arith.constant 0 : index
    %183 = vector.load %arg3[%c0_86, %c2, %c0_87, %c0_88] : memref<1x16x16x8xf32, #tpu.memory_space<vmem>>, vector<1x1x16x8xf32>
    %184 = vector.shape_cast %183 : vector<1x1x16x8xf32> to vector<16x8xf32>
    %c2_i32_89 = arith.constant 2 : i32
    %185 = arith.cmpi sle, %44, %c2_i32_89 : i32
    %c2_i32_90 = arith.constant 2 : i32
    %186 = arith.cmpi sgt, %50, %c2_i32_90 : i32
    %187 = arith.andi %185, %186 : i1
    %188 = arith.maximumf %167, %184 : vector<16x8xf32>
    %189 = arith.select %187, %188, %167 : vector<16x8xf32>
    %c2_i32_91 = arith.constant 2 : i32
    %190 = arith.cmpi sle, %68, %c2_i32_91 : i32
    %c2_i32_92 = arith.constant 2 : i32
    %191 = arith.cmpi sgt, %74, %c2_i32_92 : i32
    %192 = arith.andi %190, %191 : i1
    %193 = arith.maximumf %172, %184 : vector<16x8xf32>
    %194 = arith.select %192, %193, %172 : vector<16x8xf32>
    %c2_i32_93 = arith.constant 2 : i32
    %195 = arith.cmpi sle, %92, %c2_i32_93 : i32
    %c2_i32_94 = arith.constant 2 : i32
    %196 = arith.cmpi sgt, %98, %c2_i32_94 : i32
    %197 = arith.andi %195, %196 : i1
    %198 = arith.maximumf %177, %184 : vector<16x8xf32>
    %199 = arith.select %197, %198, %177 : vector<16x8xf32>
    %c2_i32_95 = arith.constant 2 : i32
    %200 = arith.cmpi sle, %116, %c2_i32_95 : i32
    %c2_i32_96 = arith.constant 2 : i32
    %201 = arith.cmpi sgt, %122, %c2_i32_96 : i32
    %202 = arith.andi %200, %201 : i1
    %203 = arith.maximumf %182, %184 : vector<16x8xf32>
    %204 = arith.select %202, %203, %182 : vector<16x8xf32>
    %c0_97 = arith.constant 0 : index
    %c3 = arith.constant 3 : index
    %c0_98 = arith.constant 0 : index
    %c0_99 = arith.constant 0 : index
    %205 = vector.load %arg3[%c0_97, %c3, %c0_98, %c0_99] : memref<1x16x16x8xf32, #tpu.memory_space<vmem>>, vector<1x1x16x8xf32>
    %206 = vector.shape_cast %205 : vector<1x1x16x8xf32> to vector<16x8xf32>
    %c3_i32_100 = arith.constant 3 : i32
    %207 = arith.cmpi sle, %44, %c3_i32_100 : i32
    %c3_i32_101 = arith.constant 3 : i32
    %208 = arith.cmpi sgt, %50, %c3_i32_101 : i32
    %209 = arith.andi %207, %208 : i1
    %210 = arith.maximumf %189, %206 : vector<16x8xf32>
    %211 = arith.select %209, %210, %189 : vector<16x8xf32>
    %c3_i32_102 = arith.constant 3 : i32
    %212 = arith.cmpi sle, %68, %c3_i32_102 : i32
    %c3_i32_103 = arith.constant 3 : i32
    %213 = arith.cmpi sgt, %74, %c3_i32_103 : i32
    %214 = arith.andi %212, %213 : i1
    %215 = arith.maximumf %194, %206 : vector<16x8xf32>
    %216 = arith.select %214, %215, %194 : vector<16x8xf32>
    %c3_i32_104 = arith.constant 3 : i32
    %217 = arith.cmpi sle, %92, %c3_i32_104 : i32
    %c3_i32_105 = arith.constant 3 : i32
    %218 = arith.cmpi sgt, %98, %c3_i32_105 : i32
    %219 = arith.andi %217, %218 : i1
    %220 = arith.maximumf %199, %206 : vector<16x8xf32>
    %221 = arith.select %219, %220, %199 : vector<16x8xf32>
    %c3_i32_106 = arith.constant 3 : i32
    %222 = arith.cmpi sle, %116, %c3_i32_106 : i32
    %c3_i32_107 = arith.constant 3 : i32
    %223 = arith.cmpi sgt, %122, %c3_i32_107 : i32
    %224 = arith.andi %222, %223 : i1
    %225 = arith.maximumf %204, %206 : vector<16x8xf32>
    %226 = arith.select %224, %225, %204 : vector<16x8xf32>
    %c0_108 = arith.constant 0 : index
    %c4 = arith.constant 4 : index
    %c0_109 = arith.constant 0 : index
    %c0_110 = arith.constant 0 : index
    %227 = vector.load %arg3[%c0_108, %c4, %c0_109, %c0_110] : memref<1x16x16x8xf32, #tpu.memory_space<vmem>>, vector<1x1x16x8xf32>
    %228 = vector.shape_cast %227 : vector<1x1x16x8xf32> to vector<16x8xf32>
    %c4_i32_111 = arith.constant 4 : i32
    %229 = arith.cmpi sle, %44, %c4_i32_111 : i32
    %c4_i32_112 = arith.constant 4 : i32
    %230 = arith.cmpi sgt, %50, %c4_i32_112 : i32
    %231 = arith.andi %229, %230 : i1
    %232 = arith.maximumf %211, %228 : vector<16x8xf32>
    %233 = arith.select %231, %232, %211 : vector<16x8xf32>
    %c4_i32_113 = arith.constant 4 : i32
    %234 = arith.cmpi sle, %68, %c4_i32_113 : i32
    %c4_i32_114 = arith.constant 4 : i32
    %235 = arith.cmpi sgt, %74, %c4_i32_114 : i32
    %236 = arith.andi %234, %235 : i1
    %237 = arith.maximumf %216, %228 : vector<16x8xf32>
    %238 = arith.select %236, %237, %216 : vector<16x8xf32>
    %c4_i32_115 = arith.constant 4 : i32
    %239 = arith.cmpi sle, %92, %c4_i32_115 : i32
    %c4_i32_116 = arith.constant 4 : i32
    %240 = arith.cmpi sgt, %98, %c4_i32_116 : i32
    %241 = arith.andi %239, %240 : i1
    %242 = arith.maximumf %221, %228 : vector<16x8xf32>
    %243 = arith.select %241, %242, %221 : vector<16x8xf32>
    %c4_i32_117 = arith.constant 4 : i32
    %244 = arith.cmpi sle, %116, %c4_i32_117 : i32
    %c4_i32_118 = arith.constant 4 : i32
    %245 = arith.cmpi sgt, %122, %c4_i32_118 : i32
    %246 = arith.andi %244, %245 : i1
    %247 = arith.maximumf %226, %228 : vector<16x8xf32>
    %248 = arith.select %246, %247, %226 : vector<16x8xf32>
    %c0_119 = arith.constant 0 : index
    %c5 = arith.constant 5 : index
    %c0_120 = arith.constant 0 : index
    %c0_121 = arith.constant 0 : index
    %249 = vector.load %arg3[%c0_119, %c5, %c0_120, %c0_121] : memref<1x16x16x8xf32, #tpu.memory_space<vmem>>, vector<1x1x16x8xf32>
    %250 = vector.shape_cast %249 : vector<1x1x16x8xf32> to vector<16x8xf32>
    %c5_i32 = arith.constant 5 : i32
    %251 = arith.cmpi sle, %44, %c5_i32 : i32
    %c5_i32_122 = arith.constant 5 : i32
    %252 = arith.cmpi sgt, %50, %c5_i32_122 : i32
    %253 = arith.andi %251, %252 : i1
    %254 = arith.maximumf %233, %250 : vector<16x8xf32>
    %255 = arith.select %253, %254, %233 : vector<16x8xf32>
    %c5_i32_123 = arith.constant 5 : i32
    %256 = arith.cmpi sle, %68, %c5_i32_123 : i32
    %c5_i32_124 = arith.constant 5 : i32
    %257 = arith.cmpi sgt, %74, %c5_i32_124 : i32
    %258 = arith.andi %256, %257 : i1
    %259 = arith.maximumf %238, %250 : vector<16x8xf32>
    %260 = arith.select %258, %259, %238 : vector<16x8xf32>
    %c5_i32_125 = arith.constant 5 : i32
    %261 = arith.cmpi sle, %92, %c5_i32_125 : i32
    %c5_i32_126 = arith.constant 5 : i32
    %262 = arith.cmpi sgt, %98, %c5_i32_126 : i32
    %263 = arith.andi %261, %262 : i1
    %264 = arith.maximumf %243, %250 : vector<16x8xf32>
    %265 = arith.select %263, %264, %243 : vector<16x8xf32>
    %c5_i32_127 = arith.constant 5 : i32
    %266 = arith.cmpi sle, %116, %c5_i32_127 : i32
    %c5_i32_128 = arith.constant 5 : i32
    %267 = arith.cmpi sgt, %122, %c5_i32_128 : i32
    %268 = arith.andi %266, %267 : i1
    %269 = arith.maximumf %248, %250 : vector<16x8xf32>
    %270 = arith.select %268, %269, %248 : vector<16x8xf32>
    %c0_129 = arith.constant 0 : index
    %c6 = arith.constant 6 : index
    %c0_130 = arith.constant 0 : index
    %c0_131 = arith.constant 0 : index
    %271 = vector.load %arg3[%c0_129, %c6, %c0_130, %c0_131] : memref<1x16x16x8xf32, #tpu.memory_space<vmem>>, vector<1x1x16x8xf32>
    %272 = vector.shape_cast %271 : vector<1x1x16x8xf32> to vector<16x8xf32>
    %c6_i32 = arith.constant 6 : i32
    %273 = arith.cmpi sle, %44, %c6_i32 : i32
    %c6_i32_132 = arith.constant 6 : i32
    %274 = arith.cmpi sgt, %50, %c6_i32_132 : i32
    %275 = arith.andi %273, %274 : i1
    %276 = arith.maximumf %255, %272 : vector<16x8xf32>
    %277 = arith.select %275, %276, %255 : vector<16x8xf32>
    %c6_i32_133 = arith.constant 6 : i32
    %278 = arith.cmpi sle, %68, %c6_i32_133 : i32
    %c6_i32_134 = arith.constant 6 : i32
    %279 = arith.cmpi sgt, %74, %c6_i32_134 : i32
    %280 = arith.andi %278, %279 : i1
    %281 = arith.maximumf %260, %272 : vector<16x8xf32>
    %282 = arith.select %280, %281, %260 : vector<16x8xf32>
    %c6_i32_135 = arith.constant 6 : i32
    %283 = arith.cmpi sle, %92, %c6_i32_135 : i32
    %c6_i32_136 = arith.constant 6 : i32
    %284 = arith.cmpi sgt, %98, %c6_i32_136 : i32
    %285 = arith.andi %283, %284 : i1
    %286 = arith.maximumf %265, %272 : vector<16x8xf32>
    %287 = arith.select %285, %286, %265 : vector<16x8xf32>
    %c6_i32_137 = arith.constant 6 : i32
    %288 = arith.cmpi sle, %116, %c6_i32_137 : i32
    %c6_i32_138 = arith.constant 6 : i32
    %289 = arith.cmpi sgt, %122, %c6_i32_138 : i32
    %290 = arith.andi %288, %289 : i1
    %291 = arith.maximumf %270, %272 : vector<16x8xf32>
    %292 = arith.select %290, %291, %270 : vector<16x8xf32>
    %c0_139 = arith.constant 0 : index
    %c7 = arith.constant 7 : index
    %c0_140 = arith.constant 0 : index
    %c0_141 = arith.constant 0 : index
    %293 = vector.load %arg3[%c0_139, %c7, %c0_140, %c0_141] : memref<1x16x16x8xf32, #tpu.memory_space<vmem>>, vector<1x1x16x8xf32>
    %294 = vector.shape_cast %293 : vector<1x1x16x8xf32> to vector<16x8xf32>
    %c7_i32 = arith.constant 7 : i32
    %295 = arith.cmpi sle, %44, %c7_i32 : i32
    %c7_i32_142 = arith.constant 7 : i32
    %296 = arith.cmpi sgt, %50, %c7_i32_142 : i32
    %297 = arith.andi %295, %296 : i1
    %298 = arith.maximumf %277, %294 : vector<16x8xf32>
    %299 = arith.select %297, %298, %277 : vector<16x8xf32>
    %c7_i32_143 = arith.constant 7 : i32
    %300 = arith.cmpi sle, %68, %c7_i32_143 : i32
    %c7_i32_144 = arith.constant 7 : i32
    %301 = arith.cmpi sgt, %74, %c7_i32_144 : i32
    %302 = arith.andi %300, %301 : i1
    %303 = arith.maximumf %282, %294 : vector<16x8xf32>
    %304 = arith.select %302, %303, %282 : vector<16x8xf32>
    %c7_i32_145 = arith.constant 7 : i32
    %305 = arith.cmpi sle, %92, %c7_i32_145 : i32
    %c7_i32_146 = arith.constant 7 : i32
    %306 = arith.cmpi sgt, %98, %c7_i32_146 : i32
    %307 = arith.andi %305, %306 : i1
    %308 = arith.maximumf %287, %294 : vector<16x8xf32>
    %309 = arith.select %307, %308, %287 : vector<16x8xf32>
    %c7_i32_147 = arith.constant 7 : i32
    %310 = arith.cmpi sle, %116, %c7_i32_147 : i32
    %c7_i32_148 = arith.constant 7 : i32
    %311 = arith.cmpi sgt, %122, %c7_i32_148 : i32
    %312 = arith.andi %310, %311 : i1
    %313 = arith.maximumf %292, %294 : vector<16x8xf32>
    %314 = arith.select %312, %313, %292 : vector<16x8xf32>
    %c0_149 = arith.constant 0 : index
    %c8 = arith.constant 8 : index
    %c0_150 = arith.constant 0 : index
    %c0_151 = arith.constant 0 : index
    %315 = vector.load %arg3[%c0_149, %c8, %c0_150, %c0_151] : memref<1x16x16x8xf32, #tpu.memory_space<vmem>>, vector<1x1x16x8xf32>
    %316 = vector.shape_cast %315 : vector<1x1x16x8xf32> to vector<16x8xf32>
    %c8_i32 = arith.constant 8 : i32
    %317 = arith.cmpi sle, %44, %c8_i32 : i32
    %c8_i32_152 = arith.constant 8 : i32
    %318 = arith.cmpi sgt, %50, %c8_i32_152 : i32
    %319 = arith.andi %317, %318 : i1
    %320 = arith.maximumf %299, %316 : vector<16x8xf32>
    %321 = arith.select %319, %320, %299 : vector<16x8xf32>
    %c8_i32_153 = arith.constant 8 : i32
    %322 = arith.cmpi sle, %68, %c8_i32_153 : i32
    %c8_i32_154 = arith.constant 8 : i32
    %323 = arith.cmpi sgt, %74, %c8_i32_154 : i32
    %324 = arith.andi %322, %323 : i1
    %325 = arith.maximumf %304, %316 : vector<16x8xf32>
    %326 = arith.select %324, %325, %304 : vector<16x8xf32>
    %c8_i32_155 = arith.constant 8 : i32
    %327 = arith.cmpi sle, %92, %c8_i32_155 : i32
    %c8_i32_156 = arith.constant 8 : i32
    %328 = arith.cmpi sgt, %98, %c8_i32_156 : i32
    %329 = arith.andi %327, %328 : i1
    %330 = arith.maximumf %309, %316 : vector<16x8xf32>
    %331 = arith.select %329, %330, %309 : vector<16x8xf32>
    %c8_i32_157 = arith.constant 8 : i32
    %332 = arith.cmpi sle, %116, %c8_i32_157 : i32
    %c8_i32_158 = arith.constant 8 : i32
    %333 = arith.cmpi sgt, %122, %c8_i32_158 : i32
    %334 = arith.andi %332, %333 : i1
    %335 = arith.maximumf %314, %316 : vector<16x8xf32>
    %336 = arith.select %334, %335, %314 : vector<16x8xf32>
    %c0_159 = arith.constant 0 : index
    %c9 = arith.constant 9 : index
    %c0_160 = arith.constant 0 : index
    %c0_161 = arith.constant 0 : index
    %337 = vector.load %arg3[%c0_159, %c9, %c0_160, %c0_161] : memref<1x16x16x8xf32, #tpu.memory_space<vmem>>, vector<1x1x16x8xf32>
    %338 = vector.shape_cast %337 : vector<1x1x16x8xf32> to vector<16x8xf32>
    %c9_i32 = arith.constant 9 : i32
    %339 = arith.cmpi sle, %44, %c9_i32 : i32
    %c9_i32_162 = arith.constant 9 : i32
    %340 = arith.cmpi sgt, %50, %c9_i32_162 : i32
    %341 = arith.andi %339, %340 : i1
    %342 = arith.maximumf %321, %338 : vector<16x8xf32>
    %343 = arith.select %341, %342, %321 : vector<16x8xf32>
    %c9_i32_163 = arith.constant 9 : i32
    %344 = arith.cmpi sle, %68, %c9_i32_163 : i32
    %c9_i32_164 = arith.constant 9 : i32
    %345 = arith.cmpi sgt, %74, %c9_i32_164 : i32
    %346 = arith.andi %344, %345 : i1
    %347 = arith.maximumf %326, %338 : vector<16x8xf32>
    %348 = arith.select %346, %347, %326 : vector<16x8xf32>
    %c9_i32_165 = arith.constant 9 : i32
    %349 = arith.cmpi sle, %92, %c9_i32_165 : i32
    %c9_i32_166 = arith.constant 9 : i32
    %350 = arith.cmpi sgt, %98, %c9_i32_166 : i32
    %351 = arith.andi %349, %350 : i1
    %352 = arith.maximumf %331, %338 : vector<16x8xf32>
    %353 = arith.select %351, %352, %331 : vector<16x8xf32>
    %c9_i32_167 = arith.constant 9 : i32
    %354 = arith.cmpi sle, %116, %c9_i32_167 : i32
    %c9_i32_168 = arith.constant 9 : i32
    %355 = arith.cmpi sgt, %122, %c9_i32_168 : i32
    %356 = arith.andi %354, %355 : i1
    %357 = arith.maximumf %336, %338 : vector<16x8xf32>
    %358 = arith.select %356, %357, %336 : vector<16x8xf32>
    %c0_169 = arith.constant 0 : index
    %c10 = arith.constant 10 : index
    %c0_170 = arith.constant 0 : index
    %c0_171 = arith.constant 0 : index
    %359 = vector.load %arg3[%c0_169, %c10, %c0_170, %c0_171] : memref<1x16x16x8xf32, #tpu.memory_space<vmem>>, vector<1x1x16x8xf32>
    %360 = vector.shape_cast %359 : vector<1x1x16x8xf32> to vector<16x8xf32>
    %c10_i32 = arith.constant 10 : i32
    %361 = arith.cmpi sle, %44, %c10_i32 : i32
    %c10_i32_172 = arith.constant 10 : i32
    %362 = arith.cmpi sgt, %50, %c10_i32_172 : i32
    %363 = arith.andi %361, %362 : i1
    %364 = arith.maximumf %343, %360 : vector<16x8xf32>
    %365 = arith.select %363, %364, %343 : vector<16x8xf32>
    %c10_i32_173 = arith.constant 10 : i32
    %366 = arith.cmpi sle, %68, %c10_i32_173 : i32
    %c10_i32_174 = arith.constant 10 : i32
    %367 = arith.cmpi sgt, %74, %c10_i32_174 : i32
    %368 = arith.andi %366, %367 : i1
    %369 = arith.maximumf %348, %360 : vector<16x8xf32>
    %370 = arith.select %368, %369, %348 : vector<16x8xf32>
    %c10_i32_175 = arith.constant 10 : i32
    %371 = arith.cmpi sle, %92, %c10_i32_175 : i32
    %c10_i32_176 = arith.constant 10 : i32
    %372 = arith.cmpi sgt, %98, %c10_i32_176 : i32
    %373 = arith.andi %371, %372 : i1
    %374 = arith.maximumf %353, %360 : vector<16x8xf32>
    %375 = arith.select %373, %374, %353 : vector<16x8xf32>
    %c10_i32_177 = arith.constant 10 : i32
    %376 = arith.cmpi sle, %116, %c10_i32_177 : i32
    %c10_i32_178 = arith.constant 10 : i32
    %377 = arith.cmpi sgt, %122, %c10_i32_178 : i32
    %378 = arith.andi %376, %377 : i1
    %379 = arith.maximumf %358, %360 : vector<16x8xf32>
    %380 = arith.select %378, %379, %358 : vector<16x8xf32>
    %c0_179 = arith.constant 0 : index
    %c11 = arith.constant 11 : index
    %c0_180 = arith.constant 0 : index
    %c0_181 = arith.constant 0 : index
    %381 = vector.load %arg3[%c0_179, %c11, %c0_180, %c0_181] : memref<1x16x16x8xf32, #tpu.memory_space<vmem>>, vector<1x1x16x8xf32>
    %382 = vector.shape_cast %381 : vector<1x1x16x8xf32> to vector<16x8xf32>
    %c11_i32 = arith.constant 11 : i32
    %383 = arith.cmpi sle, %44, %c11_i32 : i32
    %c11_i32_182 = arith.constant 11 : i32
    %384 = arith.cmpi sgt, %50, %c11_i32_182 : i32
    %385 = arith.andi %383, %384 : i1
    %386 = arith.maximumf %365, %382 : vector<16x8xf32>
    %387 = arith.select %385, %386, %365 : vector<16x8xf32>
    %c11_i32_183 = arith.constant 11 : i32
    %388 = arith.cmpi sle, %68, %c11_i32_183 : i32
    %c11_i32_184 = arith.constant 11 : i32
    %389 = arith.cmpi sgt, %74, %c11_i32_184 : i32
    %390 = arith.andi %388, %389 : i1
    %391 = arith.maximumf %370, %382 : vector<16x8xf32>
    %392 = arith.select %390, %391, %370 : vector<16x8xf32>
    %c11_i32_185 = arith.constant 11 : i32
    %393 = arith.cmpi sle, %92, %c11_i32_185 : i32
    %c11_i32_186 = arith.constant 11 : i32
    %394 = arith.cmpi sgt, %98, %c11_i32_186 : i32
    %395 = arith.andi %393, %394 : i1
    %396 = arith.maximumf %375, %382 : vector<16x8xf32>
    %397 = arith.select %395, %396, %375 : vector<16x8xf32>
    %c11_i32_187 = arith.constant 11 : i32
    %398 = arith.cmpi sle, %116, %c11_i32_187 : i32
    %c11_i32_188 = arith.constant 11 : i32
    %399 = arith.cmpi sgt, %122, %c11_i32_188 : i32
    %400 = arith.andi %398, %399 : i1
    %401 = arith.maximumf %380, %382 : vector<16x8xf32>
    %402 = arith.select %400, %401, %380 : vector<16x8xf32>
    %c0_189 = arith.constant 0 : index
    %c12 = arith.constant 12 : index
    %c0_190 = arith.constant 0 : index
    %c0_191 = arith.constant 0 : index
    %403 = vector.load %arg3[%c0_189, %c12, %c0_190, %c0_191] : memref<1x16x16x8xf32, #tpu.memory_space<vmem>>, vector<1x1x16x8xf32>
    %404 = vector.shape_cast %403 : vector<1x1x16x8xf32> to vector<16x8xf32>
    %c12_i32 = arith.constant 12 : i32
    %405 = arith.cmpi sle, %44, %c12_i32 : i32
    %c12_i32_192 = arith.constant 12 : i32
    %406 = arith.cmpi sgt, %50, %c12_i32_192 : i32
    %407 = arith.andi %405, %406 : i1
    %408 = arith.maximumf %387, %404 : vector<16x8xf32>
    %409 = arith.select %407, %408, %387 : vector<16x8xf32>
    %c12_i32_193 = arith.constant 12 : i32
    %410 = arith.cmpi sle, %68, %c12_i32_193 : i32
    %c12_i32_194 = arith.constant 12 : i32
    %411 = arith.cmpi sgt, %74, %c12_i32_194 : i32
    %412 = arith.andi %410, %411 : i1
    %413 = arith.maximumf %392, %404 : vector<16x8xf32>
    %414 = arith.select %412, %413, %392 : vector<16x8xf32>
    %c12_i32_195 = arith.constant 12 : i32
    %415 = arith.cmpi sle, %92, %c12_i32_195 : i32
    %c12_i32_196 = arith.constant 12 : i32
    %416 = arith.cmpi sgt, %98, %c12_i32_196 : i32
    %417 = arith.andi %415, %416 : i1
    %418 = arith.maximumf %397, %404 : vector<16x8xf32>
    %419 = arith.select %417, %418, %397 : vector<16x8xf32>
    %c12_i32_197 = arith.constant 12 : i32
    %420 = arith.cmpi sle, %116, %c12_i32_197 : i32
    %c12_i32_198 = arith.constant 12 : i32
    %421 = arith.cmpi sgt, %122, %c12_i32_198 : i32
    %422 = arith.andi %420, %421 : i1
    %423 = arith.maximumf %402, %404 : vector<16x8xf32>
    %424 = arith.select %422, %423, %402 : vector<16x8xf32>
    %c0_199 = arith.constant 0 : index
    %c13 = arith.constant 13 : index
    %c0_200 = arith.constant 0 : index
    %c0_201 = arith.constant 0 : index
    %425 = vector.load %arg3[%c0_199, %c13, %c0_200, %c0_201] : memref<1x16x16x8xf32, #tpu.memory_space<vmem>>, vector<1x1x16x8xf32>
    %426 = vector.shape_cast %425 : vector<1x1x16x8xf32> to vector<16x8xf32>
    %c13_i32 = arith.constant 13 : i32
    %427 = arith.cmpi sle, %44, %c13_i32 : i32
    %c13_i32_202 = arith.constant 13 : i32
    %428 = arith.cmpi sgt, %50, %c13_i32_202 : i32
    %429 = arith.andi %427, %428 : i1
    %430 = arith.maximumf %409, %426 : vector<16x8xf32>
    %431 = arith.select %429, %430, %409 : vector<16x8xf32>
    %c13_i32_203 = arith.constant 13 : i32
    %432 = arith.cmpi sle, %68, %c13_i32_203 : i32
    %c13_i32_204 = arith.constant 13 : i32
    %433 = arith.cmpi sgt, %74, %c13_i32_204 : i32
    %434 = arith.andi %432, %433 : i1
    %435 = arith.maximumf %414, %426 : vector<16x8xf32>
    %436 = arith.select %434, %435, %414 : vector<16x8xf32>
    %c13_i32_205 = arith.constant 13 : i32
    %437 = arith.cmpi sle, %92, %c13_i32_205 : i32
    %c13_i32_206 = arith.constant 13 : i32
    %438 = arith.cmpi sgt, %98, %c13_i32_206 : i32
    %439 = arith.andi %437, %438 : i1
    %440 = arith.maximumf %419, %426 : vector<16x8xf32>
    %441 = arith.select %439, %440, %419 : vector<16x8xf32>
    %c13_i32_207 = arith.constant 13 : i32
    %442 = arith.cmpi sle, %116, %c13_i32_207 : i32
    %c13_i32_208 = arith.constant 13 : i32
    %443 = arith.cmpi sgt, %122, %c13_i32_208 : i32
    %444 = arith.andi %442, %443 : i1
    %445 = arith.maximumf %424, %426 : vector<16x8xf32>
    %446 = arith.select %444, %445, %424 : vector<16x8xf32>
    %c0_209 = arith.constant 0 : index
    %c14 = arith.constant 14 : index
    %c0_210 = arith.constant 0 : index
    %c0_211 = arith.constant 0 : index
    %447 = vector.load %arg3[%c0_209, %c14, %c0_210, %c0_211] : memref<1x16x16x8xf32, #tpu.memory_space<vmem>>, vector<1x1x16x8xf32>
    %448 = vector.shape_cast %447 : vector<1x1x16x8xf32> to vector<16x8xf32>
    %c14_i32 = arith.constant 14 : i32
    %449 = arith.cmpi sle, %44, %c14_i32 : i32
    %c14_i32_212 = arith.constant 14 : i32
    %450 = arith.cmpi sgt, %50, %c14_i32_212 : i32
    %451 = arith.andi %449, %450 : i1
    %452 = arith.maximumf %431, %448 : vector<16x8xf32>
    %453 = arith.select %451, %452, %431 : vector<16x8xf32>
    %c14_i32_213 = arith.constant 14 : i32
    %454 = arith.cmpi sle, %68, %c14_i32_213 : i32
    %c14_i32_214 = arith.constant 14 : i32
    %455 = arith.cmpi sgt, %74, %c14_i32_214 : i32
    %456 = arith.andi %454, %455 : i1
    %457 = arith.maximumf %436, %448 : vector<16x8xf32>
    %458 = arith.select %456, %457, %436 : vector<16x8xf32>
    %c14_i32_215 = arith.constant 14 : i32
    %459 = arith.cmpi sle, %92, %c14_i32_215 : i32
    %c14_i32_216 = arith.constant 14 : i32
    %460 = arith.cmpi sgt, %98, %c14_i32_216 : i32
    %461 = arith.andi %459, %460 : i1
    %462 = arith.maximumf %441, %448 : vector<16x8xf32>
    %463 = arith.select %461, %462, %441 : vector<16x8xf32>
    %c14_i32_217 = arith.constant 14 : i32
    %464 = arith.cmpi sle, %116, %c14_i32_217 : i32
    %c14_i32_218 = arith.constant 14 : i32
    %465 = arith.cmpi sgt, %122, %c14_i32_218 : i32
    %466 = arith.andi %464, %465 : i1
    %467 = arith.maximumf %446, %448 : vector<16x8xf32>
    %468 = arith.select %466, %467, %446 : vector<16x8xf32>
    %c0_219 = arith.constant 0 : index
    %c15 = arith.constant 15 : index
    %c0_220 = arith.constant 0 : index
    %c0_221 = arith.constant 0 : index
    %469 = vector.load %arg3[%c0_219, %c15, %c0_220, %c0_221] : memref<1x16x16x8xf32, #tpu.memory_space<vmem>>, vector<1x1x16x8xf32>
    %470 = vector.shape_cast %469 : vector<1x1x16x8xf32> to vector<16x8xf32>
    %c15_i32 = arith.constant 15 : i32
    %471 = arith.cmpi sle, %44, %c15_i32 : i32
    %c15_i32_222 = arith.constant 15 : i32
    %472 = arith.cmpi sgt, %50, %c15_i32_222 : i32
    %473 = arith.andi %471, %472 : i1
    %474 = arith.maximumf %453, %470 : vector<16x8xf32>
    %475 = arith.select %473, %474, %453 : vector<16x8xf32>
    %c15_i32_223 = arith.constant 15 : i32
    %476 = arith.cmpi sle, %68, %c15_i32_223 : i32
    %c15_i32_224 = arith.constant 15 : i32
    %477 = arith.cmpi sgt, %74, %c15_i32_224 : i32
    %478 = arith.andi %476, %477 : i1
    %479 = arith.maximumf %458, %470 : vector<16x8xf32>
    %480 = arith.select %478, %479, %458 : vector<16x8xf32>
    %c15_i32_225 = arith.constant 15 : i32
    %481 = arith.cmpi sle, %92, %c15_i32_225 : i32
    %c15_i32_226 = arith.constant 15 : i32
    %482 = arith.cmpi sgt, %98, %c15_i32_226 : i32
    %483 = arith.andi %481, %482 : i1
    %484 = arith.maximumf %463, %470 : vector<16x8xf32>
    %485 = arith.select %483, %484, %463 : vector<16x8xf32>
    %c15_i32_227 = arith.constant 15 : i32
    %486 = arith.cmpi sle, %116, %c15_i32_227 : i32
    %c15_i32_228 = arith.constant 15 : i32
    %487 = arith.cmpi sgt, %122, %c15_i32_228 : i32
    %488 = arith.andi %486, %487 : i1
    %489 = arith.maximumf %468, %470 : vector<16x8xf32>
    %490 = arith.select %488, %489, %468 : vector<16x8xf32>
    %491 = tpu.iota {dimensions = array<i32: 0>} : vector<16x1xi32>
    %492 = arith.cmpi sle, %50, %44 : i32
    %493 = vector.broadcast %56 : i32 to vector<16x1xi32>
    %494 = arith.cmpi sge, %491, %493 : vector<16x1xi32>
    %495 = vector.broadcast %62 : i32 to vector<16x1xi32>
    %496 = arith.cmpi slt, %491, %495 : vector<16x1xi32>
    %497 = arith.andi %494, %496 : vector<16x1xi1>
    %cst_229 = arith.constant 0xFF800000 : f32
    %498 = vector.shape_cast %497 : vector<16x1xi1> to vector<16x1xi1>
    %499 = vector.broadcast %498 : vector<16x1xi1> to vector<16x8xi1>
    %500 = vector.broadcast %cst_229 : f32 to vector<16x8xf32>
    %501 = arith.select %499, %475, %500 : vector<16x8xi1>, vector<16x8xf32>
    %cst_230 = arith.constant dense<0xFF800000> : vector<8xf32>
    %502 = vector.multi_reduction <maximumf>, %501, %cst_230 [0] : vector<16x8xf32> to vector<8xf32>
    %503 = vector.shape_cast %502 : vector<8xf32> to vector<1x8xf32>
    %504 = arith.cmpi sle, %62, %56 : i32
    %505 = arith.ori %492, %504 : i1
    %cst_231 = arith.constant 0.000000e+00 : f32
    %506 = vector.broadcast %cst_231 : f32 to vector<1x8xf32>
    %507 = arith.select %505, %506, %503 : vector<1x8xf32>
    %c0_232 = arith.constant 0 : index
    %c0_233 = arith.constant 0 : index
    %c0_234 = arith.constant 0 : index
    %508 = vector.load %arg4[%c0_232, %c0_233, %c0_234] : memref<1x16x8xf32, #tpu.memory_space<vmem>>, vector<1x1x8xf32>
    %509 = vector.shape_cast %508 : vector<1x1x8xf32> to vector<1x8xf32>
    %510 = vector.shape_cast %507 : vector<1x8xf32> to vector<1x1x8xf32>
    tpu.vector_store %arg4[%c0_232, %c0_233, %c0_234], %510 {strides = array<i32>} : memref<1x16x8xf32, #tpu.memory_space<vmem>>, vector<1x1x8xf32>,
    %511 = vector.broadcast %80 : i32 to vector<16x1xi32>
    %512 = arith.cmpi sge, %491, %511 : vector<16x1xi32>
    %513 = vector.broadcast %86 : i32 to vector<16x1xi32>
    %514 = arith.cmpi slt, %491, %513 : vector<16x1xi32>
    %515 = arith.andi %512, %514 : vector<16x1xi1>
    %cst_235 = arith.constant 0xFF800000 : f32
    %516 = vector.shape_cast %515 : vector<16x1xi1> to vector<16x1xi1>
    %517 = vector.broadcast %516 : vector<16x1xi1> to vector<16x8xi1>
    %518 = vector.broadcast %cst_235 : f32 to vector<16x8xf32>
    %519 = arith.select %517, %475, %518 : vector<16x8xi1>, vector<16x8xf32>
    %cst_236 = arith.constant dense<0xFF800000> : vector<8xf32>
    %520 = vector.multi_reduction <maximumf>, %519, %cst_236 [0] : vector<16x8xf32> to vector<8xf32>
    %521 = vector.shape_cast %520 : vector<8xf32> to vector<1x8xf32>
    %522 = arith.cmpi sle, %86, %80 : i32
    %523 = arith.ori %492, %522 : i1
    %cst_237 = arith.constant 0.000000e+00 : f32
    %524 = vector.broadcast %cst_237 : f32 to vector<1x8xf32>
    %525 = arith.select %523, %524, %521 : vector<1x8xf32>
    %c0_238 = arith.constant 0 : index
    %c1_239 = arith.constant 1 : index
    %c0_240 = arith.constant 0 : index
    %526 = vector.load %arg4[%c0_238, %c1_239, %c0_240] : memref<1x16x8xf32, #tpu.memory_space<vmem>>, vector<1x1x8xf32>
    %527 = vector.shape_cast %526 : vector<1x1x8xf32> to vector<1x8xf32>
    %528 = vector.shape_cast %525 : vector<1x8xf32> to vector<1x1x8xf32>
    tpu.vector_store %arg4[%c0_238, %c1_239, %c0_240], %528 {strides = array<i32>} : memref<1x16x8xf32, #tpu.memory_space<vmem>>, vector<1x1x8xf32>,
    %529 = vector.broadcast %104 : i32 to vector<16x1xi32>
    %530 = arith.cmpi sge, %491, %529 : vector<16x1xi32>
    %531 = vector.broadcast %110 : i32 to vector<16x1xi32>
    %532 = arith.cmpi slt, %491, %531 : vector<16x1xi32>
    %533 = arith.andi %530, %532 : vector<16x1xi1>
    %cst_241 = arith.constant 0xFF800000 : f32
    %534 = vector.shape_cast %533 : vector<16x1xi1> to vector<16x1xi1>
    %535 = vector.broadcast %534 : vector<16x1xi1> to vector<16x8xi1>
    %536 = vector.broadcast %cst_241 : f32 to vector<16x8xf32>
    %537 = arith.select %535, %475, %536 : vector<16x8xi1>, vector<16x8xf32>
    %cst_242 = arith.constant dense<0xFF800000> : vector<8xf32>
    %538 = vector.multi_reduction <maximumf>, %537, %cst_242 [0] : vector<16x8xf32> to vector<8xf32>
    %539 = vector.shape_cast %538 : vector<8xf32> to vector<1x8xf32>
    %540 = arith.cmpi sle, %110, %104 : i32
    %541 = arith.ori %492, %540 : i1
    %cst_243 = arith.constant 0.000000e+00 : f32
    %542 = vector.broadcast %cst_243 : f32 to vector<1x8xf32>
    %543 = arith.select %541, %542, %539 : vector<1x8xf32>
    %c0_244 = arith.constant 0 : index
    %c2_245 = arith.constant 2 : index
    %c0_246 = arith.constant 0 : index
    %544 = vector.load %arg4[%c0_244, %c2_245, %c0_246] : memref<1x16x8xf32, #tpu.memory_space<vmem>>, vector<1x1x8xf32>
    %545 = vector.shape_cast %544 : vector<1x1x8xf32> to vector<1x8xf32>
    %546 = vector.shape_cast %543 : vector<1x8xf32> to vector<1x1x8xf32>
    tpu.vector_store %arg4[%c0_244, %c2_245, %c0_246], %546 {strides = array<i32>} : memref<1x16x8xf32, #tpu.memory_space<vmem>>, vector<1x1x8xf32>,
    %547 = vector.broadcast %128 : i32 to vector<16x1xi32>
    %548 = arith.cmpi sge, %491, %547 : vector<16x1xi32>
    %549 = vector.broadcast %134 : i32 to vector<16x1xi32>
    %550 = arith.cmpi slt, %491, %549 : vector<16x1xi32>
    %551 = arith.andi %548, %550 : vector<16x1xi1>
    %cst_247 = arith.constant 0xFF800000 : f32
    %552 = vector.shape_cast %551 : vector<16x1xi1> to vector<16x1xi1>
    %553 = vector.broadcast %552 : vector<16x1xi1> to vector<16x8xi1>
    %554 = vector.broadcast %cst_247 : f32 to vector<16x8xf32>
    %555 = arith.select %553, %475, %554 : vector<16x8xi1>, vector<16x8xf32>
    %cst_248 = arith.constant dense<0xFF800000> : vector<8xf32>
    %556 = vector.multi_reduction <maximumf>, %555, %cst_248 [0] : vector<16x8xf32> to vector<8xf32>
    %557 = vector.shape_cast %556 : vector<8xf32> to vector<1x8xf32>
    %558 = arith.cmpi sle, %134, %128 : i32
    %559 = arith.ori %492, %558 : i1
    %cst_249 = arith.constant 0.000000e+00 : f32
    %560 = vector.broadcast %cst_249 : f32 to vector<1x8xf32>
    %561 = arith.select %559, %560, %557 : vector<1x8xf32>
    %c0_250 = arith.constant 0 : index
    %c3_251 = arith.constant 3 : index
    %c0_252 = arith.constant 0 : index
    %562 = vector.load %arg4[%c0_250, %c3_251, %c0_252] : memref<1x16x8xf32, #tpu.memory_space<vmem>>, vector<1x1x8xf32>
    %563 = vector.shape_cast %562 : vector<1x1x8xf32> to vector<1x8xf32>
    %564 = vector.shape_cast %561 : vector<1x8xf32> to vector<1x1x8xf32>
    tpu.vector_store %arg4[%c0_250, %c3_251, %c0_252], %564 {strides = array<i32>} : memref<1x16x8xf32, #tpu.memory_space<vmem>>, vector<1x1x8xf32>,
    %565 = arith.cmpi sle, %74, %68 : i32
    %566 = vector.broadcast %56 : i32 to vector<16x1xi32>
    %567 = arith.cmpi sge, %491, %566 : vector<16x1xi32>
    %568 = vector.broadcast %62 : i32 to vector<16x1xi32>
    %569 = arith.cmpi slt, %491, %568 : vector<16x1xi32>
    %570 = arith.andi %567, %569 : vector<16x1xi1>
    %cst_253 = arith.constant 0xFF800000 : f32
    %571 = vector.shape_cast %570 : vector<16x1xi1> to vector<16x1xi1>
    %572 = vector.broadcast %571 : vector<16x1xi1> to vector<16x8xi1>
    %573 = vector.broadcast %cst_253 : f32 to vector<16x8xf32>
    %574 = arith.select %572, %480, %573 : vector<16x8xi1>, vector<16x8xf32>
    %cst_254 = arith.constant dense<0xFF800000> : vector<8xf32>
    %575 = vector.multi_reduction <maximumf>, %574, %cst_254 [0] : vector<16x8xf32> to vector<8xf32>
    %576 = vector.shape_cast %575 : vector<8xf32> to vector<1x8xf32>
    %577 = arith.cmpi sle, %62, %56 : i32
    %578 = arith.ori %565, %577 : i1
    %cst_255 = arith.constant 0.000000e+00 : f32
    %579 = vector.broadcast %cst_255 : f32 to vector<1x8xf32>
    %580 = arith.select %578, %579, %576 : vector<1x8xf32>
    %c0_256 = arith.constant 0 : index
    %c4_257 = arith.constant 4 : index
    %c0_258 = arith.constant 0 : index
    %581 = vector.load %arg4[%c0_256, %c4_257, %c0_258] : memref<1x16x8xf32, #tpu.memory_space<vmem>>, vector<1x1x8xf32>
    %582 = vector.shape_cast %581 : vector<1x1x8xf32> to vector<1x8xf32>
    %583 = vector.shape_cast %580 : vector<1x8xf32> to vector<1x1x8xf32>
    tpu.vector_store %arg4[%c0_256, %c4_257, %c0_258], %583 {strides = array<i32>} : memref<1x16x8xf32, #tpu.memory_space<vmem>>, vector<1x1x8xf32>,
    %584 = vector.broadcast %80 : i32 to vector<16x1xi32>
    %585 = arith.cmpi sge, %491, %584 : vector<16x1xi32>
    %586 = vector.broadcast %86 : i32 to vector<16x1xi32>
    %587 = arith.cmpi slt, %491, %586 : vector<16x1xi32>
    %588 = arith.andi %585, %587 : vector<16x1xi1>
    %cst_259 = arith.constant 0xFF800000 : f32
    %589 = vector.shape_cast %588 : vector<16x1xi1> to vector<16x1xi1>
    %590 = vector.broadcast %589 : vector<16x1xi1> to vector<16x8xi1>
    %591 = vector.broadcast %cst_259 : f32 to vector<16x8xf32>
    %592 = arith.select %590, %480, %591 : vector<16x8xi1>, vector<16x8xf32>
    %cst_260 = arith.constant dense<0xFF800000> : vector<8xf32>
    %593 = vector.multi_reduction <maximumf>, %592, %cst_260 [0] : vector<16x8xf32> to vector<8xf32>
    %594 = vector.shape_cast %593 : vector<8xf32> to vector<1x8xf32>
    %595 = arith.cmpi sle, %86, %80 : i32
    %596 = arith.ori %565, %595 : i1
    %cst_261 = arith.constant 0.000000e+00 : f32
    %597 = vector.broadcast %cst_261 : f32 to vector<1x8xf32>
    %598 = arith.select %596, %597, %594 : vector<1x8xf32>
    %c0_262 = arith.constant 0 : index
    %c5_263 = arith.constant 5 : index
    %c0_264 = arith.constant 0 : index
    %599 = vector.load %arg4[%c0_262, %c5_263, %c0_264] : memref<1x16x8xf32, #tpu.memory_space<vmem>>, vector<1x1x8xf32>
    %600 = vector.shape_cast %599 : vector<1x1x8xf32> to vector<1x8xf32>
    %601 = vector.shape_cast %598 : vector<1x8xf32> to vector<1x1x8xf32>
    tpu.vector_store %arg4[%c0_262, %c5_263, %c0_264], %601 {strides = array<i32>} : memref<1x16x8xf32, #tpu.memory_space<vmem>>, vector<1x1x8xf32>,
    %602 = vector.broadcast %104 : i32 to vector<16x1xi32>
    %603 = arith.cmpi sge, %491, %602 : vector<16x1xi32>
    %604 = vector.broadcast %110 : i32 to vector<16x1xi32>
    %605 = arith.cmpi slt, %491, %604 : vector<16x1xi32>
    %606 = arith.andi %603, %605 : vector<16x1xi1>
    %cst_265 = arith.constant 0xFF800000 : f32
    %607 = vector.shape_cast %606 : vector<16x1xi1> to vector<16x1xi1>
    %608 = vector.broadcast %607 : vector<16x1xi1> to vector<16x8xi1>
    %609 = vector.broadcast %cst_265 : f32 to vector<16x8xf32>
    %610 = arith.select %608, %480, %609 : vector<16x8xi1>, vector<16x8xf32>
    %cst_266 = arith.constant dense<0xFF800000> : vector<8xf32>
    %611 = vector.multi_reduction <maximumf>, %610, %cst_266 [0] : vector<16x8xf32> to vector<8xf32>
    %612 = vector.shape_cast %611 : vector<8xf32> to vector<1x8xf32>
    %613 = arith.cmpi sle, %110, %104 : i32
    %614 = arith.ori %565, %613 : i1
    %cst_267 = arith.constant 0.000000e+00 : f32
    %615 = vector.broadcast %cst_267 : f32 to vector<1x8xf32>
    %616 = arith.select %614, %615, %612 : vector<1x8xf32>
    %c0_268 = arith.constant 0 : index
    %c6_269 = arith.constant 6 : index
    %c0_270 = arith.constant 0 : index
    %617 = vector.load %arg4[%c0_268, %c6_269, %c0_270] : memref<1x16x8xf32, #tpu.memory_space<vmem>>, vector<1x1x8xf32>
    %618 = vector.shape_cast %617 : vector<1x1x8xf32> to vector<1x8xf32>
    %619 = vector.shape_cast %616 : vector<1x8xf32> to vector<1x1x8xf32>
    tpu.vector_store %arg4[%c0_268, %c6_269, %c0_270], %619 {strides = array<i32>} : memref<1x16x8xf32, #tpu.memory_space<vmem>>, vector<1x1x8xf32>,
    %620 = vector.broadcast %128 : i32 to vector<16x1xi32>
    %621 = arith.cmpi sge, %491, %620 : vector<16x1xi32>
    %622 = vector.broadcast %134 : i32 to vector<16x1xi32>
    %623 = arith.cmpi slt, %491, %622 : vector<16x1xi32>
    %624 = arith.andi %621, %623 : vector<16x1xi1>
    %cst_271 = arith.constant 0xFF800000 : f32
    %625 = vector.shape_cast %624 : vector<16x1xi1> to vector<16x1xi1>
    %626 = vector.broadcast %625 : vector<16x1xi1> to vector<16x8xi1>
    %627 = vector.broadcast %cst_271 : f32 to vector<16x8xf32>
    %628 = arith.select %626, %480, %627 : vector<16x8xi1>, vector<16x8xf32>
    %cst_272 = arith.constant dense<0xFF800000> : vector<8xf32>
    %629 = vector.multi_reduction <maximumf>, %628, %cst_272 [0] : vector<16x8xf32> to vector<8xf32>
    %630 = vector.shape_cast %629 : vector<8xf32> to vector<1x8xf32>
    %631 = arith.cmpi sle, %134, %128 : i32
    %632 = arith.ori %565, %631 : i1
    %cst_273 = arith.constant 0.000000e+00 : f32
    %633 = vector.broadcast %cst_273 : f32 to vector<1x8xf32>
    %634 = arith.select %632, %633, %630 : vector<1x8xf32>
    %c0_274 = arith.constant 0 : index
    %c7_275 = arith.constant 7 : index
    %c0_276 = arith.constant 0 : index
    %635 = vector.load %arg4[%c0_274, %c7_275, %c0_276] : memref<1x16x8xf32, #tpu.memory_space<vmem>>, vector<1x1x8xf32>
    %636 = vector.shape_cast %635 : vector<1x1x8xf32> to vector<1x8xf32>
    %637 = vector.shape_cast %634 : vector<1x8xf32> to vector<1x1x8xf32>
    tpu.vector_store %arg4[%c0_274, %c7_275, %c0_276], %637 {strides = array<i32>} : memref<1x16x8xf32, #tpu.memory_space<vmem>>, vector<1x1x8xf32>,
    %638 = arith.cmpi sle, %98, %92 : i32
    %639 = vector.broadcast %56 : i32 to vector<16x1xi32>
    %640 = arith.cmpi sge, %491, %639 : vector<16x1xi32>
    %641 = vector.broadcast %62 : i32 to vector<16x1xi32>
    %642 = arith.cmpi slt, %491, %641 : vector<16x1xi32>
    %643 = arith.andi %640, %642 : vector<16x1xi1>
    %cst_277 = arith.constant 0xFF800000 : f32
    %644 = vector.shape_cast %643 : vector<16x1xi1> to vector<16x1xi1>
    %645 = vector.broadcast %644 : vector<16x1xi1> to vector<16x8xi1>
    %646 = vector.broadcast %cst_277 : f32 to vector<16x8xf32>
    %647 = arith.select %645, %485, %646 : vector<16x8xi1>, vector<16x8xf32>
    %cst_278 = arith.constant dense<0xFF800000> : vector<8xf32>
    %648 = vector.multi_reduction <maximumf>, %647, %cst_278 [0] : vector<16x8xf32> to vector<8xf32>
    %649 = vector.shape_cast %648 : vector<8xf32> to vector<1x8xf32>
    %650 = arith.cmpi sle, %62, %56 : i32
    %651 = arith.ori %638, %650 : i1
    %cst_279 = arith.constant 0.000000e+00 : f32
    %652 = vector.broadcast %cst_279 : f32 to vector<1x8xf32>
    %653 = arith.select %651, %652, %649 : vector<1x8xf32>
    %c0_280 = arith.constant 0 : index
    %c8_281 = arith.constant 8 : index
    %c0_282 = arith.constant 0 : index
    %654 = vector.load %arg4[%c0_280, %c8_281, %c0_282] : memref<1x16x8xf32, #tpu.memory_space<vmem>>, vector<1x1x8xf32>
    %655 = vector.shape_cast %654 : vector<1x1x8xf32> to vector<1x8xf32>
    %656 = vector.shape_cast %653 : vector<1x8xf32> to vector<1x1x8xf32>
    tpu.vector_store %arg4[%c0_280, %c8_281, %c0_282], %656 {strides = array<i32>} : memref<1x16x8xf32, #tpu.memory_space<vmem>>, vector<1x1x8xf32>,
    %657 = vector.broadcast %80 : i32 to vector<16x1xi32>
    %658 = arith.cmpi sge, %491, %657 : vector<16x1xi32>
    %659 = vector.broadcast %86 : i32 to vector<16x1xi32>
    %660 = arith.cmpi slt, %491, %659 : vector<16x1xi32>
    %661 = arith.andi %658, %660 : vector<16x1xi1>
    %cst_283 = arith.constant 0xFF800000 : f32
    %662 = vector.shape_cast %661 : vector<16x1xi1> to vector<16x1xi1>
    %663 = vector.broadcast %662 : vector<16x1xi1> to vector<16x8xi1>
    %664 = vector.broadcast %cst_283 : f32 to vector<16x8xf32>
    %665 = arith.select %663, %485, %664 : vector<16x8xi1>, vector<16x8xf32>
    %cst_284 = arith.constant dense<0xFF800000> : vector<8xf32>
    %666 = vector.multi_reduction <maximumf>, %665, %cst_284 [0] : vector<16x8xf32> to vector<8xf32>
    %667 = vector.shape_cast %666 : vector<8xf32> to vector<1x8xf32>
    %668 = arith.cmpi sle, %86, %80 : i32
    %669 = arith.ori %638, %668 : i1
    %cst_285 = arith.constant 0.000000e+00 : f32
    %670 = vector.broadcast %cst_285 : f32 to vector<1x8xf32>
    %671 = arith.select %669, %670, %667 : vector<1x8xf32>
    %c0_286 = arith.constant 0 : index
    %c9_287 = arith.constant 9 : index
    %c0_288 = arith.constant 0 : index
    %672 = vector.load %arg4[%c0_286, %c9_287, %c0_288] : memref<1x16x8xf32, #tpu.memory_space<vmem>>, vector<1x1x8xf32>
    %673 = vector.shape_cast %672 : vector<1x1x8xf32> to vector<1x8xf32>
    %674 = vector.shape_cast %671 : vector<1x8xf32> to vector<1x1x8xf32>
    tpu.vector_store %arg4[%c0_286, %c9_287, %c0_288], %674 {strides = array<i32>} : memref<1x16x8xf32, #tpu.memory_space<vmem>>, vector<1x1x8xf32>,
    %675 = vector.broadcast %104 : i32 to vector<16x1xi32>
    %676 = arith.cmpi sge, %491, %675 : vector<16x1xi32>
    %677 = vector.broadcast %110 : i32 to vector<16x1xi32>
    %678 = arith.cmpi slt, %491, %677 : vector<16x1xi32>
    %679 = arith.andi %676, %678 : vector<16x1xi1>
    %cst_289 = arith.constant 0xFF800000 : f32
    %680 = vector.shape_cast %679 : vector<16x1xi1> to vector<16x1xi1>
    %681 = vector.broadcast %680 : vector<16x1xi1> to vector<16x8xi1>
    %682 = vector.broadcast %cst_289 : f32 to vector<16x8xf32>
    %683 = arith.select %681, %485, %682 : vector<16x8xi1>, vector<16x8xf32>
    %cst_290 = arith.constant dense<0xFF800000> : vector<8xf32>
    %684 = vector.multi_reduction <maximumf>, %683, %cst_290 [0] : vector<16x8xf32> to vector<8xf32>
    %685 = vector.shape_cast %684 : vector<8xf32> to vector<1x8xf32>
    %686 = arith.cmpi sle, %110, %104 : i32
    %687 = arith.ori %638, %686 : i1
    %cst_291 = arith.constant 0.000000e+00 : f32
    %688 = vector.broadcast %cst_291 : f32 to vector<1x8xf32>
    %689 = arith.select %687, %688, %685 : vector<1x8xf32>
    %c0_292 = arith.constant 0 : index
    %c10_293 = arith.constant 10 : index
    %c0_294 = arith.constant 0 : index
    %690 = vector.load %arg4[%c0_292, %c10_293, %c0_294] : memref<1x16x8xf32, #tpu.memory_space<vmem>>, vector<1x1x8xf32>
    %691 = vector.shape_cast %690 : vector<1x1x8xf32> to vector<1x8xf32>
    %692 = vector.shape_cast %689 : vector<1x8xf32> to vector<1x1x8xf32>
    tpu.vector_store %arg4[%c0_292, %c10_293, %c0_294], %692 {strides = array<i32>} : memref<1x16x8xf32, #tpu.memory_space<vmem>>, vector<1x1x8xf32>,
    %693 = vector.broadcast %128 : i32 to vector<16x1xi32>
    %694 = arith.cmpi sge, %491, %693 : vector<16x1xi32>
    %695 = vector.broadcast %134 : i32 to vector<16x1xi32>
    %696 = arith.cmpi slt, %491, %695 : vector<16x1xi32>
    %697 = arith.andi %694, %696 : vector<16x1xi1>
    %cst_295 = arith.constant 0xFF800000 : f32
    %698 = vector.shape_cast %697 : vector<16x1xi1> to vector<16x1xi1>
    %699 = vector.broadcast %698 : vector<16x1xi1> to vector<16x8xi1>
    %700 = vector.broadcast %cst_295 : f32 to vector<16x8xf32>
    %701 = arith.select %699, %485, %700 : vector<16x8xi1>, vector<16x8xf32>
    %cst_296 = arith.constant dense<0xFF800000> : vector<8xf32>
    %702 = vector.multi_reduction <maximumf>, %701, %cst_296 [0] : vector<16x8xf32> to vector<8xf32>
    %703 = vector.shape_cast %702 : vector<8xf32> to vector<1x8xf32>
    %704 = arith.cmpi sle, %134, %128 : i32
    %705 = arith.ori %638, %704 : i1
    %cst_297 = arith.constant 0.000000e+00 : f32
    %706 = vector.broadcast %cst_297 : f32 to vector<1x8xf32>
    %707 = arith.select %705, %706, %703 : vector<1x8xf32>
    %c0_298 = arith.constant 0 : index
    %c11_299 = arith.constant 11 : index
    %c0_300 = arith.constant 0 : index
    %708 = vector.load %arg4[%c0_298, %c11_299, %c0_300] : memref<1x16x8xf32, #tpu.memory_space<vmem>>, vector<1x1x8xf32>
    %709 = vector.shape_cast %708 : vector<1x1x8xf32> to vector<1x8xf32>
    %710 = vector.shape_cast %707 : vector<1x8xf32> to vector<1x1x8xf32>
    tpu.vector_store %arg4[%c0_298, %c11_299, %c0_300], %710 {strides = array<i32>} : memref<1x16x8xf32, #tpu.memory_space<vmem>>, vector<1x1x8xf32>,
    %711 = arith.cmpi sle, %122, %116 : i32
    %712 = vector.broadcast %56 : i32 to vector<16x1xi32>
    %713 = arith.cmpi sge, %491, %712 : vector<16x1xi32>
    %714 = vector.broadcast %62 : i32 to vector<16x1xi32>
    %715 = arith.cmpi slt, %491, %714 : vector<16x1xi32>
    %716 = arith.andi %713, %715 : vector<16x1xi1>
    %cst_301 = arith.constant 0xFF800000 : f32
    %717 = vector.shape_cast %716 : vector<16x1xi1> to vector<16x1xi1>
    %718 = vector.broadcast %717 : vector<16x1xi1> to vector<16x8xi1>
    %719 = vector.broadcast %cst_301 : f32 to vector<16x8xf32>
    %720 = arith.select %718, %490, %719 : vector<16x8xi1>, vector<16x8xf32>
    %cst_302 = arith.constant dense<0xFF800000> : vector<8xf32>
    %721 = vector.multi_reduction <maximumf>, %720, %cst_302 [0] : vector<16x8xf32> to vector<8xf32>
    %722 = vector.shape_cast %721 : vector<8xf32> to vector<1x8xf32>
    %723 = arith.cmpi sle, %62, %56 : i32
    %724 = arith.ori %711, %723 : i1
    %cst_303 = arith.constant 0.000000e+00 : f32
    %725 = vector.broadcast %cst_303 : f32 to vector<1x8xf32>
    %726 = arith.select %724, %725, %722 : vector<1x8xf32>
    %c0_304 = arith.constant 0 : index
    %c12_305 = arith.constant 12 : index
    %c0_306 = arith.constant 0 : index
    %727 = vector.load %arg4[%c0_304, %c12_305, %c0_306] : memref<1x16x8xf32, #tpu.memory_space<vmem>>, vector<1x1x8xf32>
    %728 = vector.shape_cast %727 : vector<1x1x8xf32> to vector<1x8xf32>
    %729 = vector.shape_cast %726 : vector<1x8xf32> to vector<1x1x8xf32>
    tpu.vector_store %arg4[%c0_304, %c12_305, %c0_306], %729 {strides = array<i32>} : memref<1x16x8xf32, #tpu.memory_space<vmem>>, vector<1x1x8xf32>,
    %730 = vector.broadcast %80 : i32 to vector<16x1xi32>
    %731 = arith.cmpi sge, %491, %730 : vector<16x1xi32>
    %732 = vector.broadcast %86 : i32 to vector<16x1xi32>
    %733 = arith.cmpi slt, %491, %732 : vector<16x1xi32>
    %734 = arith.andi %731, %733 : vector<16x1xi1>
    %cst_307 = arith.constant 0xFF800000 : f32
    %735 = vector.shape_cast %734 : vector<16x1xi1> to vector<16x1xi1>
    %736 = vector.broadcast %735 : vector<16x1xi1> to vector<16x8xi1>
    %737 = vector.broadcast %cst_307 : f32 to vector<16x8xf32>
    %738 = arith.select %736, %490, %737 : vector<16x8xi1>, vector<16x8xf32>
    %cst_308 = arith.constant dense<0xFF800000> : vector<8xf32>
    %739 = vector.multi_reduction <maximumf>, %738, %cst_308 [0] : vector<16x8xf32> to vector<8xf32>
    %740 = vector.shape_cast %739 : vector<8xf32> to vector<1x8xf32>
    %741 = arith.cmpi sle, %86, %80 : i32
    %742 = arith.ori %711, %741 : i1
    %cst_309 = arith.constant 0.000000e+00 : f32
    %743 = vector.broadcast %cst_309 : f32 to vector<1x8xf32>
    %744 = arith.select %742, %743, %740 : vector<1x8xf32>
    %c0_310 = arith.constant 0 : index
    %c13_311 = arith.constant 13 : index
    %c0_312 = arith.constant 0 : index
    %745 = vector.load %arg4[%c0_310, %c13_311, %c0_312] : memref<1x16x8xf32, #tpu.memory_space<vmem>>, vector<1x1x8xf32>
    %746 = vector.shape_cast %745 : vector<1x1x8xf32> to vector<1x8xf32>
    %747 = vector.shape_cast %744 : vector<1x8xf32> to vector<1x1x8xf32>
    tpu.vector_store %arg4[%c0_310, %c13_311, %c0_312], %747 {strides = array<i32>} : memref<1x16x8xf32, #tpu.memory_space<vmem>>, vector<1x1x8xf32>,
    %748 = vector.broadcast %104 : i32 to vector<16x1xi32>
    %749 = arith.cmpi sge, %491, %748 : vector<16x1xi32>
    %750 = vector.broadcast %110 : i32 to vector<16x1xi32>
    %751 = arith.cmpi slt, %491, %750 : vector<16x1xi32>
    %752 = arith.andi %749, %751 : vector<16x1xi1>
    %cst_313 = arith.constant 0xFF800000 : f32
    %753 = vector.shape_cast %752 : vector<16x1xi1> to vector<16x1xi1>
    %754 = vector.broadcast %753 : vector<16x1xi1> to vector<16x8xi1>
    %755 = vector.broadcast %cst_313 : f32 to vector<16x8xf32>
    %756 = arith.select %754, %490, %755 : vector<16x8xi1>, vector<16x8xf32>
    %cst_314 = arith.constant dense<0xFF800000> : vector<8xf32>
    %757 = vector.multi_reduction <maximumf>, %756, %cst_314 [0] : vector<16x8xf32> to vector<8xf32>
    %758 = vector.shape_cast %757 : vector<8xf32> to vector<1x8xf32>
    %759 = arith.cmpi sle, %110, %104 : i32
    %760 = arith.ori %711, %759 : i1
    %cst_315 = arith.constant 0.000000e+00 : f32
    %761 = vector.broadcast %cst_315 : f32 to vector<1x8xf32>
    %762 = arith.select %760, %761, %758 : vector<1x8xf32>
    %c0_316 = arith.constant 0 : index
    %c14_317 = arith.constant 14 : index
    %c0_318 = arith.constant 0 : index
    %763 = vector.load %arg4[%c0_316, %c14_317, %c0_318] : memref<1x16x8xf32, #tpu.memory_space<vmem>>, vector<1x1x8xf32>
    %764 = vector.shape_cast %763 : vector<1x1x8xf32> to vector<1x8xf32>
    %765 = vector.shape_cast %762 : vector<1x8xf32> to vector<1x1x8xf32>
    tpu.vector_store %arg4[%c0_316, %c14_317, %c0_318], %765 {strides = array<i32>} : memref<1x16x8xf32, #tpu.memory_space<vmem>>, vector<1x1x8xf32>,
    %766 = vector.broadcast %128 : i32 to vector<16x1xi32>
    %767 = arith.cmpi sge, %491, %766 : vector<16x1xi32>
    %768 = vector.broadcast %134 : i32 to vector<16x1xi32>
    %769 = arith.cmpi slt, %491, %768 : vector<16x1xi32>
    %770 = arith.andi %767, %769 : vector<16x1xi1>
    %cst_319 = arith.constant 0xFF800000 : f32
    %771 = vector.shape_cast %770 : vector<16x1xi1> to vector<16x1xi1>
    %772 = vector.broadcast %771 : vector<16x1xi1> to vector<16x8xi1>
    %773 = vector.broadcast %cst_319 : f32 to vector<16x8xf32>
    %774 = arith.select %772, %490, %773 : vector<16x8xi1>, vector<16x8xf32>
    %cst_320 = arith.constant dense<0xFF800000> : vector<8xf32>
    %775 = vector.multi_reduction <maximumf>, %774, %cst_320 [0] : vector<16x8xf32> to vector<8xf32>
    %776 = vector.shape_cast %775 : vector<8xf32> to vector<1x8xf32>
    %777 = arith.cmpi sle, %134, %128 : i32
    %778 = arith.ori %711, %777 : i1
    %cst_321 = arith.constant 0.000000e+00 : f32
    %779 = vector.broadcast %cst_321 : f32 to vector<1x8xf32>
    %780 = arith.select %778, %779, %776 : vector<1x8xf32>
    %c0_322 = arith.constant 0 : index
    %c15_323 = arith.constant 15 : index
    %c0_324 = arith.constant 0 : index
    %781 = vector.load %arg4[%c0_322, %c15_323, %c0_324] : memref<1x16x8xf32, #tpu.memory_space<vmem>>, vector<1x1x8xf32>
    %782 = vector.shape_cast %781 : vector<1x1x8xf32> to vector<1x8xf32>
    %783 = vector.shape_cast %780 : vector<1x8xf32> to vector<1x1x8xf32>
    tpu.vector_store %arg4[%c0_322, %c15_323, %c0_324], %783 {strides = array<i32>} : memref<1x16x8xf32, #tpu.memory_space<vmem>>, vector<1x1x8xf32>,
    return
  }
  func.func @transform_0(%arg0: i32, %arg1: memref<8xi32, #tpu.memory_space<smem>>) -> i32 {
    %c0_i32 = arith.constant 0 : i32
    %c0_i32_0 = arith.constant 0 : i32
    return %c0_i32 : i32
  }
  func.func @transform_1(%arg0: i32, %arg1: memref<8xi32, #tpu.memory_space<smem>>) -> (i32, i32, i32, i32) {
    %0 = arith.index_cast %arg0 : i32 to index
    %1 = memref.load %arg1[%0] : memref<8xi32, #tpu.memory_space<smem>>
    %c0_i32 = arith.constant 0 : i32
    %c0_i32_0 = arith.constant 0 : i32
    %c0_i32_1 = arith.constant 0 : i32
    %c0_i32_2 = arith.constant 0 : i32
    return %1, %c0_i32, %c0_i32_0, %c0_i32_1 : i32, i32, i32, i32
  }
  func.func @transform_2(%arg0: i32, %arg1: memref<8xi32, #tpu.memory_space<smem>>) -> (i32, i32, i32) {
    %c0_i32 = arith.constant 0 : i32
    %c0_i32_0 = arith.constant 0 : i32
    %c0_i32_1 = arith.constant 0 : i32
    return %arg0, %c0_i32, %c0_i32_0 : i32, i32, i32
  }
}

</mosaic_0001>

<bundles_post_ra>
// kernel: tpu_custom_call.1
= control target key start
LH: loop header
LB: loop body
LE: loop exit
PB: predicated region body
PF: predicated region fallthrough
CT: control target
= control target key end

     0   :  { %s3597_s0 = inlined_call_operand.vmem [shape: s32[8], index: 0, kind: input, shape index: {}]   ;;  %s3598_s1 = inlined_call_operand.vmem [shape: f32[32], index: 1, kind: input, shape index: {}]   ;;  %s3599_s2 = inlined_call_operand.vmem [shape: f32[2,16,16,8], index: 2, kind: input, shape index: {}]   ;;  %s3600_s3 = inlined_call_operand.vmem [shape: f32[8,16,8], index: 3, kind: output, shape index: {}]  }
   0x1   :  { %3631 = sst [smem:[#allocation19_spill]] %s3598_s1  ;;  %s8_s14 = sshll.u32 %s3597_s0, 4  ;;  %s9_s14 = int_to_ptr.vmem [resolvable:$true] %s8_s14 }
   0x2   :  { %3632 = sst [smem:[#allocation20_spill]] %s3599_s2  ;;  %s1757_s15 = scalar_lea.vmem %s9_s14, 16 }
   0x3   :  { %3633 = sst [smem:[#allocation21_spill]] %s3600_s3  ;;  %p1758_p0 = scmp.ne.s32.totalorder %s9_s14, %s1757_s15 }
   0x4   :  { %p1762_p1 = scmp.lt.s32.totalorder %s9_s14, %s9_s14  ;;  %p1763_p2 = scmp.lt.s32.totalorder %s1757_s15, %s1757_s15 }
   0x6   :  { %p1764_p3 = por %p1763_p2, %p1762_p1 }
   0x8   :  { %p1765_p4 = pnand %p1764_p3, %p1758_p0 }
   0xa   :  { %1768 = shalt.err (!%p1765_p4)  }
   0xb   :  { %s1798_s16 = smov [#allocation3]  }
   0xc   :  { %11 = dma.vmem_to_smem %s9_s14, 16, %s1798_s16, [#allocation2] }
   0xd   :  { %1788 = dma.done.wait [#allocation2], 16 }
   0xe   :  { %1789 = vsyncadd [#allocation2], 4294967280 }
   0xf   :  { %13 = sfence }
  0x10   :  { %14 = vsyncpa [#allocation5], 0  ;;  %s1823_s17 = smov 0  }
  0x11 LB: > { %3634 = sst [smem:[#allocation8_spill]] %s1796_s17  ;;  %s1475_s0 = sadd.s32 4294967295, %s1796_s17   ;;  %s1796_s17 = sphi %s1823_s17, %s20_s17  }
  0x12   : > { %p1477_p5 = scmp.ge.s32.totalorder %s1796_s17, 1  ;;  %p100_p6 = scmp.lt.s32.totalorder %s1796_s17, 9 }
  0x13   : > { %s3635_s1 = sld [smem:[#allocation19_spill]]  ;;  %p1745_p8 = scmp.eq.s32.totalorder %s1475_s0, 0 }
  0x14   : > { %p1834_p7 = pnand %p1477_p5, %p100_p6 }
  0x16   : > { %p1741_p9 = pneg %p1834_p7 }
  0x18   : > { %p1742_p10 = pnand %p1745_p8, %p1741_p9 }
  0x19   : > { %s113_s20 = sshll.u32 %s3635_s1, 4  ;;  %s114_s20 = int_to_ptr.vmem [resolvable:$true] %s113_s20 }
  0x1a   : > { %s1769_s22 = scalar_lea.vmem %s114_s20, 16  ;;  %p1771_p12 = pneg %p1742_p10 }
  0x1b   : > { %p1770_p11 = scmp.ne.s32.totalorder %s114_s20, %s1769_s22  ;;  %p1777_p1 = scmp.lt.s32.totalorder %s114_s20, %s114_s20 }
  0x1c   : > { %p1778_p2 = scmp.lt.s32.totalorder %s1769_s22, %s1769_s22 }
  0x1d   : > { %p1772_p13 = pnand %p1771_p12, %p1770_p11 }
  0x1e   : > { %p1779_p3 = por %p1778_p2, %p1777_p1 }
  0x1f   : > { %p1773_p0 = pneg %p1772_p13 }
  0x21   : > { %p1780_p4 = pnand %p1779_p3, %p1773_p0 }
  0x23   : > { %1783 = shalt.err (!%p1780_p4)
}
  0x24   : > { %s1799_s23 = smov [#allocation4]   ;;  %136 = sbr.rel (%p1834_p7) target bundleno = 394 (0x18a), region = 28 }
  0x25   : > { %1744 = dma.vmem_to_smem (!%p1742_p10), %s114_s20, 16, %s1799_s23, [#allocation5]  }
  0x2b   : > { %1791 = dma.done.wait (%p1745_p8), [#allocation5], 16  }
  0x2c   : > { %1793 = vsyncadd (%p1745_p8), [#allocation5], 4294967280 }
  0x2d   : > { %142 = sfence }
  0x2e   : > { %s160_s24 = sld [smem:[#allocation3 + %s1475_s0]]  ;;  %p167_p5 = scmp.lt.s32.totalorder %s1475_s0, 7 }
  0x2f   : > { %s1486_s25 = sshll.u32 %s1475_s0, 2  ;;  %s3638_s2 = sld [smem:[#allocation20_spill]] }
  0x30   : > { %s3867_s0 = smov (!%p167_p5, %s1475_s0), 7  ;;  %s173_s26 = sld [smem:[#allocation4 + %s1486_s25]] }
  0x31   : > { %3637 = sst [smem:[#allocation9_spill]] %s3867_s0  ;;  %s175_s27 = sadd.s32 1, %s1486_s25 }
  0x32   : > { %s176_s28 = sld [smem:[#allocation4 + %s175_s27]]  ;;  %s178_s29 = sadd.s32 2, %s1486_s25 }
  0x33   : > { %s179_s30 = sld [smem:[#allocation4 + %s178_s29]]  ;;  %s181_s4 = sadd.s32 3, %s1486_s25 }
  0x34   : > { %p161_p6 = scmp.lt.s32.totalorder %s160_s24, 1  ;;  %s182_s6 = sld [smem:[#allocation4 + %s181_s4]] }
  0x36   : > { %s174_s5 = smul.f32 0.5, %s173_s26  ;;  %s3869_s24 = smov (!%p161_p6, %s160_s24), 1 }
  0x38   : > { %s177_s7 = smul.f32 0.5, %s176_s28  ;;  %s184_s8 = sadd.f32 0.5, %s174_s5 }
  0x39   : > { %s180_s9 = smul.f32 0.5, %s179_s30  ;;  %s1663_s28 = sshll.u32 %s3869_s24, 8 }
  0x3a   : > { %s187_s10 = sadd.f32 0.5, %s177_s7  ;;  %s185_s11 = sfloor.f32 %s184_s8 }
  0x3b   : > { %s183_s12 = smul.f32 0.5, %s182_s6  ;;  %s190_s14 = sadd.f32 0.5, %s180_s9 }
  0x3c   : > { %s188_s13 = sfloor.f32 %s187_s10  ;;  %s1847_s15 = scvt.f32.s32 %s185_s11 }
  0x3d   : > { %s193_s16 = sadd.f32 0.5, %s183_s12  ;;  %s1849_s18 = scvt.f32.s32 %s188_s13 }
  0x3e   : > { %s191_s19 = sfloor.f32 %s190_s14  ;;  %s1858_s7 = scalar_lea.vmem %s3638_s2, %s1663_s28 }
  0x3f   : > { %s1702_s20 = scvt.f32.s32 %s191_s19  ;;  %s194_s21 = sfloor.f32 %s193_s16  ;;  %v332_v2 = vld [vmem:[%s1858_s7] sm:$0xff]  ;;  %v333_v3 = vld [vmem:[%s1858_s7 + $0x8] sm:$0xff]  ;;  %v2103_v8 = vld [vmem:[%s1858_s7 + $0x10] sm:$0xff] }
  0x40   : > { %s1704_s22 = scvt.f32.s32 %s194_s21  ;;  %v2106_v9 = vld [vmem:[%s1858_s7 + $0x18] sm:$0xff]  ;;  %v2154_v26 = vld [vmem:[%s1858_s7 + $0x20] sm:$0xff]  ;;  %v2157_v27 = vld [vmem:[%s1858_s7 + $0x28] sm:$0xff] }
  0x41   : > { %s196_s23 = ssub.s32 %s1702_s20, %s1847_s15  ;;  %v2215_v48 = vld [vmem:[%s1858_s7 + $0x30] sm:$0xff]  ;;  %v2218_v49 = vld [vmem:[%s1858_s7 + $0x38] sm:$0xff] }
  0x42   : > { %s197_s25 = sadd.s32 1, %s196_s23  ;;  %s200_s26 = ssub.s32 %s1704_s22, %s1849_s18 }
  0x43   : > { %p198_p7 = scmp.gt.s32.totalorder %s197_s25, 1  ;;  %s201_s27 = sadd.s32 1, %s200_s26 }
  0x44   : > { %p202_p8 = scmp.gt.s32.totalorder %s201_s27, 1 }
  0x45   : > { %s3871_s25 = smov (!%p198_p7, %s197_s25), 1 }
  0x46   : > { %s3873_s27 = smov (!%p202_p8, %s201_s27), 1  ;;  %s204_s29 = scvt.s32.f32 %s3871_s25 }
  0x47   : > { %s208_s30 = scvt.s32.f32 %s3873_s27 }
  0x48   : > { %s1853_s4 = smul.f32 0.25, %s204_s29 }
  0x49   : > { %s1860_s8 = smul.f32 0.25, %s208_s30 }
  0x4a   : > { %s227_s9 = smul.f32 0.0, %s1853_s4  ;;  %s235_s10 = sceil.f32 %s1853_s4 }
  0x4b   : > { %s212_s24 = smul.f32 0.0, %s1860_s8  ;;  %s220_s11 = sceil.f32 %s1860_s8 }
  0x4c   : > { %s1708_s12 = scvt.f32.s32 %s220_s11  ;;  %s228_s13 = sfloor.f32 %s227_s9 }
  0x4d   : > { %s213_s14 = sfloor.f32 %s212_s24  ;;  %s1710_s16 = scvt.f32.s32 %s228_s13 }
  0x4e   : > { %s1706_s19 = scvt.f32.s32 %s213_s14  ;;  %s222_s20 = sadd.s32 %s1708_s12, %s1849_s18 }
  0x4f   : > { %p223_p9 = scmp.gt.s32.totalorder %s222_s20, 0  ;;  %p1492_p10 = scmp.lt.s32.totalorder %s222_s20, 16 }
  0x50   : > { %s215_s21 = sadd.s32 %s1706_s19, %s1849_s18  ;;  %s230_s22 = sadd.s32 %s1710_s16, %s1847_s15 }
  0x51   : > { %p216_p11 = scmp.gt.s32.totalorder %s215_s21, 0  ;;  %p1487_p12 = scmp.lt.s32.totalorder %s215_s21, 16 }
  0x52   : > { %s3875_s20 = smov (!%p223_p9, %s222_s20), 0  ;;  %p231_p13 = scmp.gt.s32.totalorder %s230_s22, 0 }
  0x53   : > { %s3877_s21 = smov (!%p216_p11, %s215_s21), 0  ;;  %s3879_s20 = smov (!%p1492_p10, %s3875_s20), 16 }
  0x54   : > { %s3881_s21 = smov (!%p1487_p12, %s3877_s21), 16  ;;  %p1497_p0 = scmp.lt.s32.totalorder %s230_s22, 16 }
  0x55   : > { %s1712_s23 = scvt.f32.s32 %s235_s10  ;;  %s242_s25 = sfloor.f32 %s1860_s8 }
  0x56   : > { %s3883_s22 = smov (!%p231_p13, %s230_s22), 0  ;;  %s1714_s27 = scvt.f32.s32 %s242_s25 }
  0x57   : > { %s237_s26 = sadd.s32 %s1712_s23, %s1847_s15  ;;  %s3885_s22 = smov (!%p1497_p0, %s3883_s22), 16 }
  0x58   : > { %3639 = sst [smem:[#allocation10_spill]] %s3885_s22  ;;  %p238_p1 = scmp.gt.s32.totalorder %s237_s26, 0 }
  0x59   : > { %p1502_p2 = scmp.lt.s32.totalorder %s237_s26, 16  ;;  %s244_s28 = sadd.s32 %s1714_s27, %s1849_s18 }
  0x5a   : > { %s249_s29 = smul.f32 2.0, %s1860_s8  ;;  %s3887_s26 = smov (!%p238_p1, %s237_s26), 0 }
  0x5b   : > { %p245_p3 = scmp.gt.s32.totalorder %s244_s28, 0  ;;  %p1507_p4 = scmp.lt.s32.totalorder %s244_s28, 16 }
  0x5c   : > { %s3889_s26 = smov (!%p1502_p2, %s3887_s26), 16  ;;  %s250_s30 = sceil.f32 %s249_s29 }
  0x5d   : > { %3640 = sst [smem:[#allocation11_spill]] %s3889_s26  ;;  %s3891_s28 = smov (!%p245_p3, %s244_s28), 0 }
  0x5e   : > { %s257_s5 = sfloor.f32 %s1853_s4  ;;  %s3893_s28 = smov (!%p1507_p4, %s3891_s28), 16 }
  0x5f   : > { %s1716_s6 = scvt.f32.s32 %s250_s30  ;;  %s1718_s9 = scvt.f32.s32 %s257_s5 }
  0x60   : > { %s264_s10 = smul.f32 2.0, %s1853_s4  ;;  %s272_s24 = sfloor.f32 %s249_s29 }
  0x61   : > { %s252_s11 = sadd.s32 %s1716_s6, %s1849_s18  ;;  %s259_s12 = sadd.s32 %s1718_s9, %s1847_s15 }
  0x62   : > { %p253_p5 = scmp.gt.s32.totalorder %s252_s11, 0  ;;  %p1512_p6 = scmp.lt.s32.totalorder %s252_s11, 16 }
  0x63   : > { %p260_p7 = scmp.gt.s32.totalorder %s259_s12, 0  ;;  %p1517_p8 = scmp.lt.s32.totalorder %s259_s12, 16 }
  0x64   : > { %s3895_s11 = smov (!%p253_p5, %s252_s11), 0  ;;  %s265_s13 = sceil.f32 %s264_s10 }
  0x65   : > { %s3897_s12 = smov (!%p260_p7, %s259_s12), 0  ;;  %s3899_s11 = smov (!%p1512_p6, %s3895_s11), 16 }
  0x66   : > { %s3901_s12 = smov (!%p1517_p8, %s3897_s12), 16  ;;  %s1722_s14 = scvt.f32.s32 %s272_s24 }
  0x67   : > { %3641 = sst [smem:[#allocation12_spill]] %s3901_s12  ;;  %s1720_s16 = scvt.f32.s32 %s265_s13 }
  0x68   : > { %s279_s19 = smul.f32 3.0, %s1860_s8  ;;  %s274_s23 = sadd.s32 %s1722_s14, %s1849_s18 }
  0x69   : > { %s287_s25 = sfloor.f32 %s264_s10  ;;  %s267_s27 = sadd.s32 %s1720_s16, %s1847_s15 }
  0x6a   : > { %p275_p9 = scmp.gt.s32.totalorder %s274_s23, 0  ;;  %p268_p10 = scmp.gt.s32.totalorder %s267_s27, 0 }
  0x6b   : > { %p1522_p11 = scmp.lt.s32.totalorder %s267_s27, 16  ;;  %p1527_p12 = scmp.lt.s32.totalorder %s274_s23, 16 }
  0x6c   : > { %s276_s29 = scalar_select %p275_p9, %s274_s23, 0 }
  0x6d   : > { %s3903_s27 = smov (!%p268_p10, %s267_s27), 0  ;;  %s280_s30 = sceil.f32 %s279_s19 }
  0x6e   : > { %s3905_s27 = smov (!%p1522_p11, %s3903_s27), 16  ;;  %s3907_s29 = smov (!%p1527_p12, %s276_s29), 16 }
  0x6f   : > { %3642 = sst [smem:[#allocation13_spill]] %s3905_s27  ;;  %s1724_s5 = scvt.f32.s32 %s280_s30 }
  0x70   : > { %s1726_s6 = scvt.f32.s32 %s287_s25  ;;  %s294_s9 = smul.f32 3.0, %s1853_s4 }
  0x71   : > { %s302_s24 = sfloor.f32 %s279_s19  ;;  %s282_s10 = sadd.s32 %s1724_s5, %s1849_s18 }
  0x72   : > { %s289_s13 = sadd.s32 %s1726_s6, %s1847_s15  ;;  %p283_p13 = scmp.gt.s32.totalorder %s282_s10, 0 }
  0x73   : > { %p1532_p0 = scmp.lt.s32.totalorder %s282_s10, 16  ;;  %p290_p1 = scmp.gt.s32.totalorder %s289_s13, 0 }
  0x74   : > { %p1537_p2 = scmp.lt.s32.totalorder %s289_s13, 16  ;;  %s3909_s10 = smov (!%p283_p13, %s282_s10), 0 }
  0x75   : > { %s3911_s13 = smov (!%p290_p1, %s289_s13), 0  ;;  %s3913_s10 = smov (!%p1532_p0, %s3909_s10), 16 }
  0x76   : > { %s3915_s13 = smov (!%p1537_p2, %s3911_s13), 16  ;;  %s295_s14 = sceil.f32 %s294_s9 }
  0x77   : > { %3643 = sst [smem:[#allocation14_spill]] %s3915_s13  ;;  %s1730_s16 = scvt.f32.s32 %s302_s24 }
  0x78   : > { %s1728_s23 = scvt.f32.s32 %s295_s14  ;;  %s309_s25 = smul.f32 4.0, %s1860_s8 }
  0x79   : > { %s304_s19 = sadd.s32 %s1730_s16, %s1849_s18  ;;  %s317_s30 = sfloor.f32 %s294_s9 }
  0x7a   : > { %s297_s5 = sadd.s32 %s1728_s23, %s1847_s15  ;;  %p305_p3 = scmp.gt.s32.totalorder %s304_s19, 0 }
  0x7b   : > { %p298_p4 = scmp.gt.s32.totalorder %s297_s5, 0  ;;  %p1542_p5 = scmp.lt.s32.totalorder %s297_s5, 16 }
  0x7c   : > { %s306_s6 = scalar_select %p305_p3, %s304_s19, 0 }
  0x7d   : > { %s3917_s5 = smov (!%p298_p4, %s297_s5), 0  ;;  %p1547_p6 = scmp.lt.s32.totalorder %s304_s19, 16 }
  0x7e   : > { %s310_s1 = sceil.f32 %s309_s25  ;;  %s3919_s5 = smov (!%p1542_p5, %s3917_s5), 16 }
  0x7f   : > { %3644 = sst [smem:[#allocation15_spill]] %s3919_s5  ;;  %s3921_s6 = smov (!%p1547_p6, %s306_s6), 16 }
  0x80   : > { %s1732_s24 = scvt.f32.s32 %s310_s1  ;;  %s1734_s8 = scvt.f32.s32 %s317_s30 }
  0x81   : > { %s324_s14 = smul.f32 4.0, %s1853_s4  ;;  %p334_p7 = scmp.le.s32.totalorder %s3881_s21, 0 }
  0x82   : > { %s312_s9 = sadd.s32 %s1732_s24, %s1849_s18  ;;  %s319_s16 = sadd.s32 %s1734_s8, %s1847_s15 }
  0x83   : > { %p313_p8 = scmp.gt.s32.totalorder %s312_s9, 0  ;;  %p1552_p9 = scmp.lt.s32.totalorder %s312_s9, 16 }
  0x84   : > { %p320_p10 = scmp.gt.s32.totalorder %s319_s16, 0  ;;  %p1557_p11 = scmp.lt.s32.totalorder %s319_s16, 16 }
  0x85   : > { %s3923_s9 = smov (!%p313_p8, %s312_s9), 0  ;;  %s325_s1 = sceil.f32 %s324_s14 }
  0x86   : > { %s3925_s16 = smov (!%p320_p10, %s319_s16), 0  ;;  %s3927_s9 = smov (!%p1552_p9, %s3923_s9), 16 }
  0x87   : > { %s3929_s16 = smov (!%p1557_p11, %s3925_s16), 16  ;;  %p335_p12 = scmp.gt.s32.totalorder %s3879_s20, 0 }
  0x88   : > { %3645 = sst [smem:[#allocation16_spill]] %s3929_s16  ;;  %s1736_s4 = scvt.f32.s32 %s325_s1 }
  0x89   : > { %p343_p13 = scmp.le.s32.totalorder %s3893_s28, 0  ;;  %p1924_p0 = pnand %p335_p12, %p334_p7 }
  0x8a   : > { %p344_p1 = scmp.gt.s32.totalorder %s3899_s11, 0  ;;  %s327_s23 = sadd.s32 %s1736_s4, %s1847_s15 }
  0x8b   : > { %p352_p2 = scmp.le.s32.totalorder %s3907_s29, 0  ;;  %p328_p3 = scmp.gt.s32.totalorder %s327_s23, 0 }
  0x8c   : > { %p1562_p4 = scmp.lt.s32.totalorder %s327_s23, 16  ;;  %p1933_p5 = pnand %p344_p1, %p343_p13 }
  0x8d   : > { %s3931_s23 = smov (!%p328_p3, %s327_s23), 0  ;;  %p353_p6 = scmp.gt.s32.totalorder %s3913_s10, 0 }
  0x8e   : > { %s3933_s23 = smov (!%p1562_p4, %s3931_s23), 16  ;;  %p361_p8 = scmp.le.s32.totalorder %s3921_s6, 0 }
  0x8f   : > { %3648 = sst [smem:[#allocation17_spill]] %s3933_s23  ;;  %p1942_p7 = pnand %p353_p6, %p352_p2 }
  0x90   : > { %p362_p9 = scmp.gt.s32.totalorder %s3927_s9, 0  ;;  %p373_p10 = scmp.le.s32.totalorder %s3881_s21, 1 }
  0x91   : > { %p374_p12 = scmp.gt.s32.totalorder %s3879_s20, 1  ;;  %p384_p13 = scmp.le.s32.totalorder %s3893_s28, 1 }
  0x92   : > { %p1951_p11 = pnand %p362_p9, %p361_p8  ;;  %p385_p1 = scmp.gt.s32.totalorder %s3899_s11, 1 }
  0x93   : > { %p1960_p2 = pnand %p374_p12, %p373_p10  ;;  %p395_p4 = scmp.le.s32.totalorder %s3907_s29, 1 }
  0x94   : > { %p1964_p3 = pnand %p385_p1, %p384_p13  ;;  %p396_p6 = scmp.gt.s32.totalorder %s3913_s10, 1 }
  0x95   : > { %s3651_s1 = scalar_select %p1960_p2, 1, 0 }
  0x96   : > { %s3652_s4 = scalar_select %p1964_p3, 1, 0 }
  0x97   : > { %p1974_p8 = pnand %p396_p6, %p395_p4  ;;  %p406_p9 = scmp.le.s32.totalorder %s3921_s6, 1 }
  0x98   : > { %p407_p10 = scmp.gt.s32.totalorder %s3927_s9, 1  ;;  %p420_p12 = scmp.le.s32.totalorder %s3881_s21, 2 }
  0x99   : > { %s3653_s14 = scalar_select %p1974_p8, 1, 0 }
  0x9a   : > { %p1983_p13 = pnand %p407_p10, %p406_p9  ;;  %p421_p1 = scmp.gt.s32.totalorder %s3879_s20, 2 }
  0x9b   : > { %p431_p4 = scmp.le.s32.totalorder %s3893_s28, 2  ;;  %p432_p6 = scmp.gt.s32.totalorder %s3899_s11, 2 }
  0x9c   : > { %s3654_s2 = scalar_select %p1983_p13, 1, 0 }
  0x9d   : > { %p1992_p3 = pnand %p421_p1, %p420_p12  ;;  %p1996_p2 = pnand %p432_p6, %p431_p4 }
  0x9e   : > { %p442_p9 = scmp.le.s32.totalorder %s3907_s29, 2  ;;  %p443_p10 = scmp.gt.s32.totalorder %s3913_s10, 2 }
  0x9f   : > { %s3655_s24 = scalar_select %p1992_p3, 1, 0 }
  0xa0   : > { %s3656_s25 = scalar_select %p1996_p2, 1, 0 }
  0xa1   : > { %p2006_p8 = pnand %p443_p10, %p442_p9  ;;  %p453_p12 = scmp.le.s32.totalorder %s3921_s6, 2 }
  0xa2   : > { %p454_p1 = scmp.gt.s32.totalorder %s3927_s9, 2  ;;  %p467_p4 = scmp.le.s32.totalorder %s3881_s21, 3 }
  0xa3   : > { %s3657_s15 = scalar_select %p2006_p8, 1, 0 }
  0xa4   : > { %p2015_p6 = pnand %p454_p1, %p453_p12  ;;  %p468_p3 = scmp.gt.s32.totalorder %s3879_s20, 3 }
  0xa5   : > { %p478_p9 = scmp.le.s32.totalorder %s3893_s28, 3  ;;  %p479_p10 = scmp.gt.s32.totalorder %s3899_s11, 3 }
  0xa6   : > { %p2024_p2 = pnand %p468_p3, %p467_p4  ;;  %p489_p12 = scmp.le.s32.totalorder %s3907_s29, 3 }
  0xa7   : > { %p2028_p13 = pnand %p479_p10, %p478_p9  ;;  %p490_p1 = scmp.gt.s32.totalorder %s3913_s10, 3 }
  0xa8   : > { %s3659_s17 = scalar_select %p2024_p2, 1, 0 }
  0xa9   : > { %s3660_s0 = scalar_select %p2028_p13, 1, 0 }
  0xaa   : > { %p2038_p8 = pnand %p490_p1, %p489_p12  ;;  %p500_p3 = scmp.le.s32.totalorder %s3921_s6, 3 }
  0xab   : > { %p501_p4 = scmp.gt.s32.totalorder %s3927_s9, 3  ;;  %p514_p9 = scmp.le.s32.totalorder %s3881_s21, 4 }
  0xac   : > { %s3661_s3 = scalar_select %p2038_p8, 1, 0 }
  0xad   : > { %p2047_p10 = pnand %p501_p4, %p500_p3  ;;  %p515_p12 = scmp.gt.s32.totalorder %s3879_s20, 4 }
  0xae   : > { %p525_p1 = scmp.le.s32.totalorder %s3893_s28, 4  ;;  %p526_p13 = scmp.gt.s32.totalorder %s3899_s11, 4 }
  0xaf   : > { %s3662_s27 = scalar_select %p2047_p10, 1, 0 }
  0xb0   : > { %p2056_p2 = pnand %p515_p12, %p514_p9  ;;  %p2060_p8 = pnand %p526_p13, %p525_p1 }
  0xb1   : > { %3663 = sst [smem:[#allocation18_spill]] %s3662_s27  ;;  %p536_p3 = scmp.le.s32.totalorder %s3907_s29, 4 }
  0xb2   : > { %p537_p4 = scmp.gt.s32.totalorder %s3913_s10, 4  ;;  %p547_p13 = scmp.le.s32.totalorder %s3921_s6, 4 }
  0xb3   : > { %s1592_s5 = scalar_select %p2060_p8, 0, 1 }
  0xb4   : > { %s3666_s26 = scalar_select %p1924_p0, 0, 1 }
  0xb5   : > { %p2073_p9 = pnand %p537_p4, %p536_p3  ;;  %p548_p12 = scmp.gt.s32.totalorder %s3927_s9, 4 }
  0xb6   : > { %v339_v0 = vstv %s3666_s26  ;;  %p561_p1 = scmp.le.s32.totalorder %s3881_s21, 5  ;;  %p562_p3 = scmp.gt.s32.totalorder %s3879_s20, 5 }
  0xb7   : > { %s3668_s27 = scalar_select %p1933_p5, 0, 1  ;;  %vm340_vm0 = vcmp.eq.s32.totalorder %v339_v0, 1 }
  0xb8   : > { %s1593_s12 = scalar_select %p2073_p9, 0, 1  ;;  %v341_v5 = vsel %vm340_vm0, %v332_v2, -inf  ;;  %v342_v6 = vsel %vm340_vm0, %v333_v3, -inf }
  0xb9   : > { %v348_v1 = vstv %s3668_s27  ;;  %p2087_p0 = pnand %p548_p12, %p547_p13  ;;  %p572_p5 = scmp.le.s32.totalorder %s3893_s28, 5  ;;  %v377_v13 = vmax.f32 %v341_v5, %v2103_v8  ;;  %v378_v14 = vmax.f32 %v342_v6, %v2106_v9 }
  0xba   : > { %s3670_s18 = scalar_select %p1942_p7, 0, 1  ;;  %vm349_vm1 = vcmp.eq.s32.totalorder %v348_v1, 1 }
  0xbb   : > { %s3669_s26 = scalar_select %p2087_p0, 1, 0  ;;  %v350_v11 = vsel %vm349_vm1, %v332_v2, -inf  ;;  %v351_v12 = vsel %vm349_vm1, %v333_v3, -inf }
  0xbc   : > { %v357_v4 = vstv %s3670_s18  ;;  %p573_p4 = scmp.gt.s32.totalorder %s3899_s11, 5  ;;  %p2110_p13 = pnand %p562_p3, %p561_p1  ;;  %v388_v18 = vmax.f32 %v350_v11, %v2103_v8  ;;  %v389_v19 = vmax.f32 %v351_v12, %v2106_v9 }
  0xbd   : > { %s3671_s19 = scalar_select %p1951_p11, 0, 1  ;;  %vm358_vm2 = vcmp.eq.s32.totalorder %v357_v4, 1 }
  0xbe   : > { %p2114_p7 = pnand %p573_p4, %p572_p5  ;;  %p3674_p11 = scmp.ne.s32.totalorder %s3651_s1, 0  ;;  %v359_v16 = vsel %vm358_vm2, %v332_v2, -inf  ;;  %v360_v17 = vsel %vm358_vm2, %v333_v3, -inf }
  0xbf   : > { %v366_v7 = vstv %s3671_s19  ;;  %p583_p12 = scmp.le.s32.totalorder %s3907_s29, 5  ;;  %p584_p0 = scmp.gt.s32.totalorder %s3913_s10, 5  ;;  %v399_v24 = vmax.f32 %v359_v16, %v2103_v8  ;;  %v400_v29 = vmax.f32 %v360_v17, %v2106_v9 }
  0xc0   : > { %s3673_s18 = scalar_select %p2114_p7, 1, 0  ;;  %vm367_vm3 = vcmp.eq.s32.totalorder %v366_v7, 1  ;;  %v2286_v7 = vld [vmem:[%s1858_s7 + $0x48] sm:$0xff] }
  0xc1   : > { %s3675_s8 = scalar_select %p3674_p11, 0, 1  ;;  %v368_v21 = vsel %vm367_vm3, %v332_v2, -inf  ;;  %v369_v28 = vsel %vm367_vm3, %v333_v3, -inf }
  0xc2   : > { %s1597_s19 = scalar_select %p2110_p13, 0, 1  ;;  %v410_v33 = vmax.f32 %v368_v21, %v2103_v8  ;;  %v411_v38 = vmax.f32 %v369_v28, %v2106_v9 }
  0xc3   : > { %v380_v10 = vstv %s3675_s8  ;;  %p3676_p1 = scmp.ne.s32.totalorder %s3652_s4, 0  ;;  %p2133_p3 = pnand %p584_p0, %p583_p12 }
  0xc4   : > { %vm381_vm4 = vcmp.eq.s32.totalorder %v380_v10, 1  ;;  %p594_p5 = scmp.le.s32.totalorder %s3921_s6, 5  ;;  %p3679_p4 = scmp.ne.s32.totalorder %s3653_s14, 0 }
  0xc5   : > { %s3677_s27 = scalar_select %p3676_p1, 0, 1  ;;  %v382_v22 = vsel %vm381_vm4, %v377_v13, %v341_v5  ;;  %v383_v23 = vsel %vm381_vm4, %v378_v14, %v342_v6  ;;  %v2283_v6 = vld [vmem:[%s1858_s7 + $0x40] sm:$0xff] }
  0xc6   : > { %s3678_s8 = scalar_select %p2133_p3, 1, 0  ;;  %v424_v34 = vmax.f32 %v382_v22, %v2154_v26  ;;  %v425_v35 = vmax.f32 %v383_v23, %v2157_v27 }
  0xc7   : > { %v391_v15 = vstv %s3677_s27  ;;  %s3680_s4 = scalar_select %p3679_p4, 0, 1 }
  0xc8   : > { %p595_p11 = scmp.gt.s32.totalorder %s3927_s9, 5  ;;  %vm392_vm5 = vcmp.eq.s32.totalorder %v391_v15, 1  ;;  %p3681_p12 = scmp.ne.s32.totalorder %s3654_s2, 0 }
  0xc9   : > { %v402_v20 = vstv %s3680_s4  ;;  %p609_p4 = scmp.gt.s32.totalorder %s3879_s20, 6  ;;  %p619_p0 = scmp.le.s32.totalorder %s3893_s28, 6  ;;  %v393_v31 = vsel %vm392_vm5, %v388_v18, %v350_v11  ;;  %v394_v32 = vsel %vm392_vm5, %v389_v19, %v351_v12 }
  0xca   : > { %s3682_s1 = scalar_select %p3681_p12, 0, 1  ;;  %vm403_vm6 = vcmp.eq.s32.totalorder %v402_v20, 1  ;;  %v435_v40 = vmax.f32 %v393_v31, %v2154_v26  ;;  %v436_v41 = vmax.f32 %v394_v32, %v2157_v27 }
  0xcb   : > { %p2161_p1 = pnand %p595_p11, %p594_p5  ;;  %p3684_p12 = scmp.ne.s32.totalorder %s3655_s24, 0  ;;  %v404_v37 = vsel %vm403_vm6, %v399_v24, %v359_v16  ;;  %v405_v39 = vsel %vm403_vm6, %v400_v29, %v360_v17  ;;  %v532_v16 = vstv %s1592_s5  ;;  %v2344_v29 = vld [vmem:[%s1858_s7 + $0x58] sm:$0xff] }
  0xcc   : > { %v413_v25 = vstv %s3682_s1  ;;  %p620_p3 = scmp.gt.s32.totalorder %s3899_s11, 6  ;;  %p3686_p5 = scmp.ne.s32.totalorder %s3656_s25, 0  ;;  %v446_v46 = vmax.f32 %v404_v37, %v2154_v26  ;;  %v447_v51 = vmax.f32 %v405_v39, %v2157_v27  ;;  %vm533_vm1 = vcmp.eq.s32.totalorder %v532_v16, 1 }
  0xcd   : > { %s3685_s2 = scalar_select %p3684_p12, 0, 1  ;;  %vm414_vm7 = vcmp.eq.s32.totalorder %v413_v25, 1 }
  0xce   : > { %s3687_s24 = scalar_select %p3686_p5, 0, 1  ;;  %v415_v43 = vsel %vm414_vm7, %v410_v33, %v368_v21  ;;  %v416_v50 = vsel %vm414_vm7, %v411_v38, %v369_v28  ;;  %v2341_v28 = vld [vmem:[%s1858_s7 + $0x50] sm:$0xff] }
  0xcf   : > { %v427_v30 = vstv %s3685_s2  ;;  %p3688_p11 = scmp.le.s32.totalorder %s3881_s21, 6  ;;  %p2191_p7 = pnand %p620_p3, %p619_p0  ;;  %v457_v55 = vmax.f32 %v415_v43, %v2154_v26  ;;  %v458_v60 = vmax.f32 %v416_v50, %v2157_v27 }
  0xd0   : > { %v438_v36 = vstv %s3687_s24  ;;  %vm428_vm8 = vcmp.eq.s32.totalorder %v427_v30, 1  ;;  %p630_p5 = scmp.le.s32.totalorder %s3907_s29, 6  ;;  %p3691_p3 = scmp.ne.s32.totalorder %s3657_s15, 0 }
  0xd1   : > { %p2187_p12 = pnand %p609_p4, %p3688_p11  ;;  %p631_p4 = scmp.gt.s32.totalorder %s3913_s10, 6  ;;  %vm439_vm9 = vcmp.eq.s32.totalorder %v438_v36, 1  ;;  %v429_v44 = vsel %vm428_vm8, %v424_v34, %v382_v22  ;;  %v430_v45 = vsel %vm428_vm8, %v425_v35, %v383_v23  ;;  %v543_v22 = vstv %s1593_s12 }
  0xd2   : > { %s3690_s2 = scalar_select %p2191_p7, 1, 0  ;;  %v440_v53 = vsel %vm439_vm9, %v435_v40, %v393_v31  ;;  %v441_v54 = vsel %vm439_vm9, %v436_v41, %v394_v32  ;;  %v471_v56 = vmax.f32 %v429_v44, %v2215_v48  ;;  %v472_v57 = vmax.f32 %v430_v45, %v2218_v49 }
  0xd3   : > { %s3692_s25 = scalar_select %p3691_p3, 0, 1  ;;  %v482_v62 = vmax.f32 %v440_v53, %v2215_v48  ;;  %v483_v63 = vmax.f32 %v441_v54, %v2218_v49  ;;  %vm544_vm2 = vcmp.eq.s32.totalorder %v543_v22, 1  ;;  %v568_v32 = vstv %s1597_s19 }
  0xd4   : > { %s1603_s24 = scalar_select %p2187_p12, 0, 1  ;;  %vm569_vm4 = vcmp.eq.s32.totalorder %v568_v32, 1 }
  0xd5   : > { %v449_v42 = vstv %s3692_s25  ;;  %s3693_s27 = scalar_select %p2015_p6, 0, 1 }
  0xd6   : > { %p2224_p0 = pnand %p631_p4, %p630_p5  ;;  %p641_p11 = scmp.le.s32.totalorder %s3921_s6, 6  ;;  %vm450_vm10 = vcmp.eq.s32.totalorder %v449_v42, 1 }
  0xd7   : > { %v460_v47 = vstv %s3693_s27  ;;  %p3695_p6 = scmp.ne.s32.totalorder %s3659_s17, 0  ;;  %p642_p3 = scmp.gt.s32.totalorder %s3927_s9, 6  ;;  %v451_v59 = vsel %vm450_vm10, %v446_v46, %v404_v37  ;;  %v452_v61 = vsel %vm450_vm10, %v447_v51, %v405_v39  ;;  %v2405_v51 = vld [vmem:[%s1858_s7 + $0x68] sm:$0xff] }
  0xd8   : > { %s3694_s15 = scalar_select %p2224_p0, 1, 0  ;;  %vm461_vm11 = vcmp.eq.s32.totalorder %v460_v47, 1  ;;  %v493_v4 = vmax.f32 %v451_v59, %v2215_v48  ;;  %v494_v9 = vmax.f32 %v452_v61, %v2218_v49 }
  0xd9   : > { %s3696_s23 = scalar_select %p3695_p6, 0, 1  ;;  %v462_v1 = vsel %vm461_vm11, %v457_v55, %v415_v43  ;;  %v463_v8 = vsel %vm461_vm11, %v458_v60, %v416_v50  ;;  %v2402_v50 = vld [vmem:[%s1858_s7 + $0x60] sm:$0xff] }
  0xda   : > { %p3697_p5 = scmp.ne.s32.totalorder %s3660_s0, 0  ;;  %p2248_p4 = pnand %p642_p3, %p641_p11  ;;  %v504_v13 = vmax.f32 %v462_v1, %v2215_v48  ;;  %v505_v18 = vmax.f32 %v463_v8, %v2218_v49 }
  0xdb   : > { %v474_v52 = vstv %s3696_s23  ;;  %p656_p6 = scmp.gt.s32.totalorder %s3879_s20, 7  ;;  %p666_p7 = scmp.le.s32.totalorder %s3893_s28, 7 }
  0xdc   : > { %s3698_s17 = scalar_select %p3697_p5, 0, 1  ;;  %vm475_vm12 = vcmp.eq.s32.totalorder %v474_v52, 1 }
  0xdd   : > { %p667_p5 = scmp.gt.s32.totalorder %s3899_s11, 7  ;;  %p3701_p11 = scmp.ne.s32.totalorder %s3661_s3, 0  ;;  %v476_v2 = vsel %vm475_vm12, %v471_v56, %v429_v44  ;;  %v477_v3 = vsel %vm475_vm12, %v472_v57, %v430_v45 }
  0xde   : > { %v485_v58 = vstv %s3698_s17  ;;  %s1606_s17 = scalar_select %p2248_p4, 0, 1  ;;  %v518_v14 = vmax.f32 %v476_v2, %v2283_v6  ;;  %v519_v15 = vmax.f32 %v477_v3, %v2286_v7 }
  0xdf   : > { %s3702_s0 = scalar_select %p3701_p11, 0, 1  ;;  %vm486_vm13 = vcmp.eq.s32.totalorder %v485_v58, 1 }
  0xe0   : > { %p3703_p3 = scmp.le.s32.totalorder %s3881_s21, 7  ;;  %p2274_p12 = pnand %p667_p5, %p666_p7  ;;  %v487_v11 = vsel %vm486_vm13, %v482_v62, %v440_v53  ;;  %v488_v12 = vsel %vm486_vm13, %v483_v63, %v441_v54  ;;  %v615_v54 = vstv %s1603_s24 }
  0xe1   : > { %v496_v0 = vstv %s3702_s0  ;;  %s3706_s3 = scalar_select %p2047_p10, 0, 1  ;;  %v529_v20 = vmax.f32 %v487_v11, %v2283_v6  ;;  %v530_v21 = vmax.f32 %v488_v12, %v2286_v7  ;;  %vm616_vm8 = vcmp.eq.s32.totalorder %v615_v54, 1 }
  0xe2   : > { %p2270_p0 = pnand %p656_p6, %p3703_p3  ;;  %p677_p6 = scmp.le.s32.totalorder %s3907_s29, 7  ;;  %vm497_vm14 = vcmp.eq.s32.totalorder %v496_v0, 1 }
  0xe3   : > { %v507_v5 = vstv %s3706_s3  ;;  %p678_p7 = scmp.gt.s32.totalorder %s3913_s10, 7  ;;  %p688_p10 = scmp.le.s32.totalorder %s3921_s6, 7  ;;  %v498_v17 = vsel %vm497_vm14, %v493_v4, %v451_v59  ;;  %v499_v19 = vsel %vm497_vm14, %v494_v9, %v452_v61  ;;  %v534_v33 = vsel %vm533_vm1, %v529_v20, %v487_v11  ;;  %v2466_v9 = vld [vmem:[%s1858_s7 + $0x78] sm:$0xff] }
  0xe4   : > { %s3707_s0 = scalar_select %p2056_p2, 0, 1  ;;  %vm508_vm15 = vcmp.eq.s32.totalorder %v507_v5, 1  ;;  %v540_v26 = vmax.f32 %v498_v17, %v2283_v6  ;;  %v541_v31 = vmax.f32 %v499_v19, %v2286_v7  ;;  %v535_v34 = vsel %vm533_vm1, %v530_v21, %v488_v12 }
  0xe5   : > { %s1609_s23 = scalar_select %p2270_p0, 0, 1  ;;  %v509_v23 = vsel %vm508_vm15, %v504_v13, %v462_v1  ;;  %v510_v30 = vsel %vm508_vm15, %v505_v18, %v463_v8  ;;  %v576_v42 = vmax.f32 %v534_v33, %v2341_v28  ;;  %v577_v43 = vmax.f32 %v535_v34, %v2344_v29  ;;  %v2463_v8 = vld [vmem:[%s1858_s7 + $0x70] sm:$0xff] }
  0xe6   : > { %v521_v10 = vstv %s3707_s0  ;;  %s1610_s3 = scalar_select %p2274_p12, 0, 1  ;;  %v551_v35 = vmax.f32 %v509_v23, %v2283_v6  ;;  %v545_v39 = vsel %vm544_vm2, %v540_v26, %v498_v17  ;;  %v552_v40 = vmax.f32 %v510_v30, %v2286_v7 }
  0xe7   : > { %p2311_p2 = pnand %p678_p7, %p677_p6  ;;  %vm522_vm0 = vcmp.eq.s32.totalorder %v521_v10, 1  ;;  %p689_p5 = scmp.gt.s32.totalorder %s3927_s9, 7  ;;  %v546_v41 = vsel %vm544_vm2, %v541_v31, %v499_v19  ;;  %v587_v48 = vmax.f32 %v545_v39, %v2341_v28  ;;  %v648_v7 = vstv %s1606_s17  ;;  %v2524_v31 = vld [vmem:[%s1858_s7 + $0x88] sm:$0xff] }
  0xe8   : > { %p702_p8 = scmp.le.s32.totalorder %s3881_s21, 8  ;;  %p703_p3 = scmp.gt.s32.totalorder %s3879_s20, 8  ;;  %v523_v24 = vsel %vm522_vm0, %v518_v14, %v476_v2  ;;  %v524_v25 = vsel %vm522_vm0, %v519_v15, %v477_v3  ;;  %v588_v53 = vmax.f32 %v546_v41, %v2344_v29  ;;  %v662_v12 = vstv %s1609_s23 }
  0xe9   : > { %s1611_s13 = scalar_select %p2311_p2, 0, 1  ;;  %v565_v36 = vmax.f32 %v523_v24, %v2341_v28  ;;  %v566_v37 = vmax.f32 %v524_v25, %v2344_v29  ;;  %vm649_vm11 = vcmp.eq.s32.totalorder %v648_v7, 1  ;;  %v673_v18 = vstv %s1610_s3 }
  0xea   : > { %p2331_p11 = pnand %p689_p5, %p688_p10  ;;  %p3710_p9 = scmp.ne.s32.totalorder %s3669_s26, 0  ;;  %vm663_vm12 = vcmp.eq.s32.totalorder %v662_v12, 1  ;;  %vm674_vm13 = vcmp.eq.s32.totalorder %v673_v18, 1 }
  0xeb   : > { %p713_p6 = scmp.le.s32.totalorder %s3893_s28, 8  ;;  %p714_p7 = scmp.gt.s32.totalorder %s3899_s11, 8  ;;  %v570_v46 = vsel %vm569_vm4, %v565_v36, %v523_v24  ;;  %v571_v47 = vsel %vm569_vm4, %v566_v37, %v524_v25  ;;  %v684_v24 = vstv %s1611_s13 }
  0xec   : > { %s3711_s22 = scalar_select %p3710_p9, 0, 1  ;;  %v612_v58 = vmax.f32 %v570_v46, %v2402_v50  ;;  %v613_v59 = vmax.f32 %v571_v47, %v2405_v51  ;;  %vm685_vm14 = vcmp.eq.s32.totalorder %v684_v24, 1 }
  0xed   : > { %s1612_s12 = scalar_select %p2331_p11, 0, 1 }
  0xee   : > { %v554_v27 = vstv %s3711_s22  ;;  %p2362_p10 = pnand %p703_p3, %p702_p8  ;;  %p2366_p5 = pnand %p714_p7, %p713_p6  ;;  %v617_v4 = vsel %vm616_vm8, %v612_v58, %v570_v46  ;;  %v618_v5 = vsel %vm616_vm8, %v613_v59, %v571_v47 }
  0xef   : > { %vm555_vm3 = vcmp.eq.s32.totalorder %v554_v27, 1  ;;  %p3714_p13 = scmp.ne.s32.totalorder %s3673_s18, 0  ;;  %p724_p8 = scmp.le.s32.totalorder %s3907_s29, 8  ;;  %v659_v16 = vmax.f32 %v617_v4, %v2463_v8  ;;  %v660_v17 = vmax.f32 %v618_v5, %v2466_v9 }
  0xf0   : > { %p725_p3 = scmp.gt.s32.totalorder %s3913_s10, 8  ;;  %p3716_p9 = scmp.ne.s32.totalorder %s3678_s8, 0  ;;  %v556_v45 = vsel %vm555_vm3, %v551_v35, %v509_v23  ;;  %v557_v52 = vsel %vm555_vm3, %v552_v40, %v510_v30  ;;  %v2521_v30 = vld [vmem:[%s1858_s7 + $0x80] sm:$0xff] }
  0xf1   : > { %s3715_s19 = scalar_select %p3714_p13, 0, 1  ;;  %v598_v57 = vmax.f32 %v556_v45, %v2341_v28  ;;  %v599_v62 = vmax.f32 %v557_v52, %v2344_v29  ;;  %v664_v26 = vsel %vm663_vm12, %v659_v16, %v617_v4  ;;  %v665_v27 = vsel %vm663_vm12, %v660_v17, %v618_v5 }
  0xf2   : > { %s1615_s0 = scalar_select %p2362_p10, 0, 1  ;;  %v695_v29 = vstv %s1612_s12 }
  0xf3   : > { %v579_v38 = vstv %s3715_s19  ;;  %s3717_s18 = scalar_select %p3716_p9, 0, 1  ;;  %vm696_vm15 = vcmp.eq.s32.totalorder %v695_v29, 1 }
  0xf4   : > { %s1616_s22 = scalar_select %p2366_p5, 0, 1  ;;  %vm580_vm5 = vcmp.eq.s32.totalorder %v579_v38, 1  ;;  %v706_v38 = vmax.f32 %v664_v26, %v2521_v30 }
  0xf5   : > { %v590_v44 = vstv %s3717_s18  ;;  %p2392_p6 = pnand %p725_p3, %p724_p8  ;;  %p735_p7 = scmp.le.s32.totalorder %s3921_s6, 8  ;;  %v581_v55 = vsel %vm580_vm5, %v576_v42, %v534_v33  ;;  %v582_v56 = vsel %vm580_vm5, %v577_v43, %v535_v34  ;;  %v709_v34 = vstv %s1615_s0 }
  0xf6   : > { %s3719_s8 = scalar_select %p2161_p1, 0, 1  ;;  %vm591_vm6 = vcmp.eq.s32.totalorder %v590_v44, 1  ;;  %v623_v0 = vmax.f32 %v581_v55, %v2402_v50  ;;  %v624_v1 = vmax.f32 %v582_v56, %v2405_v51  ;;  %v720_v40 = vstv %s1616_s22 }
  0xf7   : > { %p736_p13 = scmp.gt.s32.totalorder %s3927_s9, 8  ;;  %p750_p9 = scmp.gt.s32.totalorder %s3879_s20, 9  ;;  %v592_v61 = vsel %vm591_vm6, %v587_v48, %v545_v39  ;;  %v593_v63 = vsel %vm591_vm6, %v588_v53, %v546_v41  ;;  %v707_v39 = vmax.f32 %v665_v27, %v2524_v31  ;;  %vm710_vm0 = vcmp.eq.s32.totalorder %v709_v34, 1  ;;  %v2591_v53 = vld [vmem:[%s1858_s7 + $0x98] sm:$0xff] }
  0xf8   : > { %v601_v49 = vstv %s3719_s8  ;;  %s1617_s14 = scalar_select %p2392_p6, 0, 1  ;;  %v634_v6 = vmax.f32 %v592_v61, %v2402_v50  ;;  %v635_v11 = vmax.f32 %v593_v63, %v2405_v51  ;;  %vm721_vm1 = vcmp.eq.s32.totalorder %v720_v40, 1 }
  0xf9   : > { %p2421_p1 = pnand %p736_p13, %p735_p7  ;;  %vm602_vm7 = vcmp.eq.s32.totalorder %v601_v49, 1  ;;  %p3722_p3 = scmp.ne.s32.totalorder %s3690_s2, 0  ;;  %v711_v48 = vsel %vm710_vm0, %v706_v38, %v664_v26  ;;  %v712_v49 = vsel %vm710_vm0, %v707_v39, %v665_v27 }
  0xfa   : > { %p760_p8 = scmp.le.s32.totalorder %s3893_s28, 9  ;;  %p761_p6 = scmp.gt.s32.totalorder %s3899_s11, 9  ;;  %v603_v3 = vsel %vm602_vm7, %v598_v57, %v556_v45  ;;  %v604_v10 = vsel %vm602_vm7, %v599_v62, %v557_v52  ;;  %v731_v46 = vstv %s1617_s14  ;;  %v2588_v52 = vld [vmem:[%s1858_s7 + $0x90] sm:$0xff] }
  0xfb   : > { %s3723_s4 = scalar_select %p3722_p3, 0, 1  ;;  %v645_v15 = vmax.f32 %v603_v3, %v2402_v50  ;;  %v646_v20 = vmax.f32 %v604_v10, %v2405_v51  ;;  %vm732_vm2 = vcmp.eq.s32.totalorder %v731_v46, 1 }
  0xfc   : > { %s1618_s24 = scalar_select %p2421_p1, 0, 1 }
  0xfd   : > { %v626_v60 = vstv %s3723_s4  ;;  %p3724_p7 = scmp.ne.s32.totalorder %s3694_s15, 0  ;;  %p3726_p13 = scmp.le.s32.totalorder %s3881_s21, 9  ;;  %v650_v25 = vsel %vm649_vm11, %v645_v15, %v603_v3  ;;  %v651_v32 = vsel %vm649_vm11, %v646_v20, %v604_v10  ;;  %v2651_v10 = vld [vmem:[%s1858_s7 + $0xa0] sm:$0xff] }
  0xfe   : > { %p2451_p5 = pnand %p761_p6, %p760_p8  ;;  %vm627_vm9 = vcmp.eq.s32.totalorder %v626_v60, 1  ;;  %p771_p1 = scmp.le.s32.totalorder %s3907_s29, 9  ;;  %v692_v37 = vmax.f32 %v650_v25, %v2463_v8  ;;  %v693_v42 = vmax.f32 %v651_v32, %v2466_v9  ;;  %v742_v51 = vstv %s1618_s24 }
  0xff   : > { %s3725_s2 = scalar_select %p3724_p7, 0, 1  ;;  %v628_v13 = vsel %vm627_vm9, %v623_v0, %v581_v55  ;;  %v629_v14 = vsel %vm627_vm9, %v624_v1, %v582_v56  ;;  %vm743_vm3 = vcmp.eq.s32.totalorder %v742_v51, 1  ;;  %v753_v60 = vmax.f32 %v711_v48, %v2588_v52 }
 0x100   : > { %p2447_p3 = pnand %p750_p9, %p3726_p13  ;;  %p772_p10 = scmp.gt.s32.totalorder %s3913_s10, 9  ;;  %v670_v22 = vmax.f32 %v628_v13, %v2463_v8  ;;  %v671_v23 = vmax.f32 %v629_v14, %v2466_v9  ;;  %v697_v47 = vsel %vm696_vm15, %v692_v37, %v650_v25  ;;  %v698_v54 = vsel %vm696_vm15, %v693_v42, %v651_v32  ;;  %v2709_v32 = vld [vmem:[%s1858_s7 + $0xb0] sm:$0xff] }
 0x101   : > { %v637_v2 = vstv %s3725_s2  ;;  %s1622_s25 = scalar_select %p2451_p5, 0, 1  ;;  %v739_v59 = vmax.f32 %v697_v47, %v2521_v30  ;;  %v740_v0 = vmax.f32 %v698_v54, %v2524_v31 }
 0x102   : > { %s1621_s15 = scalar_select %p2447_p3, 0, 1  ;;  %vm638_vm10 = vcmp.eq.s32.totalorder %v637_v2, 1  ;;  %v675_v35 = vsel %vm674_vm13, %v670_v22, %v628_v13  ;;  %v676_v36 = vsel %vm674_vm13, %v671_v23, %v629_v14 }
 0x103   : > { %p2484_p4 = pnand %p772_p10, %p771_p1  ;;  %p782_p6 = scmp.le.s32.totalorder %s3921_s6, 9  ;;  %v639_v19 = vsel %vm638_vm10, %v634_v6, %v592_v61  ;;  %v640_v21 = vsel %vm638_vm10, %v635_v11, %v593_v63  ;;  %v717_v44 = vmax.f32 %v675_v35, %v2521_v30  ;;  %v718_v45 = vmax.f32 %v676_v36, %v2524_v31  ;;  %v2654_v11 = vld [vmem:[%s1858_s7 + $0xa8] sm:$0xff] }
 0x104   : > { %p783_p0 = scmp.gt.s32.totalorder %s3927_s9, 9  ;;  %p796_p8 = scmp.le.s32.totalorder %s3881_s21, 10  ;;  %v681_v28 = vmax.f32 %v639_v19, %v2463_v8  ;;  %v682_v33 = vmax.f32 %v640_v21, %v2466_v9  ;;  %v756_v56 = vstv %s1621_s15  ;;  %v754_v61 = vmax.f32 %v712_v49, %v2591_v53 }
 0x105   : > { %s1623_s27 = scalar_select %p2484_p4, 0, 1  ;;  %v722_v57 = vsel %vm721_vm1, %v717_v44, %v675_v35  ;;  %v723_v58 = vsel %vm721_vm1, %v718_v45, %v676_v36  ;;  %v767_v62 = vstv %s1622_s25  ;;  %vm757_vm4 = vcmp.eq.s32.totalorder %v756_v56, 1 }
 0x106   : > { %p2508_p12 = pnand %p783_p0, %p782_p6  ;;  %p797_p10 = scmp.gt.s32.totalorder %s3879_s20, 10  ;;  %v686_v41 = vsel %vm685_vm14, %v681_v28, %v639_v19  ;;  %v687_v43 = vsel %vm685_vm14, %v682_v33, %v640_v21  ;;  %v764_v2 = vmax.f32 %v722_v57, %v2588_v52  ;;  %v765_v3 = vmax.f32 %v723_v58, %v2591_v53  ;;  %v2712_v33 = vld [vmem:[%s1858_s7 + $0xb8] sm:$0xff] }
 0x107   : > { %p807_p1 = scmp.le.s32.totalorder %s3893_s28, 10  ;;  %p808_p9 = scmp.gt.s32.totalorder %s3899_s11, 10  ;;  %v728_v50 = vmax.f32 %v686_v41, %v2521_v30  ;;  %v729_v55 = vmax.f32 %v687_v43, %v2524_v31  ;;  %v778_v4 = vstv %s1623_s27  ;;  %v744_v5 = vsel %vm743_vm3, %v739_v59, %v697_v47 }
 0x108   : > { %s1624_s23 = scalar_select %p2508_p12, 0, 1  ;;  %vm768_vm5 = vcmp.eq.s32.totalorder %v767_v62, 1  ;;  %v758_v6 = vsel %vm757_vm4, %v753_v60, %v711_v48  ;;  %v759_v7 = vsel %vm757_vm4, %v754_v61, %v712_v49  ;;  %vm779_vm6 = vcmp.eq.s32.totalorder %v778_v4, 1 }
 0x109   : > { %p2537_p7 = pnand %p797_p10, %p796_p8  ;;  %p2545_p11 = pnand %p808_p9, %p807_p1  ;;  %v733_v63 = vsel %vm732_vm2, %v728_v50, %v686_v41  ;;  %v734_v1 = vsel %vm732_vm2, %v729_v55, %v687_v43  ;;  %v745_v14 = vsel %vm743_vm3, %v740_v0, %v698_v54  ;;  %v769_v15 = vsel %vm768_vm5, %v764_v2, %v722_v57  ;;  %v2771_v54 = vld [vmem:[%s1858_s7 + $0xc0] sm:$0xff]  ;;  %v2774_v55 = vld [vmem:[%s1858_s7 + $0xc8] sm:$0xff] }
 0x10a   : > { %p818_p13 = scmp.le.s32.totalorder %s3907_s29, 10  ;;  %p819_p6 = scmp.gt.s32.totalorder %s3913_s10, 10  ;;  %v775_v8 = vmax.f32 %v733_v63, %v2588_v52  ;;  %v789_v9 = vstv %s1624_s23  ;;  %v776_v12 = vmax.f32 %v734_v1, %v2591_v53  ;;  %v770_v16 = vsel %vm768_vm5, %v765_v3, %v723_v58 }
 0x10b   : > { %s1627_s13 = scalar_select %p2537_p7, 0, 1  ;;  %v786_v17 = vmax.f32 %v744_v5, %v2588_v52  ;;  %vm790_vm7 = vcmp.eq.s32.totalorder %v789_v9, 1  ;;  %v800_v18 = vmax.f32 %v758_v6, %v2651_v10  ;;  %v801_v19 = vmax.f32 %v759_v7, %v2654_v11 }
 0x10c   : > { %s1628_s5 = scalar_select %p2545_p11, 0, 1  ;;  %v780_v21 = vsel %vm779_vm6, %v775_v8, %v733_v63  ;;  %v781_v22 = vsel %vm779_vm6, %v776_v12, %v734_v1  ;;  %v787_v23 = vmax.f32 %v745_v14, %v2591_v53  ;;  %v811_v24 = vmax.f32 %v769_v15, %v2651_v10  ;;  %v2837_v12 = vld [vmem:[%s1858_s7 + $0xd0] sm:$0xff] }
 0x10d   : > { %p2575_p10 = pnand %p819_p6, %p818_p13  ;;  %p829_p1 = scmp.le.s32.totalorder %s3921_s6, 10  ;;  %v803_v13 = vstv %s1627_s13  ;;  %v791_v26 = vsel %vm790_vm7, %v786_v17, %v744_v5  ;;  %v812_v27 = vmax.f32 %v770_v16, %v2654_v11  ;;  %v822_v30 = vmax.f32 %v780_v21, %v2651_v10 }
 0x10e   : > { %p830_p9 = scmp.gt.s32.totalorder %s3927_s9, 10  ;;  %p843_p2 = scmp.le.s32.totalorder %s3881_s21, 11  ;;  %v814_v20 = vstv %s1628_s5  ;;  %vm804_vm8 = vcmp.eq.s32.totalorder %v803_v13, 1  ;;  %v823_v34 = vmax.f32 %v781_v22, %v2654_v11  ;;  %v792_v36 = vsel %vm790_vm7, %v787_v23, %v745_v14 }
 0x10f   : > { %s1629_s26 = scalar_select %p2575_p10, 0, 1  ;;  %vm815_vm9 = vcmp.eq.s32.totalorder %v814_v20, 1  ;;  %v805_v28 = vsel %vm804_vm8, %v800_v18, %v758_v6  ;;  %v806_v29 = vsel %vm804_vm8, %v801_v19, %v759_v7  ;;  %v833_v38 = vmax.f32 %v791_v26, %v2651_v10 }
 0x110   : > { %p2604_p6 = pnand %p830_p9, %p829_p1  ;;  %p844_p0 = scmp.gt.s32.totalorder %s3879_s20, 11  ;;  %v816_v37 = vsel %vm815_vm9, %v811_v24, %v769_v15  ;;  %v817_v39 = vsel %vm815_vm9, %v812_v27, %v770_v16  ;;  %v847_v40 = vmax.f32 %v805_v28, %v2709_v32  ;;  %v848_v41 = vmax.f32 %v806_v29, %v2712_v33  ;;  %v2854_v16 = vld [vmem:[%s1858_s7 + $0xd8] sm:$0xff] }
 0x111   : > { %p854_p8 = scmp.le.s32.totalorder %s3893_s28, 11  ;;  %p855_p3 = scmp.gt.s32.totalorder %s3899_s11, 11  ;;  %v825_v25 = vstv %s1629_s26  ;;  %v834_v45 = vmax.f32 %v792_v36, %v2654_v11  ;;  %v858_v48 = vmax.f32 %v816_v37, %v2709_v32  ;;  %v859_v49 = vmax.f32 %v817_v39, %v2712_v33 }
 0x112   : > { %s1630_s0 = scalar_select %p2604_p6, 0, 1  ;;  %vm826_vm10 = vcmp.eq.s32.totalorder %v825_v25, 1  ;;  %v1075_v50 = vlaneseq }
 0x113   : > { %p2627_p1 = pnand %p844_p0, %p843_p2  ;;  %p2631_p9 = pnand %p855_p3, %p854_p8  ;;  %v827_v42 = vsel %vm826_vm10, %v822_v30, %v780_v21  ;;  %v828_v44 = vsel %vm826_vm10, %v823_v34, %v781_v22 }
 0x114   : > { %p865_p5 = scmp.le.s32.totalorder %s3907_s29, 11  ;;  %p866_p2 = scmp.gt.s32.totalorder %s3913_s10, 11  ;;  %v836_v31 = vstv %s1630_s0  ;;  %v869_v53 = vmax.f32 %v827_v42, %v2709_v32  ;;  %v870_v56 = vmax.f32 %v828_v44, %v2712_v33  ;;  %v2827_v6 = vshrl.u32 %v1075_v50, 7 }
 0x115   : > { %s1633_s14 = scalar_select %p2627_p1, 0, 1  ;;  %vm837_vm11 = vcmp.eq.s32.totalorder %v836_v31, 1 }
 0x116   : > { %s1634_s18 = scalar_select %p2631_p9, 0, 1  ;;  %v838_v47 = vsel %vm837_vm11, %v833_v38, %v791_v26  ;;  %v839_v59 = vsel %vm837_vm11, %v834_v45, %v792_v36  ;;  %v2862_v19 = vadd.s32 8, %v2827_v6 }
 0x117   : > { %p2666_p4 = pnand %p866_p2, %p865_p5  ;;  %p876_p12 = scmp.le.s32.totalorder %s3921_s6, 11  ;;  %v850_v35 = vstv %s1633_s14  ;;  %v880_v60 = vmax.f32 %v838_v47, %v2709_v32  ;;  %v881_v4 = vmax.f32 %v839_v59, %v2712_v33 }
 0x118   : > { %p877_p7 = scmp.gt.s32.totalorder %s3927_s9, 11  ;;  %p890_p13 = scmp.le.s32.totalorder %s3881_s21, 12  ;;  %vm851_vm12 = vcmp.eq.s32.totalorder %v850_v35, 1  ;;  %v861_v43 = vstv %s1634_s18 }
 0x119   : > { %s1635_s2 = scalar_select %p2666_p4, 0, 1  ;;  %v852_v51 = vsel %vm851_vm12, %v847_v40, %v805_v28  ;;  %v853_v52 = vsel %vm851_vm12, %v848_v41, %v806_v29  ;;  %vm862_vm13 = vcmp.eq.s32.totalorder %v861_v43, 1  ;;  %v2912_v43 = vld [vmem:[%s1858_s7 + $0xe8] sm:$0xff] }
 0x11a   : > { %p2687_p0 = pnand %p877_p7, %p876_p12  ;;  %p891_p8 = scmp.gt.s32.totalorder %s3879_s20, 12  ;;  %v863_v61 = vsel %vm862_vm13, %v858_v48, %v816_v37  ;;  %v864_v62 = vsel %vm862_vm13, %v859_v49, %v817_v39  ;;  %v894_v63 = vmax.f32 %v852_v51, %v2771_v54  ;;  %v895_v0 = vmax.f32 %v853_v52, %v2774_v55 }
 0x11b   : > { %p901_p11 = scmp.le.s32.totalorder %s3893_s28, 12  ;;  %p902_p3 = scmp.gt.s32.totalorder %s3899_s11, 12  ;;  %v872_v46 = vstv %s1635_s2  ;;  %v905_v7 = vmax.f32 %v863_v61, %v2771_v54  ;;  %v906_v8 = vmax.f32 %v864_v62, %v2774_v55 }
 0x11c   : > { %s1636_s4 = scalar_select %p2687_p0, 0, 1  ;;  %vm873_vm14 = vcmp.eq.s32.totalorder %v872_v46, 1 }
 0x11d   : > { %p2718_p10 = pnand %p891_p8, %p890_p13  ;;  %p2724_p5 = pnand %p902_p3, %p901_p11  ;;  %v874_v1 = vsel %vm873_vm14, %v869_v53, %v827_v42  ;;  %v875_v3 = vsel %vm873_vm14, %v870_v56, %v828_v44  ;;  %v2909_v42 = vld [vmem:[%s1858_s7 + $0xe0] sm:$0xff] }
 0x11e   : > { %p912_p6 = scmp.le.s32.totalorder %s3907_s29, 12  ;;  %p913_p2 = scmp.gt.s32.totalorder %s3913_s10, 12  ;;  %v883_v57 = vstv %s1636_s4  ;;  %v916_v11 = vmax.f32 %v874_v1, %v2771_v54  ;;  %v917_v14 = vmax.f32 %v875_v3, %v2774_v55 }
 0x11f   : > { %s1639_s17 = scalar_select %p2718_p10, 0, 1  ;;  %vm884_vm15 = vcmp.eq.s32.totalorder %v883_v57, 1 }
 0x120   : > { %s1640_s27 = scalar_select %p2724_p5, 0, 1  ;;  %v885_v9 = vsel %vm884_vm15, %v880_v60, %v838_v47  ;;  %v886_v17 = vsel %vm884_vm15, %v881_v4, %v839_v59 }
 0x121   : > { %p2752_p1 = pnand %p913_p2, %p912_p6  ;;  %p923_p12 = scmp.le.s32.totalorder %s3921_s6, 12  ;;  %v897_v58 = vstv %s1639_s17  ;;  %v927_v23 = vmax.f32 %v885_v9, %v2771_v54  ;;  %v928_v29 = vmax.f32 %v886_v17, %v2774_v55 }
 0x122   : > { %p924_p9 = scmp.gt.s32.totalorder %s3927_s9, 12  ;;  %p937_p7 = scmp.le.s32.totalorder %s3881_s21, 13  ;;  %vm898_vm0 = vcmp.eq.s32.totalorder %v897_v58, 1  ;;  %v908_v2 = vstv %s1640_s27 }
 0x123   : > { %s1641_s23 = scalar_select %p2752_p1, 0, 1  ;;  %v899_v10 = vsel %vm898_vm0, %v894_v63, %v852_v51  ;;  %vm909_vm1 = vcmp.eq.s32.totalorder %v908_v2, 1  ;;  %v900_v13 = vsel %vm898_vm0, %v895_v0, %v853_v52 }
 0x124   : > { %p2780_p4 = pnand %p924_p9, %p923_p12  ;;  %p938_p13 = scmp.gt.s32.totalorder %s3879_s20, 13  ;;  %v910_v21 = vsel %vm909_vm1, %v905_v7, %v863_v61  ;;  %v911_v22 = vsel %vm909_vm1, %v906_v8, %v864_v62  ;;  %v941_v24 = vmax.f32 %v899_v10, %v2837_v12  ;;  %v942_v26 = vmax.f32 %v900_v13, %v2854_v16 }
 0x125   : > { %p948_p8 = scmp.le.s32.totalorder %s3893_s28, 13  ;;  %p949_p11 = scmp.gt.s32.totalorder %s3899_s11, 13  ;;  %v919_v5 = vstv %s1641_s23  ;;  %v952_v31 = vmax.f32 %v910_v21, %v2837_v12  ;;  %v953_v32 = vmax.f32 %v911_v22, %v2854_v16 }
 0x126   : > { %s1642_s16 = scalar_select %p2780_p4, 0, 1  ;;  %vm920_vm2 = vcmp.eq.s32.totalorder %v919_v5, 1 }
 0x127   : > { %p2806_p0 = pnand %p938_p13, %p937_p7  ;;  %p2810_p3 = pnand %p949_p11, %p948_p8  ;;  %v921_v25 = vsel %vm920_vm2, %v916_v11, %v874_v1  ;;  %v922_v28 = vsel %vm920_vm2, %v917_v14, %v875_v3  ;;  %v3017_v14 = vld [vmem:[%s1858_s7 + $0xf0] sm:$0xff] }
 0x128   : > { %p959_p10 = scmp.le.s32.totalorder %s3907_s29, 13  ;;  %p960_p6 = scmp.gt.s32.totalorder %s3913_s10, 13  ;;  %v930_v15 = vstv %s1642_s16  ;;  %v963_v36 = vmax.f32 %v921_v25, %v2837_v12  ;;  %v964_v40 = vmax.f32 %v922_v28, %v2854_v16 }
 0x129   : > { %s1645_s12 = scalar_select %p2806_p0, 0, 1  ;;  %vm931_vm3 = vcmp.eq.s32.totalorder %v930_v15, 1  ;;  %v3020_v15 = vld [vmem:[%s1858_s7 + $0xf8] sm:$0xff] }
 0x12a   : > { %s1646_s26 = scalar_select %p2810_p3, 0, 1  ;;  %v932_v35 = vsel %vm931_vm3, %v927_v23, %v885_v9  ;;  %v933_v46 = vsel %vm931_vm3, %v928_v29, %v886_v17 }
 0x12b   : > { %s3749_s30 = sld [smem:[#allocation10_spill]]  ;;  %p2843_p5 = pnand %p960_p6, %p959_p10  ;;  %v944_v18 = vstv %s1645_s12  ;;  %v974_v53 = vmax.f32 %v932_v35, %v2837_v12  ;;  %v975_v0 = vmax.f32 %v933_v46, %v2854_v16 }
 0x12c   : > { %p970_p2 = scmp.le.s32.totalorder %s3921_s6, 13  ;;  %p971_p1 = scmp.gt.s32.totalorder %s3927_s9, 13  ;;  %v955_v27 = vstv %s1646_s26  ;;  %vm945_vm4 = vcmp.eq.s32.totalorder %v944_v18, 1  ;;  %v3789_v18 = vmov 0 }
 0x12d   : > { %p984_p12 = scmp.le.s32.totalorder %s3881_s21, 14  ;;  %s3751_s19 = sld [smem:[#allocation11_spill]]  ;;  %vm956_vm5 = vcmp.eq.s32.totalorder %v955_v27, 1  ;;  %v946_v38 = vsel %vm945_vm4, %v941_v24, %v899_v10  ;;  %v947_v39 = vsel %vm945_vm4, %v942_v26, %v900_v13 }
 0x12e   : > { %s1647_s22 = scalar_select %p2843_p5, 0, 1  ;;  %v957_v51 = vsel %vm956_vm5, %v952_v31, %v910_v21  ;;  %v958_v52 = vsel %vm956_vm5, %v953_v32, %v911_v22  ;;  %v988_v57 = vmax.f32 %v946_v38, %v2909_v42  ;;  %v989_v58 = vmax.f32 %v947_v39, %v2912_v43 }
 0x12f   : > { %p2871_p9 = pnand %p971_p1, %p970_p2  ;;  %p985_p7 = scmp.gt.s32.totalorder %s3879_s20, 14  ;;  %v999_v2 = vmax.f32 %v957_v51, %v2909_v42  ;;  %v1000_v8 = vmax.f32 %v958_v52, %v2912_v43  ;;  %v3793_v31 = vmov 0 }
 0x130   : > { %s3753_s18 = sld [smem:[#allocation12_spill]]  ;;  %p995_p4 = scmp.le.s32.totalorder %s3893_s28, 14  ;;  %v966_v33 = vstv %s1647_s22 }
 0x131   : > { %v1079_v20 = vstv %s3749_s30  ;;  %p996_p13 = scmp.gt.s32.totalorder %s3899_s11, 14  ;;  %s3754_s24 = sld [smem:[#allocation13_spill]]  ;;  %vm967_vm8 = vcmp.eq.s32.totalorder %v966_v33, 1 }
 0x132   : > { %s1648_s2 = scalar_select %p2871_p9, 0, 1  ;;  %vm2917_vm6 = vcmp.ge.s32.totalorder %v2827_v6, %v1079_v20  ;;  %vm2930_vm9 = vcmp.ge.s32.totalorder %v2862_v19, %v1079_v20  ;;  %v968_v62 = vsel %vm967_vm8, %v963_v36, %v921_v25  ;;  %v969_v63 = vsel %vm967_vm8, %v964_v40, %v922_v28 }
 0x133   : > { %v1082_v30 = vstv %s3751_s19  ;;  %p2891_p8 = pnand %p985_p7, %p984_p12  ;;  %p2895_p11 = pnand %p996_p13, %p995_p4  ;;  %v1010_v12 = vmax.f32 %v968_v62, %v2909_v42  ;;  %v1011_v13 = vmax.f32 %v969_v63, %v2912_v43 }
 0x134   : > { %p1006_p0 = scmp.le.s32.totalorder %s3907_s29, 14  ;;  %p1007_p3 = scmp.gt.s32.totalorder %s3913_s10, 14  ;;  %v977_v41 = vstv %s1648_s2  ;;  %vm2922_vm7 = vcmp.lt.s32.totalorder %v2827_v6, %v1082_v30  ;;  %vm2935_vm10 = vcmp.lt.s32.totalorder %v2862_v19, %v1082_v30 }
 0x135   : > { %s3757_s15 = sld [smem:[#allocation14_spill]]  ;;  %s3758_s25 = sld [smem:[#allocation15_spill]]  ;;  %vm978_vm13 = vcmp.eq.s32.totalorder %v977_v41, 1 }
 0x136   : > { %v1111_v34 = vstv %s3753_s18  ;;  %s1651_s17 = scalar_select %p2891_p8, 0, 1  ;;  %v979_v7 = vsel %vm978_vm13, %v974_v53, %v932_v35  ;;  %v980_v16 = vsel %vm978_vm13, %v975_v0, %v933_v46 }
 0x137   : > { %v1114_v37 = vstv %s3754_s24  ;;  %s1652_s27 = scalar_select %p2895_p11, 0, 1  ;;  %vm2954_vm11 = vcmp.ge.s32.totalorder %v2827_v6, %v1111_v34  ;;  %vm2968_vm14 = vcmp.ge.s32.totalorder %v2862_v19, %v1111_v34  ;;  %v1021_v21 = vmax.f32 %v979_v7, %v2909_v42 }
 0x138   : > { %v991_v54 = vstv %s1651_s17  ;;  %p2948_p10 = pnand %p1007_p3, %p1006_p0  ;;  %p1017_p6 = scmp.le.s32.totalorder %s3921_s6, 14  ;;  %vm2959_vm12 = vcmp.lt.s32.totalorder %v2827_v6, %v1114_v37  ;;  %vm2973_vm15 = vcmp.lt.s32.totalorder %v2862_v19, %v1114_v37  ;;  %v1022_v29 = vmax.f32 %v980_v16, %v2912_v43 }
 0x139   : > { %v1002_v59 = vstv %s1652_s27  ;;  %p1018_p5 = scmp.gt.s32.totalorder %s3927_s9, 14  ;;  %s3772_s23 = sld [smem:[#allocation16_spill]]  ;;  %vm992_vm0 = vcmp.eq.s32.totalorder %v991_v54, 1 }
 0x13a   : > { %p1031_p2 = scmp.le.s32.totalorder %s3881_s21, 15  ;;  %p1032_p12 = scmp.gt.s32.totalorder %s3879_s20, 15  ;;  %vm1003_vm5 = vcmp.eq.s32.totalorder %v1002_v59, 1  ;;  %v993_v10 = vsel %vm992_vm0, %v988_v57, %v946_v38  ;;  %v994_v11 = vsel %vm992_vm0, %v989_v58, %v947_v39 }
 0x13b   : > { %v1141_v49 = vstv %s3757_s15  ;;  %v1144_v50 = vstv %s3758_s25  ;;  %s1653_s3 = scalar_select %p2948_p10, 0, 1  ;;  %v1004_v20 = vsel %vm1003_vm5, %v999_v2, %v957_v51  ;;  %v3051_v24 = vsel %vm1003_vm5, %v1000_v8, %v958_v52  ;;  %vm3070_vm5 = vmand %vm2917_vm6, %vm2922_vm7 }
 0x13c   : > { %vm2983_vm1 = vcmp.ge.s32.totalorder %v2827_v6, %v1141_v49  ;;  %p2990_p1 = pnand %p1018_p5, %p1017_p6  ;;  %vm2996_vm3 = vcmp.ge.s32.totalorder %v2862_v19, %v1141_v49  ;;  %vm3001_vm4 = vcmp.lt.s32.totalorder %v2827_v6, %v1144_v50  ;;  %p1042_p9 = scmp.le.s32.totalorder %s3893_s28, 15  ;;  %vm3036_vm0 = vcmp.lt.s32.totalorder %v2862_v19, %v1144_v50  ;;  %vm3093_vm6 = vmand %vm2930_vm9, %vm2935_vm10 }
 0x13d   : > { %v1013_v9 = vstv %s1653_s3  ;;  %p1043_p7 = scmp.gt.s32.totalorder %s3899_s11, 15  ;;  %s3784_s13 = sld [smem:[#allocation17_spill]]  ;;  %v1035_v25 = vmax.f32 %v993_v10, %v3017_v14  ;;  %v1036_v26 = vmax.f32 %v994_v11, %v3020_v15  ;;  %v1046_v33 = vmax.f32 %v1004_v20, %v3017_v14  ;;  %vm3119_vm9 = vmand %vm2954_vm11, %vm2959_vm12 }
 0x13e   : > { %s1654_s5 = scalar_select %p2990_p1, 0, 1  ;;  %vm1014_vm8 = vcmp.eq.s32.totalorder %v1013_v9, 1  ;;  %v1047_v38 = vmax.f32 %v3051_v24, %v3020_v15  ;;  %vm3135_vm10 = vmand %vm2968_vm14, %vm2973_vm15  ;;  %vm3811_vm15 = vcmask 64512  }
 0x13f   : > { %v1171_v5 = vstv %s3772_s23  ;;  %p3027_p4 = pnand %p1032_p12, %p1031_p2  ;;  %p3031_p13 = pnand %p1043_p7, %p1042_p9  ;;  %v3058_v27 = vsel %vm1014_vm8, %v1010_v12, %v968_v62  ;;  %v3061_v28 = vsel %vm1014_vm8, %v1011_v13, %v969_v63  ;;  %vm3159_vm14 = vmand %vm2983_vm1, %vm3001_vm4 }
 0x140   : > { %vm3041_vm13 = vcmp.ge.s32.totalorder %v2827_v6, %v1171_v5  ;;  %v1024_v22 = vstv %s1654_s5  ;;  %p1053_p8 = scmp.le.s32.totalorder %s3907_s29, 15  ;;  %p1054_p11 = scmp.gt.s32.totalorder %s3913_s10, 15  ;;  %vm3075_vm2 = vcmp.ge.s32.totalorder %v2862_v19, %v1171_v5  ;;  %v1057_v41 = vmax.f32 %v3058_v27, %v3017_v14  ;;  %vm3175_vm1 = vmand %vm2996_vm3, %vm3036_vm0 }
 0x141   : > { %v3790_v18 = vsel %vm3041_vm13, 4294967295, %v3789_v18  ;;  %s1657_s7 = scalar_select %p3027_p4, 0, 1  ;;  %v3794_v31 = vsel %vm3075_vm2, 4294967295, %v3793_v31  ;;  %vm3802_vm2 = vcmp.eq.s32.totalorder %v1024_v22, 1  ;;  %v1058_v42 = vmax.f32 %v3061_v28, %v3020_v15 }
 0x142   : > { %s1658_s0 = scalar_select %p3031_p13, 0, 1  ;;  %v3108_v37 = vsel %vm3802_vm2, %v1021_v21, %v979_v7  ;;  %vm3807_vm11 = vmmov %vm3802_vm2  ;;  %vm3816_vm3 = vnez %v3790_v18 }
 0x143   : > { %v1174_v23 = vstv %s3784_s13  ;;  %v1038_v32 = vstv %s1657_s7  ;;  %p3084_p0 = pnand %p1054_p11, %p1053_p8  ;;  %p1064_p3 = scmp.le.s32.totalorder %s3921_s6, 15  ;;  %v3140_v44 = vsel %vm3807_vm11, %v1022_v29, %v980_v16  ;;  %v1068_v48 = vmax.f32 %v3108_v37, %v3017_v14  ;;  %vm3812_vm2 = vmmov %vm3811_vm15 }
 0x144   : > { %vm3098_vm7 = vcmp.lt.s32.totalorder %v2827_v6, %v1174_v23  ;;  %vm3103_vm8 = vcmp.lt.s32.totalorder %v2862_v19, %v1174_v23  ;;  %vm1039_vm13 = vcmp.eq.s32.totalorder %v1038_v32, 1  ;;  %v1049_v39 = vstv %s1658_s0  ;;  %p1065_p10 = scmp.gt.s32.totalorder %s3927_s9, 15  ;;  %p1078_p6 = scmp.le.s32.totalorder %s3879_s20, %s3881_s21  ;;  %vm3815_vm4 = vmmov %vm3812_vm2 }
 0x145   : > { %v1040_v19 = vsel %vm1039_vm13, %v1035_v25, %v993_v10  ;;  %v3123_v40 = vsel %vm1039_vm13, %v1036_v26, %v994_v11  ;;  %s1659_s14 = scalar_select %p3084_p0, 0, 1  ;;  %vm1050_vm12 = vcmp.eq.s32.totalorder %v1049_v39, 1  ;;  %vm3191_vm0 = vmand %vm3816_vm3, %vm3098_vm7  ;;  %v1069_v59 = vmax.f32 %v3140_v44, %v3020_v15 }
 0x146   : > { %p3144_p5 = pnand %p1065_p10, %p1064_p3  ;;  %v1091_v45 = vsel %vm3070_vm5, %v1040_v19, -inf  ;;  %v1092_v46 = vsel %vm3093_vm6, %v3123_v40, -inf  ;;  %p1103_p2 = scmp.le.s32.totalorder %s3751_s19, %s3749_s30  ;;  %v1123_v51 = vsel %vm3119_vm9, %v1040_v19, -inf  ;;  %v1124_v55 = vsel %vm3135_vm10, %v3123_v40, -inf  ;;  %vm3820_vm13 = vmmov %vm3812_vm2 }
 0x147   : > { %v1094_v49 = vsel %vm3811_vm15, %v1091_v45, -inf  ;;  %v1095_v50 = vsel %vm3812_vm2, %v1092_v46, -inf  ;;  %p1134_p1 = scmp.le.s32.totalorder %s3754_s24, %s3753_s18  ;;  %p1164_p12 = scmp.le.s32.totalorder %s3758_s25, %s3757_s15  ;;  %v1060_v53 = vstv %s1659_s14  ;;  %v1125_v56 = vsel %vm3815_vm4, %v1123_v51, -inf  ;;  %vm3826_vm4 = vmmov %vm3812_vm2 }
 0x148   : > { %s1660_s8 = scalar_select %p3144_p5, 0, 1  ;;  %v1096_v54 = vmax.f32 %v1094_v49, %v1095_v50  ;;  %v3196_v58 = vsel %vm1050_vm12, %v1046_v33, %v1004_v20  ;;  %v1126_v60 = vsel %vm3820_vm13, %v1124_v55, -inf  ;;  %v1153_v61 = vsel %vm3159_vm14, %v1040_v19, -inf  ;;  %vm3827_vm13 = vmmov %vm3812_vm2 }
 0x149   : > { %p3206_p9 = por %p1103_p2, %p1078_p6  ;;  %p3217_p7 = por %p1134_p1, %p1078_p6  ;;  %v1127_v0 = vmax.f32 %v1125_v56, %v1126_v60  ;;  %v1154_v1 = vsel %vm3175_vm1, %v3123_v40, -inf  ;;  %vm3823_vm7 = vnez %v3794_v31  ;;  %vm1061_vm15 = vcmp.eq.s32.totalorder %v1060_v53, 1 }
 0x14a   : > { %v3223_v62 = vstv %s1660_s8  ;;  %v1097_v63 = vrot.slane %v1096_v54, 4  ;;  %p3234_p4 = por %p1164_p12, %p1078_p6  ;;  %vm3242_vm11 = vmand %vm3823_vm7, %vm3103_vm8  ;;  %p1194_p13 = scmp.le.s32.totalorder %s3784_s13, %s3772_s23  ;;  %v1155_v3 = vsel %vm3812_vm2, %v1153_v61, -inf  ;;  %v1156_v4 = vsel %vm3826_vm4, %v1154_v1, -inf }
 0x14b   : > { %s1105_s1 = scalar_select %p3206_p9, 1, 0  ;;  %v1183_v5 = vsel %vm3191_vm0, %v1040_v19, -inf  ;;  %v3256_v7 = vsel %vm1050_vm12, %v1047_v38, %v3051_v24  ;;  %vm1072_vm8 = vcmp.eq.s32.totalorder %v3223_v62, 1  ;;  %vm1109_vm3 = vcmask 57344   ;;  %vm3830_vm7 = vmmov %vm3812_vm2 }
 0x14c   : > { %v1098_v8 = vmax.f32 %v1096_v54, %v1097_v63  ;;  %v1128_v9 = vrot.slane %v1127_v0, 4  ;;  %s1136_s3 = scalar_select %p3217_p7, 1, 0  ;;  %v1157_v11 = vmax.f32 %v1155_v3, %v1156_v4  ;;  %v1184_v12 = vsel %vm3242_vm11, %v3123_v40, -inf }
 0x14d   : > { %v1106_v10 = vstv %s1105_s1  ;;  %s1166_s16 = scalar_select %p3234_p4, 1, 0  ;;  %v1185_v13 = vsel %vm3827_vm13, %v1183_v5, -inf  ;;  %v3269_v14 = vsel %vm1061_vm15, %v1057_v41, %v3058_v27  ;;  %v3273_v16 = vsel %vm1061_vm15, %v1058_v42, %v3061_v28  ;;  %vm3832_vm15 = vmmov %vm3812_vm2 }
 0x14e   : > { %s3828_s5 = sld [smem:[#allocation9_spill]]  ;;  %v1099_v17 = vrot.slane %v1098_v8, 2  ;;  %v1129_v18 = vmax.f32 %v1127_v0, %v1128_v9  ;;  %p3281_p8 = por %p1194_p13, %p1078_p6  ;;  %v3290_v20 = vsel %vm1072_vm8, %v1068_v48, %v3108_v37  ;;  %vm1107_vm12 = vcmp.eq.s32.totalorder %v1106_v10, 1  ;;  %vm3835_vm13 = vmmov %vm3812_vm2 }
 0x14f   : > { %p1201_p11 = scmp.le.s32.totalorder %s3899_s11, %s3893_s28  ;;  %v1158_v21 = vrot.slane %v1157_v11, 4  ;;  %v1186_v22 = vsel %vm3830_vm7, %v1184_v12, -inf  ;;  %v1137_v25 = vstv %s1136_s3  ;;  %v1167_v28 = vstv %s1166_s16  ;;  %s3834_s14 = sld [smem:[#allocation21_spill]] }
 0x150   : > { %v1100_v23 = vmax.f32 %v1098_v8, %v1099_v17  ;;  %v1130_v24 = vrot.slane %v1129_v18, 2  ;;  %v1187_v26 = vmax.f32 %v1185_v13, %v1186_v22  ;;  %s1196_s20 = scalar_select %p3281_p8, 1, 0  ;;  %v1202_v29 = vsel %vm3070_vm5, %v3196_v58, -inf }
 0x151   : > { %v1159_v27 = vmax.f32 %v1157_v11, %v1158_v21  ;;  %v1203_v31 = vsel %vm3093_vm6, %v3256_v7, -inf  ;;  %p3308_p0 = por %p1201_p11, %p1103_p2  ;;  %v1219_v36 = vsel %vm3119_vm9, %v3196_v58, -inf  ;;  %v1204_v39 = vsel %vm3832_vm15, %v1202_v29, -inf  ;;  %p3323_p3 = por %p1201_p11, %p1134_p1 }
 0x152   : > { %v1101_v32 = vrot.slane %v1100_v23, 1  ;;  %v1131_v33 = vmax.f32 %v1129_v18, %v1130_v24  ;;  %v1188_v35 = vrot.slane %v1187_v26, 4  ;;  %v1197_v38 = vstv %s1196_s20  ;;  %p3358_p10 = por %p1201_p11, %p1164_p12  ;;  %p3374_p6 = por %p1201_p11, %p1194_p13 }
 0x153   : > { %v1160_v37 = vrot.slane %v1159_v27, 2  ;;  %v1205_v19 = vsel %vm3812_vm2, %v1203_v31, -inf  ;;  %vm1138_vm4 = vcmp.eq.s32.totalorder %v1137_v25, 1  ;;  %s1214_s8 = scalar_select %p3308_p0, 1, 0  ;;  %v1220_v48 = vsel %vm3135_vm10, %v3256_v7, -inf }
 0x154   : > { %s1664_s21 = sshll.u32 %s3828_s5, 4  ;;  %v1102_v40 = vmax.f32 %v1100_v23, %v1101_v32  ;;  %v1132_v41 = vrot.slane %v1131_v33, 1  ;;  %v1189_v42 = vmax.f32 %v1187_v26, %v1188_v35  ;;  %v1206_v45 = vmax.f32 %v1204_v39, %v1205_v19  ;;  %p1270_p5 = scmp.le.s32.totalorder %s3913_s10, %s3907_s29 }
 0x155   : > { %s3330_s2 = scalar_lea.vmem %s3834_s14, %s1664_s21  ;;  %v1161_v46 = vmax.f32 %v1159_v27, %v1160_v37  ;;  %v1221_v49 = vsel %vm3835_vm13, %v1219_v36, -inf  ;;  %vm1168_vm7 = vcmp.eq.s32.totalorder %v1167_v28, 1  ;;  %vm1198_vm15 = vcmp.eq.s32.totalorder %v1197_v38, 1  ;;  %p1339_p11 = scmp.le.s32.totalorder %s3927_s9, %s3921_s6 }
 0x156   : > { %v1108_v50 = vsel %vm1107_vm12, 0.0, %v1102_v40  ;;  %v1133_v51 = vmax.f32 %v1131_v33, %v1132_v41  ;;  %v1190_v53 = vrot.slane %v1189_v42, 2  ;;  %v1207_v54 = vrot.slane %v1206_v45, 4  ;;  %s1231_s4 = scalar_select %p3323_p3, 1, 0  ;;  %vm3837_vm12 = vmmov %vm3812_vm2 }
 0x157   : > { %1110 = vst.msk [vmem:[%s3330_s2] sm:$0x1] %vm1109_vm3, %v1108_v50  ;;  %v1162_v55 = vrot.slane %v1161_v46, 1  ;;  %v1222_v56 = vsel %vm3812_vm2, %v1220_v48, -inf  ;;  %v1215_v3 = vstv %s1214_s8  ;;  %v1236_v4 = vsel %vm3159_vm14, %v3196_v58, -inf  ;;  %p3414_p9 = por %p1270_p5, %p1103_p2  ;;  %p3429_p7 = por %p1270_p5, %p1134_p1 }
 0x158   : > { %v1139_v60 = vsel %vm1138_vm4, 0.0, %v1133_v51  ;;  %v1191_v61 = vmax.f32 %v1189_v42, %v1190_v53  ;;  %v1208_v63 = vmax.f32 %v1206_v45, %v1207_v54  ;;  %v1223_v0 = vmax.f32 %v1221_v49, %v1222_v56  ;;  %vm3838_vm4 = vmmov %vm3812_vm2  ;;  %s1248_s28 = scalar_select %p3358_p10, 1, 0 }
 0x159   : > { %1140 = vst.msk [vmem:[%s3330_s2 + $0x1] sm:$0x1] %vm1109_vm3, %v1139_v60  ;;  %v1163_v1 = vmax.f32 %v1161_v46, %v1162_v55  ;;  %v1237_v5 = vsel %vm3175_vm1, %v3256_v7, -inf  ;;  %v1238_v11 = vsel %vm3837_vm12, %v1236_v4, -inf  ;;  %v1232_v13 = vstv %s1231_s4  ;;  %s1265_s11 = scalar_select %p3374_p6, 1, 0  ;;  %vm3843_vm12 = vmmov %vm3812_vm2 }
 0x15a   : > { %v1192_v8 = vrot.slane %v1191_v61, 1  ;;  %v1209_v9 = vrot.slane %v1208_v63, 2  ;;  %v1224_v10 = vrot.slane %v1223_v0, 4  ;;  %v1239_v17 = vsel %vm3838_vm4, %v1237_v5, -inf  ;;  %vm3845_vm4 = vmmov %vm3812_vm2  ;;  %s1283_s16 = scalar_select %p3414_p9, 1, 0 }
 0x15b   : > { %v1169_v12 = vsel %vm1168_vm7, 0.0, %v1163_v1  ;;  %v1253_v18 = vsel %vm3191_vm0, %v3196_v58, -inf  ;;  %v1240_v24 = vmax.f32 %v1238_v11, %v1239_v17  ;;  %v3388_v58 = vsel %vm1072_vm8, %v1069_v59, %v3140_v44  ;;  %vm3840_vm7 = vmmov %vm3812_vm2  ;;  %s1300_s5 = scalar_select %p3429_p7, 1, 0 }
 0x15c   : > { %1170 = vst.msk [vmem:[%s3330_s2 + $0x2] sm:$0x1] %vm1109_vm3, %v1169_v12  ;;  %v1193_v21 = vmax.f32 %v1191_v61, %v1192_v8  ;;  %v1210_v22 = vmax.f32 %v1208_v63, %v1209_v9  ;;  %v1225_v23 = vmax.f32 %v1223_v0, %v1224_v10  ;;  %vm1216_vm13 = vcmp.eq.s32.totalorder %v1215_v3, 1  ;;  %p3462_p4 = por %p1270_p5, %p1164_p12  ;;  %p3482_p8 = por %p1270_p5, %p1194_p13 }
 0x15d   : > { %v1254_v25 = vsel %vm3242_vm11, %v3256_v7, -inf  ;;  %v1255_v26 = vsel %vm3840_vm7, %v1253_v18, -inf  ;;  %v1241_v62 = vrot.slane %v1240_v24, 4  ;;  %vm1233_vm8 = vcmp.eq.s32.totalorder %v1232_v13, 1  ;;  %p3517_p0 = por %p1339_p11, %p1103_p2  ;;  %p3531_p3 = por %p1339_p11, %p1134_p1 }
 0x15e   : > { %v1199_v27 = vsel %vm1198_vm15, 0.0, %v1193_v21  ;;  %v1211_v15 = vrot.slane %v1210_v22, 1  ;;  %v1226_v28 = vrot.slane %v1225_v23, 2  ;;  %v1256_v44 = vsel %vm3812_vm2, %v1254_v25, -inf  ;;  %vm3842_vm15 = vmmov %vm3812_vm2  ;;  %s1317_s21 = scalar_select %p3462_p4, 1, 0 }
 0x15f   : > { %1200 = vst.msk [vmem:[%s3330_s2 + $0x3] sm:$0x1] %vm1109_vm3, %v1199_v27  ;;  %v1271_v59 = vsel %vm3070_vm5, %v3269_v14, -inf  ;;  %v1272_v7 = vsel %vm3093_vm6, %v3273_v16, -inf  ;;  %v1242_v32 = vmax.f32 %v1240_v24, %v1241_v62  ;;  %v1257_v33 = vmax.f32 %v1255_v26, %v1256_v44  ;;  %s1334_s29 = scalar_select %p3482_p8, 1, 0 }
 0x160   : > { %v1212_v29 = vmax.f32 %v1210_v22, %v1211_v15  ;;  %v1227_v31 = vmax.f32 %v1225_v23, %v1226_v28  ;;  %v1249_v35 = vstv %s1248_s28  ;;  %v1273_v36 = vsel %vm3842_vm15, %v1271_v59, -inf  ;;  %vm3847_vm15 = vmmov %vm3845_vm4  ;;  %s1352_s30 = scalar_select %p3517_p0, 1, 0 }
 0x161   : > { %v1274_v37 = vsel %vm3843_vm12, %v1272_v7, -inf  ;;  %v1288_v38 = vsel %vm3119_vm9, %v3269_v14, -inf  ;;  %v1243_v40 = vrot.slane %v1242_v32, 2  ;;  %v1258_v41 = vrot.slane %v1257_v33, 4  ;;  %vm3848_vm12 = vmmov %vm3845_vm4  ;;  %s1369_s19 = scalar_select %p3531_p3, 1, 0 }
 0x162   : > { %v1217_v39 = vsel %vm1216_vm13, 0.0, %v1212_v29  ;;  %v1228_v19 = vrot.slane %v1227_v31, 1  ;;  %v1266_v42 = vstv %s1265_s11  ;;  %v1275_v45 = vmax.f32 %v1273_v36, %v1274_v37  ;;  %vm3846_vm13 = vmmov %vm3812_vm2  ;;  %p3556_p2 = por %p1339_p11, %p1164_p12  ;;  %p3576_p1 = por %p1339_p11, %p1194_p13 }
 0x163   : > { %1218 = vst.msk [vmem:[%s3330_s2 + $0x4] sm:$0x1] %vm1109_vm3, %v1217_v39  ;;  %v1289_v46 = vsel %vm3135_vm10, %v3273_v16, -inf  ;;  %v1290_v48 = vsel %vm3845_vm4, %v1288_v38, -inf  ;;  %v1244_v50 = vmax.f32 %v1242_v32, %v1243_v40  ;;  %v1259_v51 = vmax.f32 %v1257_v33, %v1258_v41 }
 0x164   : > { %v1229_v49 = vmax.f32 %v1227_v31, %v1228_v19  ;;  %v1291_v53 = vsel %vm3846_vm13, %v1289_v46, -inf  ;;  %vm1250_vm7 = vcmp.eq.s32.totalorder %v1249_v35, 1  ;;  %v1276_v54 = vrot.slane %v1275_v45, 4  ;;  %s1386_s15 = scalar_select %p3556_p2, 1, 0 }
 0x165   : > { %v1292_v55 = vmax.f32 %v1290_v48, %v1291_v53  ;;  %v1305_v56 = vsel %vm3159_vm14, %v3269_v14, -inf  ;;  %v1245_v61 = vrot.slane %v1244_v50, 1  ;;  %v1260_v63 = vrot.slane %v1259_v51, 2  ;;  %s1403_s6 = scalar_select %p3576_p1, 1, 0 }
 0x166   : > { %v1234_v60 = vsel %vm1233_vm8, 0.0, %v1229_v49  ;;  %vm1267_vm2 = vcmp.eq.s32.totalorder %v1266_v42, 1  ;;  %v1277_v0 = vmax.f32 %v1275_v45, %v1276_v54  ;;  %v1306_v3 = vsel %vm3175_vm1, %v3273_v16, -inf  ;;  %vm3850_vm8 = vmmov %vm3845_vm4 }
 0x167   : > { %1235 = vst.msk [vmem:[%s3330_s2 + $0x5] sm:$0x1] %vm1109_vm3, %v1234_v60  ;;  %v1293_v1 = vrot.slane %v1292_v55, 4  ;;  %v1307_v4 = vsel %vm3847_vm15, %v1305_v56, -inf  ;;  %v1246_v5 = vmax.f32 %v1244_v50, %v1245_v61  ;;  %v1261_v8 = vmax.f32 %v1259_v51, %v1260_v63  ;;  %vm3852_vm13 = vmmov %vm3850_vm8 }
 0x168   : > { %v1284_v9 = vstv %s1283_s16  ;;  %v1308_v10 = vsel %vm3848_vm12, %v1306_v3, -inf  ;;  %v1278_v11 = vrot.slane %v1277_v0, 2  ;;  %v1301_v13 = vstv %s1300_s5  ;;  %vm3853_vm15 = vmmov %vm3850_vm8 }
 0x169   : > { %v1294_v12 = vmax.f32 %v1292_v55, %v1293_v1  ;;  %v1309_v17 = vmax.f32 %v1307_v4, %v1308_v10  ;;  %v1251_v18 = vsel %vm1250_vm7, 0.0, %v1246_v5  ;;  %v1262_v21 = vrot.slane %v1261_v8, 1 }
 0x16a   : > { %v1322_v22 = vsel %vm3191_vm0, %v3269_v14, -inf  ;;  %v1323_v23 = vsel %vm3242_vm11, %v3273_v16, -inf  ;;  %1252 = vst.msk [vmem:[%s3330_s2 + $0x6] sm:$0x1] %vm1109_vm3, %v1251_v18  ;;  %v1279_v24 = vmax.f32 %v1277_v0, %v1278_v11  ;;  %vm1285_vm4 = vcmp.eq.s32.totalorder %v1284_v9, 1 }
 0x16b   : > { %v1295_v25 = vrot.slane %v1294_v12, 2  ;;  %v1310_v26 = vrot.slane %v1309_v17, 4  ;;  %v1324_v27 = vsel %vm3850_vm8, %v1322_v22, -inf  ;;  %v1263_v14 = vmax.f32 %v1261_v8, %v1262_v21 }
 0x16c   : > { %v1325_v16 = vsel %vm3852_vm13, %v1323_v23, -inf  ;;  %v1340_v15 = vsel %vm3070_vm5, %v3290_v20, -inf  ;;  %v1280_v28 = vrot.slane %v1279_v24, 1  ;;  %vm1302_vm7 = vcmp.eq.s32.totalorder %v1301_v13, 1  ;;  %vm3854_vm5 = vmmov %vm3850_vm8 }
 0x16d   : > { %v1296_v62 = vmax.f32 %v1294_v12, %v1295_v25  ;;  %v1311_v44 = vmax.f32 %v1309_v17, %v1310_v26  ;;  %v1326_v59 = vmax.f32 %v1324_v27, %v1325_v16  ;;  %v1268_v7 = vsel %vm1267_vm2, 0.0, %v1263_v14  ;;  %vm3859_vm2 = vmmov %vm3854_vm5 }
 0x16e   : > { %v1341_v29 = vsel %vm3093_vm6, %v3388_v58, -inf  ;;  %v1342_v30 = vsel %vm3853_vm15, %v1340_v15, -inf  ;;  %1269 = vst.msk [vmem:[%s3330_s2 + $0x7] sm:$0x1] %vm1109_vm3, %v1268_v7  ;;  %v1281_v31 = vmax.f32 %v1279_v24, %v1280_v28  ;;  %v1318_v36 = vstv %s1317_s21  ;;  %vm3856_vm6 = vmmov %vm3854_vm5 }
 0x16f   : > { %v1297_v32 = vrot.slane %v1296_v62, 1  ;;  %v1312_v33 = vrot.slane %v1311_v44, 2  ;;  %v1327_v35 = vrot.slane %v1326_v59, 4  ;;  %v1343_v34 = vsel %vm3854_vm5, %v1341_v29, -inf  ;;  %vm3860_vm12 = vmmov %vm3859_vm2 }
 0x170   : > { %v1357_v37 = vsel %vm3119_vm9, %v3290_v20, -inf  ;;  %v1358_v38 = vsel %vm3135_vm10, %v3388_v58, -inf  ;;  %v1286_v39 = vsel %vm1285_vm4, 0.0, %v1281_v31  ;;  %v1344_v6 = vmax.f32 %v1342_v30, %v1343_v34  ;;  %vm3857_vm9 = vmmov %vm3854_vm5 }
 0x171   : > { %v1298_v19 = vmax.f32 %v1296_v62, %v1297_v32  ;;  %v1313_v40 = vmax.f32 %v1311_v44, %v1312_v33  ;;  %v1328_v41 = vmax.f32 %v1326_v59, %v1327_v35  ;;  %1287 = vst.msk [vmem:[%s3330_s2 + $0x8] sm:$0x1] %vm1109_vm3, %v1286_v39  ;;  %v1359_v42 = vsel %vm3856_vm6, %v1357_v37, -inf }
 0x172   : > { %v1360_v43 = vsel %vm3857_vm9, %v1358_v38, -inf  ;;  %vm1319_vm10 = vcmp.eq.s32.totalorder %v1318_v36, 1  ;;  %v1345_v50 = vrot.slane %v1344_v6, 4  ;;  %v1374_v51 = vsel %vm3159_vm14, %v3290_v20, -inf }
 0x173   : > { %v1303_v45 = vsel %vm1302_vm7, 0.0, %v1298_v19  ;;  %v1314_v46 = vrot.slane %v1313_v40, 1  ;;  %v1329_v48 = vrot.slane %v1328_v41, 2  ;;  %v1361_v49 = vmax.f32 %v1359_v42, %v1360_v43 }
 0x174   : > { %1304 = vst.msk [vmem:[%s3330_s2 + $0x9] sm:$0x1] %vm1109_vm3, %v1303_v45  ;;  %v1375_v53 = vsel %vm3175_vm1, %v3388_v58, -inf  ;;  %v1335_v56 = vstv %s1334_s29  ;;  %v1346_v61 = vmax.f32 %v1344_v6, %v1345_v50  ;;  %v1376_v47 = vsel %vm3859_vm2, %v1374_v51, -inf  ;;  %vm3862_vm1 = vmmov %vm3859_vm2 }
 0x175   : > { %v1315_v54 = vmax.f32 %v1313_v40, %v1314_v46  ;;  %v1330_v55 = vmax.f32 %v1328_v41, %v1329_v48  ;;  %v1362_v60 = vrot.slane %v1361_v49, 4  ;;  %v1377_v63 = vsel %vm3860_vm12, %v1375_v53, -inf  ;;  %vm3863_vm8 = vmmov %vm3862_vm1 }
 0x176   : > { %v1378_v52 = vmax.f32 %v1376_v47, %v1377_v63  ;;  %vm1336_vm14 = vcmp.eq.s32.totalorder %v1335_v56, 1  ;;  %v1347_v4 = vrot.slane %v1346_v61, 2  ;;  %v1391_v5 = vsel %vm3191_vm0, %v3290_v20, -inf }
 0x177   : > { %v1320_v0 = vsel %vm1319_vm10, 0.0, %v1315_v54  ;;  %v1331_v1 = vrot.slane %v1330_v55, 1  ;;  %v1363_v3 = vmax.f32 %v1361_v49, %v1362_v60  ;;  %v1392_v8 = vsel %vm3242_vm11, %v3388_v58, -inf }
 0x178   : > { %1321 = vst.msk [vmem:[%s3330_s2 + $0xa] sm:$0x1] %vm1109_vm3, %v1320_v0  ;;  %v1379_v11 = vrot.slane %v1378_v52, 4  ;;  %v1393_v12 = vsel %vm3862_vm1, %v1391_v5, -inf  ;;  %v1348_v13 = vmax.f32 %v1346_v61, %v1347_v4  ;;  %v1353_v17 = vstv %s1352_s30 }
 0x179   : > { %v1332_v9 = vmax.f32 %v1330_v55, %v1331_v1  ;;  %v1364_v10 = vrot.slane %v1363_v3, 2  ;;  %v1370_v18 = vstv %s1369_s19  ;;  %v1394_v21 = vsel %vm3863_vm8, %v1392_v8, -inf }
 0x17a   : > { %v1380_v20 = vmax.f32 %v1378_v52, %v1379_v11  ;;  %v1395_v58 = vmax.f32 %v1393_v12, %v1394_v21  ;;  %v1349_v22 = vrot.slane %v1348_v13, 1  ;;  %vm1354_vm0 = vcmp.eq.s32.totalorder %v1353_v17, 1 }
 0x17b   : > { %v1337_v57 = vsel %vm1336_vm14, 0.0, %v1332_v9  ;;  %v1365_v2 = vmax.f32 %v1363_v3, %v1364_v10  ;;  %vm1371_vm11 = vcmp.eq.s32.totalorder %v1370_v18, 1  ;;  %v1387_v16 = vstv %s1386_s15 }
 0x17c   : > { %1338 = vst.msk [vmem:[%s3330_s2 + $0xb] sm:$0x1] %vm1109_vm3, %v1337_v57  ;;  %v1381_v24 = vrot.slane %v1380_v20, 2  ;;  %v1396_v25 = vrot.slane %v1395_v58, 4  ;;  %v1350_v26 = vmax.f32 %v1348_v13, %v1349_v22  ;;  %vm1388_vm4 = vcmp.eq.s32.totalorder %v1387_v16, 1 }
 0x17d   : > { %v1366_v23 = vrot.slane %v1365_v2, 1  ;;  %v1404_v30 = vstv %s1403_s6 }
 0x17e   : > { %v1382_v14 = vmax.f32 %v1380_v20, %v1381_v24  ;;  %v1397_v15 = vmax.f32 %v1395_v58, %v1396_v25  ;;  %v1355_v28 = vsel %vm1354_vm0, 0.0, %v1350_v26  ;;  %vm1405_vm13 = vcmp.eq.s32.totalorder %v1404_v30, 1 }
 0x17f   : > { %v1367_v27 = vmax.f32 %v1365_v2, %v1366_v23  ;;  %1356 = vst.msk [vmem:[%s3330_s2 + $0xc] sm:$0x1] %vm1109_vm3, %v1355_v28 }
 0x180   : > { %v1383_v44 = vrot.slane %v1382_v14, 1  ;;  %v1398_v59 = vrot.slane %v1397_v15, 2 }
 0x181   : > { %v1372_v62 = vsel %vm1371_vm11, 0.0, %v1367_v27 }
 0x182   : > { %1373 = vst.msk [vmem:[%s3330_s2 + $0xd] sm:$0x1] %vm1109_vm3, %v1372_v62  ;;  %v1384_v7 = vmax.f32 %v1382_v14, %v1383_v44  ;;  %v1399_v29 = vmax.f32 %v1397_v15, %v1398_v59 }
 0x184   : > { %v1389_v31 = vsel %vm1388_vm4, 0.0, %v1384_v7  ;;  %v1400_v32 = vrot.slane %v1399_v29, 1 }
 0x185   : > { %1390 = vst.msk [vmem:[%s3330_s2 + $0xe] sm:$0x1] %vm1109_vm3, %v1389_v31 }
 0x186   : > { %v1401_v33 = vmax.f32 %v1399_v29, %v1400_v32 }
 0x188   : > { %v1406_v35 = vsel %vm1405_vm13, 0.0, %v1401_v33 }
 0x189   : > { %1407 = vst.msk [vmem:[%s3330_s2 + $0xf] sm:$0x1] %vm1109_vm3, %v1406_v35 }
 0x18a PF: > { %s3865_s9 = sld [smem:[#allocation8_spill]] }
 0x190   : > { %s20_s17 = sadd.s32 1, %s3865_s9  }
 0x191   : > { %p17_p12 = scmp.ge.s32.totalorder %s20_s17, 10  }
 0x193   :  { %19 = sbr.rel (!%p17_p12) target bundleno = 17 (0x11), region = 78 }
 0x19a   :  { %1429 = vsyncpa [#allocation5], 1 }
 0x19b   :  { %1431 = vsyncpa [#allocation5 + $0x1], 1 }

</bundles_post_ra>
